<compile_context>
chip_gen: v5e
topology: v5e:2x2
jax: 0.10.0
libtpu: 0.0.40
codegen_flags: <defaults>
</compile_context>

<pallas_src>
import functools

import jax
import jax.numpy as jnp
from jax import lax
from jax.experimental import pallas as pl
from jax.experimental.pallas import tpu as pltpu


def _inception_conv_kernel(x_ref, w_ref, b_ref, o_ref, patch_ref,
                           *, TF, Wp, P, K, Cin, n_tiles):
    """One (batch, spatial-tile) step of the combined KxK 'same' convolution.

    x_ref     : (1, Cin, S_in)     bf16 flattened, spatially padded NCHW image
                                   (resident across the tile axis)
    w_ref     : (Cout_p, K*K*Cin)  bf16 combined weight, channel-major rows
    b_ref     : (Cout_p, 1)        f32 combined bias
    o_ref     : (1, Cout_p, TF)    f32 channel-major output chunk over the
                                   padded-width flat spatial axis
    patch_ref : (K*K*Cin, TF)      bf16 im2col patch scratch
    """
    halo = 2 * P * Wp + 2 * P

    if n_tiles == 1:
        # Fully static path: every tap is a static window of the resident ref.
        def window(off):
            return x_ref[0, :, off:off + TF]
    else:
        # Load the halo'd slab ONCE per step; taps are static windows into it.
        base = pl.multiple_of(pl.program_id(1) * TF, 128)   # TF % 128 == 0 here
        # TODO(synk): dynamic lane-offset slicing needs a recent Mosaic; fall
        # back to row-based tiling if this ever fails to lower.
        slab = x_ref[0, :, pl.ds(base, TF + halo)]

        def window(off):
            return lax.slice_in_dim(slab, off, off + TF, axis=1)

    # Flat shifted-window im2col: tap (kh, kw) lands at rows [(kh*K+kw)*Cin, ...).
    for kh in range(K):                        # static unroll over taps
        for kw in range(K):
            off = kh * Wp + kw
            r0 = (kh * K + kw) * Cin
            patch_ref[r0:r0 + Cin, :] = window(off)

    # ONE deep-contraction MXU matmul per step, f32 accumulation.
    acc = jnp.dot(w_ref[...], patch_ref[...],
                  preferred_element_type=jnp.float32)
    o_ref[0] = (acc + b_ref[...]).astype(o_ref.dtype)


def _vmem_capacity_bytes():
    """Per-generation VMEM capacity (guarded; falls back to the v7x 64 MiB)."""
    try:
        info = pltpu.get_tpu_info()
        for attr in ("vmem_capacity_bytes", "vmem_size_bytes", "vmem_bytes"):
            v = getattr(info, attr, None)
            if v:
                return int(v)
    except Exception:
        pass
    return 64 * 1024 * 1024


def _pick_flat_tile(total_flat, halo, Cin, Cout_p, KKC, S_in, budget_bytes):
    """Largest tile of the flat (padded-width) spatial axis whose per-step
    working set fits the VMEM budget.  Non-full tiles must be multiples of 128
    so output blocks stay lane-tile aligned."""
    def need(tf):
        x_res = 2 * Cin * S_in * 2        # resident padded image, double-buffered
        w_res = 2 * Cout_p * KKC * 2      # combined weight, double-buffered
        o_blk = 2 * Cout_p * tf * 4       # output block, double-buffered
        slab = Cin * (tf + halo) * 2      # per-step halo slab
        patch = KKC * tf * 2              # im2col patch scratch
        acc = Cout_p * tf * 4             # matmul result before store
        return x_res + w_res + o_blk + slab + patch + acc

    if need(total_flat) <= budget_bytes:
        return total_flat
    cands = [total_flat // n for n in range(2, total_flat + 1)
             if total_flat % n == 0 and (total_flat // n) % 128 == 0]
    for tf in cands:                      # descending
        if need(tf) <= budget_bytes:
            return tf
    # TODO(synk): pad H*Wp up to a tileable multiple of 128 when no divisor fits.
    return cands[-1] if cands else total_flat


def init_inception_params(key, in_channels, out_channels, num_kernels):
    """Deterministic kaiming_normal_(mode='fan_out', relu) init, bias = 0."""
    weights, biases = [], []
    for i in range(num_kernels):
        k = 2 * i + 1
        key, sub = jax.random.split(key)
        fan_out = out_channels * k * k
        std = (2.0 / fan_out) ** 0.5
        w = jax.random.normal(sub, (k, k, in_channels, out_channels), jnp.float32) * std
        weights.append(w)
        biases.append(jnp.zeros((out_channels,), jnp.float32))
    return weights, biases


@functools.partial(jax.jit, static_argnums=(3,))
def inception_block_v1(x_nchw, weights, biases, num_kernels):
    """Forward pass matching Inception_Block_V1.forward (NCHW in, NCHW out)."""
    N, Cin, H, W = x_nchw.shape
    Cout = weights[0].shape[-1]
    P = num_kernels - 1
    K = 2 * P + 1
    KKC = K * K * Cin
    Cout_p = ((Cout + 7) // 8) * 8
    Hp, Wp = H + 2 * P, W + 2 * P

    # --- combine the branches (conv is linear): mean of center-aligned,
    # zero-padded kernels; mean of the biases. ---------------------------------
    w_comb = jnp.zeros((K, K, Cin, Cout), jnp.float32)
    for i, w in enumerate(weights):
        off = P - i
        k = 2 * i + 1
        w_comb = w_comb.at[off:off + k, off:off + k].add(w)
    w_comb = w_comb / num_kernels
    # Channel-major matmul LHS: row = cout, column = (kh, kw, cin).
    w_mat = jnp.transpose(w_comb, (3, 0, 1, 2)).reshape(Cout, KKC)
    w_mat = jnp.pad(w_mat, ((0, Cout_p - Cout), (0, 0))).astype(jnp.bfloat16)
    b_mat = jnp.pad(sum(biases) / num_kernels, (0, Cout_p - Cout))
    b_mat = b_mat.reshape(Cout_p, 1).astype(jnp.float32)

    # --- activation plumbing: NO transpose (kernel is NCHW end-to-end).
    # Spatial zero-pad (one extra zero row so every shifted window stays in
    # bounds), bf16 cast, and a free contiguous flatten.  allow_input_fusion
    # below lets XLA fold this into the kernel's input path.
    x_flat = jnp.pad(x_nchw, ((0, 0), (0, 0), (P, P + 1), (P, P)))
    x_flat = x_flat.astype(jnp.bfloat16).reshape(N, Cin, (Hp + 1) * Wp)
    S_in = (Hp + 1) * Wp

    # --- per-generation tiling / VMEM budget (128 MiB v5e/v6e, 64 MiB v7x). ---
    vmem_limit = int(_vmem_capacity_bytes() * 3 // 4)
    total_flat = H * Wp                    # output over the padded width
    halo = 2 * P * Wp + 2 * P
    TF = _pick_flat_tile(total_flat, halo, Cin, Cout_p, KKC, S_in,
                         int(vmem_limit * 0.6))
    n_t = total_flat // TF

    kernel = functools.partial(_inception_conv_kernel,
                               TF=TF, Wp=Wp, P=P, K=K, Cin=Cin, n_tiles=n_t)
    out = pl.pallas_call(
        kernel,
        out_shape=jax.ShapeDtypeStruct((N, Cout_p, total_flat), jnp.float32),
        grid_spec=pltpu.PrefetchScalarGridSpec(
            num_scalar_prefetch=0,
            grid=(N, n_t),
            in_specs=[
                # Whole padded image; the block index ignores the tile axis so
                # it stays resident while spatial tiles iterate.
                # TODO(synk): pipeline_mode=pl.Buffered(1) would halve this
                # buffer's VMEM (it only changes when n changes) — useful on v7x.
                pl.BlockSpec((1, Cin, S_in), lambda n, t: (n, 0, 0)),
                pl.BlockSpec((Cout_p, KKC), lambda n, t: (0, 0)),
                pl.BlockSpec((Cout_p, 1), lambda n, t: (0, 0)),
            ],
            out_specs=pl.BlockSpec((1, Cout_p, TF), lambda n, t: (n, 0, t)),
            scratch_shapes=[pltpu.VMEM((KKC, TF), jnp.bfloat16)],
        ),
        compiler_params=pltpu.CompilerParams(
            # N >= 2 carries the megacore split (tile axis "arbitrary" so both
            # cores do not each re-DMA the resident image); when N == 1 the
            # tile axis is the parallel one.
            dimension_semantics=("parallel",
                                 "parallel" if N == 1 else "arbitrary"),
            vmem_limit_bytes=vmem_limit,
            allow_input_fusion=[True, False, False],
        ),
    )(x_flat, w_mat, b_mat)

    # Strip the Cout padding and the padded-width garbage columns.  This is a
    # Cout-wide (not 128-wide) slice; in a real model it fuses into the consumer.
    out = out.reshape(N, Cout_p, H, Wp)[:, :Cout, :, :W]
    return out


def _reference(x_nchw, weights, biases, num_kernels):
    """Pure-JAX f32 reference: per-branch convs, stack, mean (mirrors torch forward)."""
    x = jnp.transpose(x_nchw, (0, 2, 3, 1)).astype(jnp.float32)
    outs = []
    for i in range(num_kernels):
        o = lax.conv_general_dilated(
            x, weights[i], window_strides=(1, 1),
            padding=((i, i), (i, i)),
            dimension_numbers=("NHWC", "HWIO", "NHWC"))
        outs.append(o + biases[i][None, None, None, :])
    res = jnp.mean(jnp.stack(outs, axis=-1), axis=-1)
    return jnp.transpose(res, (0, 3, 1, 2))


if __name__ == "__main__":
    # Small shapes consistent with the module: NCHW input, Conv2d branches.
    N, Cin, H, W = 2, 4, 16, 16
    Cout = 8
    num_kernels = 6  # module default

    key = jax.random.PRNGKey(0)
    key, xk = jax.random.split(key)
    x = jax.random.normal(xk, (N, Cin, H, W), jnp.float32)
    weights, biases = init_inception_params(key, Cin, Cout, num_kernels)

    out = jax.block_until_ready(inception_block_v1(x, weights, biases, num_kernels))
    ref = jax.block_until_ready(_reference(x, weights, biases, num_kernels))

    assert out.shape == (N, Cout, H, W), out.shape
    max_err = float(jnp.max(jnp.abs(out - ref)))
    # bf16 MXU inputs with f32 accumulation -> small absolute error vs f32 reference.
    assert max_err < 3e-2, max_err

    print("KERNEL_OK")
</pallas_src>

<mosaic_0001>
module attributes {stable_mosaic.version = 11 : i64} {
  func.func @_inception_conv_kernel(%arg0: i32, %arg1: i32, %arg2: memref<1x4x702xbf16, #tpu.memory_space<vmem>>, %arg3: memref<8x484xbf16, #tpu.memory_space<vmem>>, %arg4: memref<8x1xf32, #tpu.memory_space<vmem>>, %arg5: memref<1x8x416xf32, #tpu.memory_space<vmem>>, %arg6: memref<484x416xbf16, #tpu.memory_space<vmem>>) attributes {dimension_semantics = [#tpu.dimension_semantics<parallel>, #tpu.dimension_semantics<arbitrary>], iteration_bounds = array<i64: 2, 1>, scalar_prefetch = 0 : i64, scratch_operands = 1 : i64, tpu.core_type = #tpu.core_type<tc>, window_params = [{transform_indices = @transform_0, window_bounds = array<i64: 1, 4, 702>}, {pipeline_mode = #tpu.pipeline_mode<synchronous>, transform_indices = @transform_1, window_bounds = array<i64: 8, 484>}, {pipeline_mode = #tpu.pipeline_mode<synchronous>, transform_indices = @transform_2, window_bounds = array<i64: 8, 1>}, {transform_indices = @transform_3, window_bounds = array<i64: 1, 8, 416>}]} {
    %c0 = arith.constant 0 : index
    %c0_0 = arith.constant 0 : index
    %c0_1 = arith.constant 0 : index
    %0 = vector.load %arg2[%c0, %c0_0, %c0_1] : memref<1x4x702xbf16, #tpu.memory_space<vmem>>, vector<1x4x416xbf16>
    %1 = vector.shape_cast %0 : vector<1x4x416xbf16> to vector<4x416xbf16>
    %c0_2 = arith.constant 0 : index
    %c0_3 = arith.constant 0 : index
    %2 = vector.load %arg6[%c0_2, %c0_3] : memref<484x416xbf16, #tpu.memory_space<vmem>>, vector<4x416xbf16>
    tpu.vector_store %arg6[%c0_2, %c0_3], %1 {strides = array<i32>} : memref<484x416xbf16, #tpu.memory_space<vmem>>, vector<4x416xbf16>,
    %c0_4 = arith.constant 0 : index
    %c0_5 = arith.constant 0 : index
    %c1 = arith.constant 1 : index
    %3 = vector.load %arg2[%c0_4, %c0_5, %c1] : memref<1x4x702xbf16, #tpu.memory_space<vmem>>, vector<1x4x416xbf16>
    %4 = vector.shape_cast %3 : vector<1x4x416xbf16> to vector<4x416xbf16>
    %c4 = arith.constant 4 : index
    %c0_6 = arith.constant 0 : index
    %5 = vector.load %arg6[%c4, %c0_6] : memref<484x416xbf16, #tpu.memory_space<vmem>>, vector<4x416xbf16>
    tpu.vector_store %arg6[%c4, %c0_6], %4 {strides = array<i32>} : memref<484x416xbf16, #tpu.memory_space<vmem>>, vector<4x416xbf16>,
    %c0_7 = arith.constant 0 : index
    %c0_8 = arith.constant 0 : index
    %c2 = arith.constant 2 : index
    %6 = vector.load %arg2[%c0_7, %c0_8, %c2] : memref<1x4x702xbf16, #tpu.memory_space<vmem>>, vector<1x4x416xbf16>
    %7 = vector.shape_cast %6 : vector<1x4x416xbf16> to vector<4x416xbf16>
    %c8 = arith.constant 8 : index
    %c0_9 = arith.constant 0 : index
    %8 = vector.load %arg6[%c8, %c0_9] : memref<484x416xbf16, #tpu.memory_space<vmem>>, vector<4x416xbf16>
    tpu.vector_store %arg6[%c8, %c0_9], %7 {strides = array<i32>} : memref<484x416xbf16, #tpu.memory_space<vmem>>, vector<4x416xbf16>,
    %c0_10 = arith.constant 0 : index
    %c0_11 = arith.constant 0 : index
    %c3 = arith.constant 3 : index
    %9 = vector.load %arg2[%c0_10, %c0_11, %c3] : memref<1x4x702xbf16, #tpu.memory_space<vmem>>, vector<1x4x416xbf16>
    %10 = vector.shape_cast %9 : vector<1x4x416xbf16> to vector<4x416xbf16>
    %c12 = arith.constant 12 : index
    %c0_12 = arith.constant 0 : index
    %11 = vector.load %arg6[%c12, %c0_12] : memref<484x416xbf16, #tpu.memory_space<vmem>>, vector<4x416xbf16>
    tpu.vector_store %arg6[%c12, %c0_12], %10 {strides = array<i32>} : memref<484x416xbf16, #tpu.memory_space<vmem>>, vector<4x416xbf16>,
    %c0_13 = arith.constant 0 : index
    %c0_14 = arith.constant 0 : index
    %c4_15 = arith.constant 4 : index
    %12 = vector.load %arg2[%c0_13, %c0_14, %c4_15] : memref<1x4x702xbf16, #tpu.memory_space<vmem>>, vector<1x4x416xbf16>
    %13 = vector.shape_cast %12 : vector<1x4x416xbf16> to vector<4x416xbf16>
    %c16 = arith.constant 16 : index
    %c0_16 = arith.constant 0 : index
    %14 = vector.load %arg6[%c16, %c0_16] : memref<484x416xbf16, #tpu.memory_space<vmem>>, vector<4x416xbf16>
    tpu.vector_store %arg6[%c16, %c0_16], %13 {strides = array<i32>} : memref<484x416xbf16, #tpu.memory_space<vmem>>, vector<4x416xbf16>,
    %c0_17 = arith.constant 0 : index
    %c0_18 = arith.constant 0 : index
    %c5 = arith.constant 5 : index
    %15 = vector.load %arg2[%c0_17, %c0_18, %c5] : memref<1x4x702xbf16, #tpu.memory_space<vmem>>, vector<1x4x416xbf16>
    %16 = vector.shape_cast %15 : vector<1x4x416xbf16> to vector<4x416xbf16>
    %c20 = arith.constant 20 : index
    %c0_19 = arith.constant 0 : index
    %17 = vector.load %arg6[%c20, %c0_19] : memref<484x416xbf16, #tpu.memory_space<vmem>>, vector<4x416xbf16>
    tpu.vector_store %arg6[%c20, %c0_19], %16 {strides = array<i32>} : memref<484x416xbf16, #tpu.memory_space<vmem>>, vector<4x416xbf16>,
    %c0_20 = arith.constant 0 : index
    %c0_21 = arith.constant 0 : index
    %c6 = arith.constant 6 : index
    %18 = vector.load %arg2[%c0_20, %c0_21, %c6] : memref<1x4x702xbf16, #tpu.memory_space<vmem>>, vector<1x4x416xbf16>
    %19 = vector.shape_cast %18 : vector<1x4x416xbf16> to vector<4x416xbf16>
    %c24 = arith.constant 24 : index
    %c0_22 = arith.constant 0 : index
    %20 = vector.load %arg6[%c24, %c0_22] : memref<484x416xbf16, #tpu.memory_space<vmem>>, vector<4x416xbf16>
    tpu.vector_store %arg6[%c24, %c0_22], %19 {strides = array<i32>} : memref<484x416xbf16, #tpu.memory_space<vmem>>, vector<4x416xbf16>,
    %c0_23 = arith.constant 0 : index
    %c0_24 = arith.constant 0 : index
    %c7 = arith.constant 7 : index
    %21 = vector.load %arg2[%c0_23, %c0_24, %c7] : memref<1x4x702xbf16, #tpu.memory_space<vmem>>, vector<1x4x416xbf16>
    %22 = vector.shape_cast %21 : vector<1x4x416xbf16> to vector<4x416xbf16>
    %c28 = arith.constant 28 : index
    %c0_25 = arith.constant 0 : index
    %23 = vector.load %arg6[%c28, %c0_25] : memref<484x416xbf16, #tpu.memory_space<vmem>>, vector<4x416xbf16>
    tpu.vector_store %arg6[%c28, %c0_25], %22 {strides = array<i32>} : memref<484x416xbf16, #tpu.memory_space<vmem>>, vector<4x416xbf16>,
    %c0_26 = arith.constant 0 : index
    %c0_27 = arith.constant 0 : index
    %c8_28 = arith.constant 8 : index
    %24 = vector.load %arg2[%c0_26, %c0_27, %c8_28] : memref<1x4x702xbf16, #tpu.memory_space<vmem>>, vector<1x4x416xbf16>
    %25 = vector.shape_cast %24 : vector<1x4x416xbf16> to vector<4x416xbf16>
    %c32 = arith.constant 32 : index
    %c0_29 = arith.constant 0 : index
    %26 = vector.load %arg6[%c32, %c0_29] : memref<484x416xbf16, #tpu.memory_space<vmem>>, vector<4x416xbf16>
    tpu.vector_store %arg6[%c32, %c0_29], %25 {strides = array<i32>} : memref<484x416xbf16, #tpu.memory_space<vmem>>, vector<4x416xbf16>,
    %c0_30 = arith.constant 0 : index
    %c0_31 = arith.constant 0 : index
    %c9 = arith.constant 9 : index
    %27 = vector.load %arg2[%c0_30, %c0_31, %c9] : memref<1x4x702xbf16, #tpu.memory_space<vmem>>, vector<1x4x416xbf16>
    %28 = vector.shape_cast %27 : vector<1x4x416xbf16> to vector<4x416xbf16>
    %c36 = arith.constant 36 : index
    %c0_32 = arith.constant 0 : index
    %29 = vector.load %arg6[%c36, %c0_32] : memref<484x416xbf16, #tpu.memory_space<vmem>>, vector<4x416xbf16>
    tpu.vector_store %arg6[%c36, %c0_32], %28 {strides = array<i32>} : memref<484x416xbf16, #tpu.memory_space<vmem>>, vector<4x416xbf16>,
    %c0_33 = arith.constant 0 : index
    %c0_34 = arith.constant 0 : index
    %c10 = arith.constant 10 : index
    %30 = vector.load %arg2[%c0_33, %c0_34, %c10] : memref<1x4x702xbf16, #tpu.memory_space<vmem>>, vector<1x4x416xbf16>
    %31 = vector.shape_cast %30 : vector<1x4x416xbf16> to vector<4x416xbf16>
    %c40 = arith.constant 40 : index
    %c0_35 = arith.constant 0 : index
    %32 = vector.load %arg6[%c40, %c0_35] : memref<484x416xbf16, #tpu.memory_space<vmem>>, vector<4x416xbf16>
    tpu.vector_store %arg6[%c40, %c0_35], %31 {strides = array<i32>} : memref<484x416xbf16, #tpu.memory_space<vmem>>, vector<4x416xbf16>,
    %c0_36 = arith.constant 0 : index
    %c0_37 = arith.constant 0 : index
    %c26 = arith.constant 26 : index
    %33 = vector.load %arg2[%c0_36, %c0_37, %c26] : memref<1x4x702xbf16, #tpu.memory_space<vmem>>, vector<1x4x416xbf16>
    %34 = vector.shape_cast %33 : vector<1x4x416xbf16> to vector<4x416xbf16>
    %c44 = arith.constant 44 : index
    %c0_38 = arith.constant 0 : index
    %35 = vector.load %arg6[%c44, %c0_38] : memref<484x416xbf16, #tpu.memory_space<vmem>>, vector<4x416xbf16>
    tpu.vector_store %arg6[%c44, %c0_38], %34 {strides = array<i32>} : memref<484x416xbf16, #tpu.memory_space<vmem>>, vector<4x416xbf16>,
    %c0_39 = arith.constant 0 : index
    %c0_40 = arith.constant 0 : index
    %c27 = arith.constant 27 : index
    %36 = vector.load %arg2[%c0_39, %c0_40, %c27] : memref<1x4x702xbf16, #tpu.memory_space<vmem>>, vector<1x4x416xbf16>
    %37 = vector.shape_cast %36 : vector<1x4x416xbf16> to vector<4x416xbf16>
    %c48 = arith.constant 48 : index
    %c0_41 = arith.constant 0 : index
    %38 = vector.load %arg6[%c48, %c0_41] : memref<484x416xbf16, #tpu.memory_space<vmem>>, vector<4x416xbf16>
    tpu.vector_store %arg6[%c48, %c0_41], %37 {strides = array<i32>} : memref<484x416xbf16, #tpu.memory_space<vmem>>, vector<4x416xbf16>,
    %c0_42 = arith.constant 0 : index
    %c0_43 = arith.constant 0 : index
    %c28_44 = arith.constant 28 : index
    %39 = vector.load %arg2[%c0_42, %c0_43, %c28_44] : memref<1x4x702xbf16, #tpu.memory_space<vmem>>, vector<1x4x416xbf16>
    %40 = vector.shape_cast %39 : vector<1x4x416xbf16> to vector<4x416xbf16>
    %c52 = arith.constant 52 : index
    %c0_45 = arith.constant 0 : index
    %41 = vector.load %arg6[%c52, %c0_45] : memref<484x416xbf16, #tpu.memory_space<vmem>>, vector<4x416xbf16>
    tpu.vector_store %arg6[%c52, %c0_45], %40 {strides = array<i32>} : memref<484x416xbf16, #tpu.memory_space<vmem>>, vector<4x416xbf16>,
    %c0_46 = arith.constant 0 : index
    %c0_47 = arith.constant 0 : index
    %c29 = arith.constant 29 : index
    %42 = vector.load %arg2[%c0_46, %c0_47, %c29] : memref<1x4x702xbf16, #tpu.memory_space<vmem>>, vector<1x4x416xbf16>
    %43 = vector.shape_cast %42 : vector<1x4x416xbf16> to vector<4x416xbf16>
    %c56 = arith.constant 56 : index
    %c0_48 = arith.constant 0 : index
    %44 = vector.load %arg6[%c56, %c0_48] : memref<484x416xbf16, #tpu.memory_space<vmem>>, vector<4x416xbf16>
    tpu.vector_store %arg6[%c56, %c0_48], %43 {strides = array<i32>} : memref<484x416xbf16, #tpu.memory_space<vmem>>, vector<4x416xbf16>,
    %c0_49 = arith.constant 0 : index
    %c0_50 = arith.constant 0 : index
    %c30 = arith.constant 30 : index
    %45 = vector.load %arg2[%c0_49, %c0_50, %c30] : memref<1x4x702xbf16, #tpu.memory_space<vmem>>, vector<1x4x416xbf16>
    %46 = vector.shape_cast %45 : vector<1x4x416xbf16> to vector<4x416xbf16>
    %c60 = arith.constant 60 : index
    %c0_51 = arith.constant 0 : index
    %47 = vector.load %arg6[%c60, %c0_51] : memref<484x416xbf16, #tpu.memory_space<vmem>>, vector<4x416xbf16>
    tpu.vector_store %arg6[%c60, %c0_51], %46 {strides = array<i32>} : memref<484x416xbf16, #tpu.memory_space<vmem>>, vector<4x416xbf16>,
    %c0_52 = arith.constant 0 : index
    %c0_53 = arith.constant 0 : index
    %c31 = arith.constant 31 : index
    %48 = vector.load %arg2[%c0_52, %c0_53, %c31] : memref<1x4x702xbf16, #tpu.memory_space<vmem>>, vector<1x4x416xbf16>
    %49 = vector.shape_cast %48 : vector<1x4x416xbf16> to vector<4x416xbf16>
    %c64 = arith.constant 64 : index
    %c0_54 = arith.constant 0 : index
    %50 = vector.load %arg6[%c64, %c0_54] : memref<484x416xbf16, #tpu.memory_space<vmem>>, vector<4x416xbf16>
    tpu.vector_store %arg6[%c64, %c0_54], %49 {strides = array<i32>} : memref<484x416xbf16, #tpu.memory_space<vmem>>, vector<4x416xbf16>,
    %c0_55 = arith.constant 0 : index
    %c0_56 = arith.constant 0 : index
    %c32_57 = arith.constant 32 : index
    %51 = vector.load %arg2[%c0_55, %c0_56, %c32_57] : memref<1x4x702xbf16, #tpu.memory_space<vmem>>, vector<1x4x416xbf16>
    %52 = vector.shape_cast %51 : vector<1x4x416xbf16> to vector<4x416xbf16>
    %c68 = arith.constant 68 : index
    %c0_58 = arith.constant 0 : index
    %53 = vector.load %arg6[%c68, %c0_58] : memref<484x416xbf16, #tpu.memory_space<vmem>>, vector<4x416xbf16>
    tpu.vector_store %arg6[%c68, %c0_58], %52 {strides = array<i32>} : memref<484x416xbf16, #tpu.memory_space<vmem>>, vector<4x416xbf16>,
    %c0_59 = arith.constant 0 : index
    %c0_60 = arith.constant 0 : index
    %c33 = arith.constant 33 : index
    %54 = vector.load %arg2[%c0_59, %c0_60, %c33] : memref<1x4x702xbf16, #tpu.memory_space<vmem>>, vector<1x4x416xbf16>
    %55 = vector.shape_cast %54 : vector<1x4x416xbf16> to vector<4x416xbf16>
    %c72 = arith.constant 72 : index
    %c0_61 = arith.constant 0 : index
    %56 = vector.load %arg6[%c72, %c0_61] : memref<484x416xbf16, #tpu.memory_space<vmem>>, vector<4x416xbf16>
    tpu.vector_store %arg6[%c72, %c0_61], %55 {strides = array<i32>} : memref<484x416xbf16, #tpu.memory_space<vmem>>, vector<4x416xbf16>,
    %c0_62 = arith.constant 0 : index
    %c0_63 = arith.constant 0 : index
    %c34 = arith.constant 34 : index
    %57 = vector.load %arg2[%c0_62, %c0_63, %c34] : memref<1x4x702xbf16, #tpu.memory_space<vmem>>, vector<1x4x416xbf16>
    %58 = vector.shape_cast %57 : vector<1x4x416xbf16> to vector<4x416xbf16>
    %c76 = arith.constant 76 : index
    %c0_64 = arith.constant 0 : index
    %59 = vector.load %arg6[%c76, %c0_64] : memref<484x416xbf16, #tpu.memory_space<vmem>>, vector<4x416xbf16>
    tpu.vector_store %arg6[%c76, %c0_64], %58 {strides = array<i32>} : memref<484x416xbf16, #tpu.memory_space<vmem>>, vector<4x416xbf16>,
    %c0_65 = arith.constant 0 : index
    %c0_66 = arith.constant 0 : index
    %c35 = arith.constant 35 : index
    %60 = vector.load %arg2[%c0_65, %c0_66, %c35] : memref<1x4x702xbf16, #tpu.memory_space<vmem>>, vector<1x4x416xbf16>
    %61 = vector.shape_cast %60 : vector<1x4x416xbf16> to vector<4x416xbf16>
    %c80 = arith.constant 80 : index
    %c0_67 = arith.constant 0 : index
    %62 = vector.load %arg6[%c80, %c0_67] : memref<484x416xbf16, #tpu.memory_space<vmem>>, vector<4x416xbf16>
    tpu.vector_store %arg6[%c80, %c0_67], %61 {strides = array<i32>} : memref<484x416xbf16, #tpu.memory_space<vmem>>, vector<4x416xbf16>,
    %c0_68 = arith.constant 0 : index
    %c0_69 = arith.constant 0 : index
    %c36_70 = arith.constant 36 : index
    %63 = vector.load %arg2[%c0_68, %c0_69, %c36_70] : memref<1x4x702xbf16, #tpu.memory_space<vmem>>, vector<1x4x416xbf16>
    %64 = vector.shape_cast %63 : vector<1x4x416xbf16> to vector<4x416xbf16>
    %c84 = arith.constant 84 : index
    %c0_71 = arith.constant 0 : index
    %65 = vector.load %arg6[%c84, %c0_71] : memref<484x416xbf16, #tpu.memory_space<vmem>>, vector<4x416xbf16>
    tpu.vector_store %arg6[%c84, %c0_71], %64 {strides = array<i32>} : memref<484x416xbf16, #tpu.memory_space<vmem>>, vector<4x416xbf16>,
    %c0_72 = arith.constant 0 : index
    %c0_73 = arith.constant 0 : index
    %c52_74 = arith.constant 52 : index
    %66 = vector.load %arg2[%c0_72, %c0_73, %c52_74] : memref<1x4x702xbf16, #tpu.memory_space<vmem>>, vector<1x4x416xbf16>
    %67 = vector.shape_cast %66 : vector<1x4x416xbf16> to vector<4x416xbf16>
    %c88 = arith.constant 88 : index
    %c0_75 = arith.constant 0 : index
    %68 = vector.load %arg6[%c88, %c0_75] : memref<484x416xbf16, #tpu.memory_space<vmem>>, vector<4x416xbf16>
    tpu.vector_store %arg6[%c88, %c0_75], %67 {strides = array<i32>} : memref<484x416xbf16, #tpu.memory_space<vmem>>, vector<4x416xbf16>,
    %c0_76 = arith.constant 0 : index
    %c0_77 = arith.constant 0 : index
    %c53 = arith.constant 53 : index
    %69 = vector.load %arg2[%c0_76, %c0_77, %c53] : memref<1x4x702xbf16, #tpu.memory_space<vmem>>, vector<1x4x416xbf16>
    %70 = vector.shape_cast %69 : vector<1x4x416xbf16> to vector<4x416xbf16>
    %c92 = arith.constant 92 : index
    %c0_78 = arith.constant 0 : index
    %71 = vector.load %arg6[%c92, %c0_78] : memref<484x416xbf16, #tpu.memory_space<vmem>>, vector<4x416xbf16>
    tpu.vector_store %arg6[%c92, %c0_78], %70 {strides = array<i32>} : memref<484x416xbf16, #tpu.memory_space<vmem>>, vector<4x416xbf16>,
    %c0_79 = arith.constant 0 : index
    %c0_80 = arith.constant 0 : index
    %c54 = arith.constant 54 : index
    %72 = vector.load %arg2[%c0_79, %c0_80, %c54] : memref<1x4x702xbf16, #tpu.memory_space<vmem>>, vector<1x4x416xbf16>
    %73 = vector.shape_cast %72 : vector<1x4x416xbf16> to vector<4x416xbf16>
    %c96 = arith.constant 96 : index
    %c0_81 = arith.constant 0 : index
    %74 = vector.load %arg6[%c96, %c0_81] : memref<484x416xbf16, #tpu.memory_space<vmem>>, vector<4x416xbf16>
    tpu.vector_store %arg6[%c96, %c0_81], %73 {strides = array<i32>} : memref<484x416xbf16, #tpu.memory_space<vmem>>, vector<4x416xbf16>,
    %c0_82 = arith.constant 0 : index
    %c0_83 = arith.constant 0 : index
    %c55 = arith.constant 55 : index
    %75 = vector.load %arg2[%c0_82, %c0_83, %c55] : memref<1x4x702xbf16, #tpu.memory_space<vmem>>, vector<1x4x416xbf16>
    %76 = vector.shape_cast %75 : vector<1x4x416xbf16> to vector<4x416xbf16>
    %c100 = arith.constant 100 : index
    %c0_84 = arith.constant 0 : index
    %77 = vector.load %arg6[%c100, %c0_84] : memref<484x416xbf16, #tpu.memory_space<vmem>>, vector<4x416xbf16>
    tpu.vector_store %arg6[%c100, %c0_84], %76 {strides = array<i32>} : memref<484x416xbf16, #tpu.memory_space<vmem>>, vector<4x416xbf16>,
    %c0_85 = arith.constant 0 : index
    %c0_86 = arith.constant 0 : index
    %c56_87 = arith.constant 56 : index
    %78 = vector.load %arg2[%c0_85, %c0_86, %c56_87] : memref<1x4x702xbf16, #tpu.memory_space<vmem>>, vector<1x4x416xbf16>
    %79 = vector.shape_cast %78 : vector<1x4x416xbf16> to vector<4x416xbf16>
    %c104 = arith.constant 104 : index
    %c0_88 = arith.constant 0 : index
    %80 = vector.load %arg6[%c104, %c0_88] : memref<484x416xbf16, #tpu.memory_space<vmem>>, vector<4x416xbf16>
    tpu.vector_store %arg6[%c104, %c0_88], %79 {strides = array<i32>} : memref<484x416xbf16, #tpu.memory_space<vmem>>, vector<4x416xbf16>,
    %c0_89 = arith.constant 0 : index
    %c0_90 = arith.constant 0 : index
    %c57 = arith.constant 57 : index
    %81 = vector.load %arg2[%c0_89, %c0_90, %c57] : memref<1x4x702xbf16, #tpu.memory_space<vmem>>, vector<1x4x416xbf16>
    %82 = vector.shape_cast %81 : vector<1x4x416xbf16> to vector<4x416xbf16>
    %c108 = arith.constant 108 : index
    %c0_91 = arith.constant 0 : index
    %83 = vector.load %arg6[%c108, %c0_91] : memref<484x416xbf16, #tpu.memory_space<vmem>>, vector<4x416xbf16>
    tpu.vector_store %arg6[%c108, %c0_91], %82 {strides = array<i32>} : memref<484x416xbf16, #tpu.memory_space<vmem>>, vector<4x416xbf16>,
    %c0_92 = arith.constant 0 : index
    %c0_93 = arith.constant 0 : index
    %c58 = arith.constant 58 : index
    %84 = vector.load %arg2[%c0_92, %c0_93, %c58] : memref<1x4x702xbf16, #tpu.memory_space<vmem>>, vector<1x4x416xbf16>
    %85 = vector.shape_cast %84 : vector<1x4x416xbf16> to vector<4x416xbf16>
    %c112 = arith.constant 112 : index
    %c0_94 = arith.constant 0 : index
    %86 = vector.load %arg6[%c112, %c0_94] : memref<484x416xbf16, #tpu.memory_space<vmem>>, vector<4x416xbf16>
    tpu.vector_store %arg6[%c112, %c0_94], %85 {strides = array<i32>} : memref<484x416xbf16, #tpu.memory_space<vmem>>, vector<4x416xbf16>,
    %c0_95 = arith.constant 0 : index
    %c0_96 = arith.constant 0 : index
    %c59 = arith.constant 59 : index
    %87 = vector.load %arg2[%c0_95, %c0_96, %c59] : memref<1x4x702xbf16, #tpu.memory_space<vmem>>, vector<1x4x416xbf16>
    %88 = vector.shape_cast %87 : vector<1x4x416xbf16> to vector<4x416xbf16>
    %c116 = arith.constant 116 : index
    %c0_97 = arith.constant 0 : index
    %89 = vector.load %arg6[%c116, %c0_97] : memref<484x416xbf16, #tpu.memory_space<vmem>>, vector<4x416xbf16>
    tpu.vector_store %arg6[%c116, %c0_97], %88 {strides = array<i32>} : memref<484x416xbf16, #tpu.memory_space<vmem>>, vector<4x416xbf16>,
    %c0_98 = arith.constant 0 : index
    %c0_99 = arith.constant 0 : index
    %c60_100 = arith.constant 60 : index
    %90 = vector.load %arg2[%c0_98, %c0_99, %c60_100] : memref<1x4x702xbf16, #tpu.memory_space<vmem>>, vector<1x4x416xbf16>
    %91 = vector.shape_cast %90 : vector<1x4x416xbf16> to vector<4x416xbf16>
    %c120 = arith.constant 120 : index
    %c0_101 = arith.constant 0 : index
    %92 = vector.load %arg6[%c120, %c0_101] : memref<484x416xbf16, #tpu.memory_space<vmem>>, vector<4x416xbf16>
    tpu.vector_store %arg6[%c120, %c0_101], %91 {strides = array<i32>} : memref<484x416xbf16, #tpu.memory_space<vmem>>, vector<4x416xbf16>,
    %c0_102 = arith.constant 0 : index
    %c0_103 = arith.constant 0 : index
    %c61 = arith.constant 61 : index
    %93 = vector.load %arg2[%c0_102, %c0_103, %c61] : memref<1x4x702xbf16, #tpu.memory_space<vmem>>, vector<1x4x416xbf16>
    %94 = vector.shape_cast %93 : vector<1x4x416xbf16> to vector<4x416xbf16>
    %c124 = arith.constant 124 : index
    %c0_104 = arith.constant 0 : index
    %95 = vector.load %arg6[%c124, %c0_104] : memref<484x416xbf16, #tpu.memory_space<vmem>>, vector<4x416xbf16>
    tpu.vector_store %arg6[%c124, %c0_104], %94 {strides = array<i32>} : memref<484x416xbf16, #tpu.memory_space<vmem>>, vector<4x416xbf16>,
    %c0_105 = arith.constant 0 : index
    %c0_106 = arith.constant 0 : index
    %c62 = arith.constant 62 : index
    %96 = vector.load %arg2[%c0_105, %c0_106, %c62] : memref<1x4x702xbf16, #tpu.memory_space<vmem>>, vector<1x4x416xbf16>
    %97 = vector.shape_cast %96 : vector<1x4x416xbf16> to vector<4x416xbf16>
    %c128 = arith.constant 128 : index
    %c0_107 = arith.constant 0 : index
    %98 = vector.load %arg6[%c128, %c0_107] : memref<484x416xbf16, #tpu.memory_space<vmem>>, vector<4x416xbf16>
    tpu.vector_store %arg6[%c128, %c0_107], %97 {strides = array<i32>} : memref<484x416xbf16, #tpu.memory_space<vmem>>, vector<4x416xbf16>,
    %c0_108 = arith.constant 0 : index
    %c0_109 = arith.constant 0 : index
    %c78 = arith.constant 78 : index
    %99 = vector.load %arg2[%c0_108, %c0_109, %c78] : memref<1x4x702xbf16, #tpu.memory_space<vmem>>, vector<1x4x416xbf16>
    %100 = vector.shape_cast %99 : vector<1x4x416xbf16> to vector<4x416xbf16>
    %c132 = arith.constant 132 : index
    %c0_110 = arith.constant 0 : index
    %101 = vector.load %arg6[%c132, %c0_110] : memref<484x416xbf16, #tpu.memory_space<vmem>>, vector<4x416xbf16>
    tpu.vector_store %arg6[%c132, %c0_110], %100 {strides = array<i32>} : memref<484x416xbf16, #tpu.memory_space<vmem>>, vector<4x416xbf16>,
    %c0_111 = arith.constant 0 : index
    %c0_112 = arith.constant 0 : index
    %c79 = arith.constant 79 : index
    %102 = vector.load %arg2[%c0_111, %c0_112, %c79] : memref<1x4x702xbf16, #tpu.memory_space<vmem>>, vector<1x4x416xbf16>
    %103 = vector.shape_cast %102 : vector<1x4x416xbf16> to vector<4x416xbf16>
    %c136 = arith.constant 136 : index
    %c0_113 = arith.constant 0 : index
    %104 = vector.load %arg6[%c136, %c0_113] : memref<484x416xbf16, #tpu.memory_space<vmem>>, vector<4x416xbf16>
    tpu.vector_store %arg6[%c136, %c0_113], %103 {strides = array<i32>} : memref<484x416xbf16, #tpu.memory_space<vmem>>, vector<4x416xbf16>,
    %c0_114 = arith.constant 0 : index
    %c0_115 = arith.constant 0 : index
    %c80_116 = arith.constant 80 : index
    %105 = vector.load %arg2[%c0_114, %c0_115, %c80_116] : memref<1x4x702xbf16, #tpu.memory_space<vmem>>, vector<1x4x416xbf16>
    %106 = vector.shape_cast %105 : vector<1x4x416xbf16> to vector<4x416xbf16>
    %c140 = arith.constant 140 : index
    %c0_117 = arith.constant 0 : index
    %107 = vector.load %arg6[%c140, %c0_117] : memref<484x416xbf16, #tpu.memory_space<vmem>>, vector<4x416xbf16>
    tpu.vector_store %arg6[%c140, %c0_117], %106 {strides = array<i32>} : memref<484x416xbf16, #tpu.memory_space<vmem>>, vector<4x416xbf16>,
    %c0_118 = arith.constant 0 : index
    %c0_119 = arith.constant 0 : index
    %c81 = arith.constant 81 : index
    %108 = vector.load %arg2[%c0_118, %c0_119, %c81] : memref<1x4x702xbf16, #tpu.memory_space<vmem>>, vector<1x4x416xbf16>
    %109 = vector.shape_cast %108 : vector<1x4x416xbf16> to vector<4x416xbf16>
    %c144 = arith.constant 144 : index
    %c0_120 = arith.constant 0 : index
    %110 = vector.load %arg6[%c144, %c0_120] : memref<484x416xbf16, #tpu.memory_space<vmem>>, vector<4x416xbf16>
    tpu.vector_store %arg6[%c144, %c0_120], %109 {strides = array<i32>} : memref<484x416xbf16, #tpu.memory_space<vmem>>, vector<4x416xbf16>,
    %c0_121 = arith.constant 0 : index
    %c0_122 = arith.constant 0 : index
    %c82 = arith.constant 82 : index
    %111 = vector.load %arg2[%c0_121, %c0_122, %c82] : memref<1x4x702xbf16, #tpu.memory_space<vmem>>, vector<1x4x416xbf16>
    %112 = vector.shape_cast %111 : vector<1x4x416xbf16> to vector<4x416xbf16>
    %c148 = arith.constant 148 : index
    %c0_123 = arith.constant 0 : index
    %113 = vector.load %arg6[%c148, %c0_123] : memref<484x416xbf16, #tpu.memory_space<vmem>>, vector<4x416xbf16>
    tpu.vector_store %arg6[%c148, %c0_123], %112 {strides = array<i32>} : memref<484x416xbf16, #tpu.memory_space<vmem>>, vector<4x416xbf16>,
    %c0_124 = arith.constant 0 : index
    %c0_125 = arith.constant 0 : index
    %c83 = arith.constant 83 : index
    %114 = vector.load %arg2[%c0_124, %c0_125, %c83] : memref<1x4x702xbf16, #tpu.memory_space<vmem>>, vector<1x4x416xbf16>
    %115 = vector.shape_cast %114 : vector<1x4x416xbf16> to vector<4x416xbf16>
    %c152 = arith.constant 152 : index
    %c0_126 = arith.constant 0 : index
    %116 = vector.load %arg6[%c152, %c0_126] : memref<484x416xbf16, #tpu.memory_space<vmem>>, vector<4x416xbf16>
    tpu.vector_store %arg6[%c152, %c0_126], %115 {strides = array<i32>} : memref<484x416xbf16, #tpu.memory_space<vmem>>, vector<4x416xbf16>,
    %c0_127 = arith.constant 0 : index
    %c0_128 = arith.constant 0 : index
    %c84_129 = arith.constant 84 : index
    %117 = vector.load %arg2[%c0_127, %c0_128, %c84_129] : memref<1x4x702xbf16, #tpu.memory_space<vmem>>, vector<1x4x416xbf16>
    %118 = vector.shape_cast %117 : vector<1x4x416xbf16> to vector<4x416xbf16>
    %c156 = arith.constant 156 : index
    %c0_130 = arith.constant 0 : index
    %119 = vector.load %arg6[%c156, %c0_130] : memref<484x416xbf16, #tpu.memory_space<vmem>>, vector<4x416xbf16>
    tpu.vector_store %arg6[%c156, %c0_130], %118 {strides = array<i32>} : memref<484x416xbf16, #tpu.memory_space<vmem>>, vector<4x416xbf16>,
    %c0_131 = arith.constant 0 : index
    %c0_132 = arith.constant 0 : index
    %c85 = arith.constant 85 : index
    %120 = vector.load %arg2[%c0_131, %c0_132, %c85] : memref<1x4x702xbf16, #tpu.memory_space<vmem>>, vector<1x4x416xbf16>
    %121 = vector.shape_cast %120 : vector<1x4x416xbf16> to vector<4x416xbf16>
    %c160 = arith.constant 160 : index
    %c0_133 = arith.constant 0 : index
    %122 = vector.load %arg6[%c160, %c0_133] : memref<484x416xbf16, #tpu.memory_space<vmem>>, vector<4x416xbf16>
    tpu.vector_store %arg6[%c160, %c0_133], %121 {strides = array<i32>} : memref<484x416xbf16, #tpu.memory_space<vmem>>, vector<4x416xbf16>,
    %c0_134 = arith.constant 0 : index
    %c0_135 = arith.constant 0 : index
    %c86 = arith.constant 86 : index
    %123 = vector.load %arg2[%c0_134, %c0_135, %c86] : memref<1x4x702xbf16, #tpu.memory_space<vmem>>, vector<1x4x416xbf16>
    %124 = vector.shape_cast %123 : vector<1x4x416xbf16> to vector<4x416xbf16>
    %c164 = arith.constant 164 : index
    %c0_136 = arith.constant 0 : index
    %125 = vector.load %arg6[%c164, %c0_136] : memref<484x416xbf16, #tpu.memory_space<vmem>>, vector<4x416xbf16>
    tpu.vector_store %arg6[%c164, %c0_136], %124 {strides = array<i32>} : memref<484x416xbf16, #tpu.memory_space<vmem>>, vector<4x416xbf16>,
    %c0_137 = arith.constant 0 : index
    %c0_138 = arith.constant 0 : index
    %c87 = arith.constant 87 : index
    %126 = vector.load %arg2[%c0_137, %c0_138, %c87] : memref<1x4x702xbf16, #tpu.memory_space<vmem>>, vector<1x4x416xbf16>
    %127 = vector.shape_cast %126 : vector<1x4x416xbf16> to vector<4x416xbf16>
    %c168 = arith.constant 168 : index
    %c0_139 = arith.constant 0 : index
    %128 = vector.load %arg6[%c168, %c0_139] : memref<484x416xbf16, #tpu.memory_space<vmem>>, vector<4x416xbf16>
    tpu.vector_store %arg6[%c168, %c0_139], %127 {strides = array<i32>} : memref<484x416xbf16, #tpu.memory_space<vmem>>, vector<4x416xbf16>,
    %c0_140 = arith.constant 0 : index
    %c0_141 = arith.constant 0 : index
    %c88_142 = arith.constant 88 : index
    %129 = vector.load %arg2[%c0_140, %c0_141, %c88_142] : memref<1x4x702xbf16, #tpu.memory_space<vmem>>, vector<1x4x416xbf16>
    %130 = vector.shape_cast %129 : vector<1x4x416xbf16> to vector<4x416xbf16>
    %c172 = arith.constant 172 : index
    %c0_143 = arith.constant 0 : index
    %131 = vector.load %arg6[%c172, %c0_143] : memref<484x416xbf16, #tpu.memory_space<vmem>>, vector<4x416xbf16>
    tpu.vector_store %arg6[%c172, %c0_143], %130 {strides = array<i32>} : memref<484x416xbf16, #tpu.memory_space<vmem>>, vector<4x416xbf16>,
    %c0_144 = arith.constant 0 : index
    %c0_145 = arith.constant 0 : index
    %c104_146 = arith.constant 104 : index
    %132 = vector.load %arg2[%c0_144, %c0_145, %c104_146] : memref<1x4x702xbf16, #tpu.memory_space<vmem>>, vector<1x4x416xbf16>
    %133 = vector.shape_cast %132 : vector<1x4x416xbf16> to vector<4x416xbf16>
    %c176 = arith.constant 176 : index
    %c0_147 = arith.constant 0 : index
    %134 = vector.load %arg6[%c176, %c0_147] : memref<484x416xbf16, #tpu.memory_space<vmem>>, vector<4x416xbf16>
    tpu.vector_store %arg6[%c176, %c0_147], %133 {strides = array<i32>} : memref<484x416xbf16, #tpu.memory_space<vmem>>, vector<4x416xbf16>,
    %c0_148 = arith.constant 0 : index
    %c0_149 = arith.constant 0 : index
    %c105 = arith.constant 105 : index
    %135 = vector.load %arg2[%c0_148, %c0_149, %c105] : memref<1x4x702xbf16, #tpu.memory_space<vmem>>, vector<1x4x416xbf16>
    %136 = vector.shape_cast %135 : vector<1x4x416xbf16> to vector<4x416xbf16>
    %c180 = arith.constant 180 : index
    %c0_150 = arith.constant 0 : index
    %137 = vector.load %arg6[%c180, %c0_150] : memref<484x416xbf16, #tpu.memory_space<vmem>>, vector<4x416xbf16>
    tpu.vector_store %arg6[%c180, %c0_150], %136 {strides = array<i32>} : memref<484x416xbf16, #tpu.memory_space<vmem>>, vector<4x416xbf16>,
    %c0_151 = arith.constant 0 : index
    %c0_152 = arith.constant 0 : index
    %c106 = arith.constant 106 : index
    %138 = vector.load %arg2[%c0_151, %c0_152, %c106] : memref<1x4x702xbf16, #tpu.memory_space<vmem>>, vector<1x4x416xbf16>
    %139 = vector.shape_cast %138 : vector<1x4x416xbf16> to vector<4x416xbf16>
    %c184 = arith.constant 184 : index
    %c0_153 = arith.constant 0 : index
    %140 = vector.load %arg6[%c184, %c0_153] : memref<484x416xbf16, #tpu.memory_space<vmem>>, vector<4x416xbf16>
    tpu.vector_store %arg6[%c184, %c0_153], %139 {strides = array<i32>} : memref<484x416xbf16, #tpu.memory_space<vmem>>, vector<4x416xbf16>,
    %c0_154 = arith.constant 0 : index
    %c0_155 = arith.constant 0 : index
    %c107 = arith.constant 107 : index
    %141 = vector.load %arg2[%c0_154, %c0_155, %c107] : memref<1x4x702xbf16, #tpu.memory_space<vmem>>, vector<1x4x416xbf16>
    %142 = vector.shape_cast %141 : vector<1x4x416xbf16> to vector<4x416xbf16>
    %c188 = arith.constant 188 : index
    %c0_156 = arith.constant 0 : index
    %143 = vector.load %arg6[%c188, %c0_156] : memref<484x416xbf16, #tpu.memory_space<vmem>>, vector<4x416xbf16>
    tpu.vector_store %arg6[%c188, %c0_156], %142 {strides = array<i32>} : memref<484x416xbf16, #tpu.memory_space<vmem>>, vector<4x416xbf16>,
    %c0_157 = arith.constant 0 : index
    %c0_158 = arith.constant 0 : index
    %c108_159 = arith.constant 108 : index
    %144 = vector.load %arg2[%c0_157, %c0_158, %c108_159] : memref<1x4x702xbf16, #tpu.memory_space<vmem>>, vector<1x4x416xbf16>
    %145 = vector.shape_cast %144 : vector<1x4x416xbf16> to vector<4x416xbf16>
    %c192 = arith.constant 192 : index
    %c0_160 = arith.constant 0 : index
    %146 = vector.load %arg6[%c192, %c0_160] : memref<484x416xbf16, #tpu.memory_space<vmem>>, vector<4x416xbf16>
    tpu.vector_store %arg6[%c192, %c0_160], %145 {strides = array<i32>} : memref<484x416xbf16, #tpu.memory_space<vmem>>, vector<4x416xbf16>,
    %c0_161 = arith.constant 0 : index
    %c0_162 = arith.constant 0 : index
    %c109 = arith.constant 109 : index
    %147 = vector.load %arg2[%c0_161, %c0_162, %c109] : memref<1x4x702xbf16, #tpu.memory_space<vmem>>, vector<1x4x416xbf16>
    %148 = vector.shape_cast %147 : vector<1x4x416xbf16> to vector<4x416xbf16>
    %c196 = arith.constant 196 : index
    %c0_163 = arith.constant 0 : index
    %149 = vector.load %arg6[%c196, %c0_163] : memref<484x416xbf16, #tpu.memory_space<vmem>>, vector<4x416xbf16>
    tpu.vector_store %arg6[%c196, %c0_163], %148 {strides = array<i32>} : memref<484x416xbf16, #tpu.memory_space<vmem>>, vector<4x416xbf16>,
    %c0_164 = arith.constant 0 : index
    %c0_165 = arith.constant 0 : index
    %c110 = arith.constant 110 : index
    %150 = vector.load %arg2[%c0_164, %c0_165, %c110] : memref<1x4x702xbf16, #tpu.memory_space<vmem>>, vector<1x4x416xbf16>
    %151 = vector.shape_cast %150 : vector<1x4x416xbf16> to vector<4x416xbf16>
    %c200 = arith.constant 200 : index
    %c0_166 = arith.constant 0 : index
    %152 = vector.load %arg6[%c200, %c0_166] : memref<484x416xbf16, #tpu.memory_space<vmem>>, vector<4x416xbf16>
    tpu.vector_store %arg6[%c200, %c0_166], %151 {strides = array<i32>} : memref<484x416xbf16, #tpu.memory_space<vmem>>, vector<4x416xbf16>,
    %c0_167 = arith.constant 0 : index
    %c0_168 = arith.constant 0 : index
    %c111 = arith.constant 111 : index
    %153 = vector.load %arg2[%c0_167, %c0_168, %c111] : memref<1x4x702xbf16, #tpu.memory_space<vmem>>, vector<1x4x416xbf16>
    %154 = vector.shape_cast %153 : vector<1x4x416xbf16> to vector<4x416xbf16>
    %c204 = arith.constant 204 : index
    %c0_169 = arith.constant 0 : index
    %155 = vector.load %arg6[%c204, %c0_169] : memref<484x416xbf16, #tpu.memory_space<vmem>>, vector<4x416xbf16>
    tpu.vector_store %arg6[%c204, %c0_169], %154 {strides = array<i32>} : memref<484x416xbf16, #tpu.memory_space<vmem>>, vector<4x416xbf16>,
    %c0_170 = arith.constant 0 : index
    %c0_171 = arith.constant 0 : index
    %c112_172 = arith.constant 112 : index
    %156 = vector.load %arg2[%c0_170, %c0_171, %c112_172] : memref<1x4x702xbf16, #tpu.memory_space<vmem>>, vector<1x4x416xbf16>
    %157 = vector.shape_cast %156 : vector<1x4x416xbf16> to vector<4x416xbf16>
    %c208 = arith.constant 208 : index
    %c0_173 = arith.constant 0 : index
    %158 = vector.load %arg6[%c208, %c0_173] : memref<484x416xbf16, #tpu.memory_space<vmem>>, vector<4x416xbf16>
    tpu.vector_store %arg6[%c208, %c0_173], %157 {strides = array<i32>} : memref<484x416xbf16, #tpu.memory_space<vmem>>, vector<4x416xbf16>,
    %c0_174 = arith.constant 0 : index
    %c0_175 = arith.constant 0 : index
    %c113 = arith.constant 113 : index
    %159 = vector.load %arg2[%c0_174, %c0_175, %c113] : memref<1x4x702xbf16, #tpu.memory_space<vmem>>, vector<1x4x416xbf16>
    %160 = vector.shape_cast %159 : vector<1x4x416xbf16> to vector<4x416xbf16>
    %c212 = arith.constant 212 : index
    %c0_176 = arith.constant 0 : index
    %161 = vector.load %arg6[%c212, %c0_176] : memref<484x416xbf16, #tpu.memory_space<vmem>>, vector<4x416xbf16>
    tpu.vector_store %arg6[%c212, %c0_176], %160 {strides = array<i32>} : memref<484x416xbf16, #tpu.memory_space<vmem>>, vector<4x416xbf16>,
    %c0_177 = arith.constant 0 : index
    %c0_178 = arith.constant 0 : index
    %c114 = arith.constant 114 : index
    %162 = vector.load %arg2[%c0_177, %c0_178, %c114] : memref<1x4x702xbf16, #tpu.memory_space<vmem>>, vector<1x4x416xbf16>
    %163 = vector.shape_cast %162 : vector<1x4x416xbf16> to vector<4x416xbf16>
    %c216 = arith.constant 216 : index
    %c0_179 = arith.constant 0 : index
    %164 = vector.load %arg6[%c216, %c0_179] : memref<484x416xbf16, #tpu.memory_space<vmem>>, vector<4x416xbf16>
    tpu.vector_store %arg6[%c216, %c0_179], %163 {strides = array<i32>} : memref<484x416xbf16, #tpu.memory_space<vmem>>, vector<4x416xbf16>,
    %c0_180 = arith.constant 0 : index
    %c0_181 = arith.constant 0 : index
    %c130 = arith.constant 130 : index
    %165 = vector.load %arg2[%c0_180, %c0_181, %c130] : memref<1x4x702xbf16, #tpu.memory_space<vmem>>, vector<1x4x416xbf16>
    %166 = vector.shape_cast %165 : vector<1x4x416xbf16> to vector<4x416xbf16>
    %c220 = arith.constant 220 : index
    %c0_182 = arith.constant 0 : index
    %167 = vector.load %arg6[%c220, %c0_182] : memref<484x416xbf16, #tpu.memory_space<vmem>>, vector<4x416xbf16>
    tpu.vector_store %arg6[%c220, %c0_182], %166 {strides = array<i32>} : memref<484x416xbf16, #tpu.memory_space<vmem>>, vector<4x416xbf16>,
    %c0_183 = arith.constant 0 : index
    %c0_184 = arith.constant 0 : index
    %c131 = arith.constant 131 : index
    %168 = vector.load %arg2[%c0_183, %c0_184, %c131] : memref<1x4x702xbf16, #tpu.memory_space<vmem>>, vector<1x4x416xbf16>
    %169 = vector.shape_cast %168 : vector<1x4x416xbf16> to vector<4x416xbf16>
    %c224 = arith.constant 224 : index
    %c0_185 = arith.constant 0 : index
    %170 = vector.load %arg6[%c224, %c0_185] : memref<484x416xbf16, #tpu.memory_space<vmem>>, vector<4x416xbf16>
    tpu.vector_store %arg6[%c224, %c0_185], %169 {strides = array<i32>} : memref<484x416xbf16, #tpu.memory_space<vmem>>, vector<4x416xbf16>,
    %c0_186 = arith.constant 0 : index
    %c0_187 = arith.constant 0 : index
    %c132_188 = arith.constant 132 : index
    %171 = vector.load %arg2[%c0_186, %c0_187, %c132_188] : memref<1x4x702xbf16, #tpu.memory_space<vmem>>, vector<1x4x416xbf16>
    %172 = vector.shape_cast %171 : vector<1x4x416xbf16> to vector<4x416xbf16>
    %c228 = arith.constant 228 : index
    %c0_189 = arith.constant 0 : index
    %173 = vector.load %arg6[%c228, %c0_189] : memref<484x416xbf16, #tpu.memory_space<vmem>>, vector<4x416xbf16>
    tpu.vector_store %arg6[%c228, %c0_189], %172 {strides = array<i32>} : memref<484x416xbf16, #tpu.memory_space<vmem>>, vector<4x416xbf16>,
    %c0_190 = arith.constant 0 : index
    %c0_191 = arith.constant 0 : index
    %c133 = arith.constant 133 : index
    %174 = vector.load %arg2[%c0_190, %c0_191, %c133] : memref<1x4x702xbf16, #tpu.memory_space<vmem>>, vector<1x4x416xbf16>
    %175 = vector.shape_cast %174 : vector<1x4x416xbf16> to vector<4x416xbf16>
    %c232 = arith.constant 232 : index
    %c0_192 = arith.constant 0 : index
    %176 = vector.load %arg6[%c232, %c0_192] : memref<484x416xbf16, #tpu.memory_space<vmem>>, vector<4x416xbf16>
    tpu.vector_store %arg6[%c232, %c0_192], %175 {strides = array<i32>} : memref<484x416xbf16, #tpu.memory_space<vmem>>, vector<4x416xbf16>,
    %c0_193 = arith.constant 0 : index
    %c0_194 = arith.constant 0 : index
    %c134 = arith.constant 134 : index
    %177 = vector.load %arg2[%c0_193, %c0_194, %c134] : memref<1x4x702xbf16, #tpu.memory_space<vmem>>, vector<1x4x416xbf16>
    %178 = vector.shape_cast %177 : vector<1x4x416xbf16> to vector<4x416xbf16>
    %c236 = arith.constant 236 : index
    %c0_195 = arith.constant 0 : index
    %179 = vector.load %arg6[%c236, %c0_195] : memref<484x416xbf16, #tpu.memory_space<vmem>>, vector<4x416xbf16>
    tpu.vector_store %arg6[%c236, %c0_195], %178 {strides = array<i32>} : memref<484x416xbf16, #tpu.memory_space<vmem>>, vector<4x416xbf16>,
    %c0_196 = arith.constant 0 : index
    %c0_197 = arith.constant 0 : index
    %c135 = arith.constant 135 : index
    %180 = vector.load %arg2[%c0_196, %c0_197, %c135] : memref<1x4x702xbf16, #tpu.memory_space<vmem>>, vector<1x4x416xbf16>
    %181 = vector.shape_cast %180 : vector<1x4x416xbf16> to vector<4x416xbf16>
    %c240 = arith.constant 240 : index
    %c0_198 = arith.constant 0 : index
    %182 = vector.load %arg6[%c240, %c0_198] : memref<484x416xbf16, #tpu.memory_space<vmem>>, vector<4x416xbf16>
    tpu.vector_store %arg6[%c240, %c0_198], %181 {strides = array<i32>} : memref<484x416xbf16, #tpu.memory_space<vmem>>, vector<4x416xbf16>,
    %c0_199 = arith.constant 0 : index
    %c0_200 = arith.constant 0 : index
    %c136_201 = arith.constant 136 : index
    %183 = vector.load %arg2[%c0_199, %c0_200, %c136_201] : memref<1x4x702xbf16, #tpu.memory_space<vmem>>, vector<1x4x416xbf16>
    %184 = vector.shape_cast %183 : vector<1x4x416xbf16> to vector<4x416xbf16>
    %c244 = arith.constant 244 : index
    %c0_202 = arith.constant 0 : index
    %185 = vector.load %arg6[%c244, %c0_202] : memref<484x416xbf16, #tpu.memory_space<vmem>>, vector<4x416xbf16>
    tpu.vector_store %arg6[%c244, %c0_202], %184 {strides = array<i32>} : memref<484x416xbf16, #tpu.memory_space<vmem>>, vector<4x416xbf16>,
    %c0_203 = arith.constant 0 : index
    %c0_204 = arith.constant 0 : index
    %c137 = arith.constant 137 : index
    %186 = vector.load %arg2[%c0_203, %c0_204, %c137] : memref<1x4x702xbf16, #tpu.memory_space<vmem>>, vector<1x4x416xbf16>
    %187 = vector.shape_cast %186 : vector<1x4x416xbf16> to vector<4x416xbf16>
    %c248 = arith.constant 248 : index
    %c0_205 = arith.constant 0 : index
    %188 = vector.load %arg6[%c248, %c0_205] : memref<484x416xbf16, #tpu.memory_space<vmem>>, vector<4x416xbf16>
    tpu.vector_store %arg6[%c248, %c0_205], %187 {strides = array<i32>} : memref<484x416xbf16, #tpu.memory_space<vmem>>, vector<4x416xbf16>,
    %c0_206 = arith.constant 0 : index
    %c0_207 = arith.constant 0 : index
    %c138 = arith.constant 138 : index
    %189 = vector.load %arg2[%c0_206, %c0_207, %c138] : memref<1x4x702xbf16, #tpu.memory_space<vmem>>, vector<1x4x416xbf16>
    %190 = vector.shape_cast %189 : vector<1x4x416xbf16> to vector<4x416xbf16>
    %c252 = arith.constant 252 : index
    %c0_208 = arith.constant 0 : index
    %191 = vector.load %arg6[%c252, %c0_208] : memref<484x416xbf16, #tpu.memory_space<vmem>>, vector<4x416xbf16>
    tpu.vector_store %arg6[%c252, %c0_208], %190 {strides = array<i32>} : memref<484x416xbf16, #tpu.memory_space<vmem>>, vector<4x416xbf16>,
    %c0_209 = arith.constant 0 : index
    %c0_210 = arith.constant 0 : index
    %c139 = arith.constant 139 : index
    %192 = vector.load %arg2[%c0_209, %c0_210, %c139] : memref<1x4x702xbf16, #tpu.memory_space<vmem>>, vector<1x4x416xbf16>
    %193 = vector.shape_cast %192 : vector<1x4x416xbf16> to vector<4x416xbf16>
    %c256 = arith.constant 256 : index
    %c0_211 = arith.constant 0 : index
    %194 = vector.load %arg6[%c256, %c0_211] : memref<484x416xbf16, #tpu.memory_space<vmem>>, vector<4x416xbf16>
    tpu.vector_store %arg6[%c256, %c0_211], %193 {strides = array<i32>} : memref<484x416xbf16, #tpu.memory_space<vmem>>, vector<4x416xbf16>,
    %c0_212 = arith.constant 0 : index
    %c0_213 = arith.constant 0 : index
    %c140_214 = arith.constant 140 : index
    %195 = vector.load %arg2[%c0_212, %c0_213, %c140_214] : memref<1x4x702xbf16, #tpu.memory_space<vmem>>, vector<1x4x416xbf16>
    %196 = vector.shape_cast %195 : vector<1x4x416xbf16> to vector<4x416xbf16>
    %c260 = arith.constant 260 : index
    %c0_215 = arith.constant 0 : index
    %197 = vector.load %arg6[%c260, %c0_215] : memref<484x416xbf16, #tpu.memory_space<vmem>>, vector<4x416xbf16>
    tpu.vector_store %arg6[%c260, %c0_215], %196 {strides = array<i32>} : memref<484x416xbf16, #tpu.memory_space<vmem>>, vector<4x416xbf16>,
    %c0_216 = arith.constant 0 : index
    %c0_217 = arith.constant 0 : index
    %c156_218 = arith.constant 156 : index
    %198 = vector.load %arg2[%c0_216, %c0_217, %c156_218] : memref<1x4x702xbf16, #tpu.memory_space<vmem>>, vector<1x4x416xbf16>
    %199 = vector.shape_cast %198 : vector<1x4x416xbf16> to vector<4x416xbf16>
    %c264 = arith.constant 264 : index
    %c0_219 = arith.constant 0 : index
    %200 = vector.load %arg6[%c264, %c0_219] : memref<484x416xbf16, #tpu.memory_space<vmem>>, vector<4x416xbf16>
    tpu.vector_store %arg6[%c264, %c0_219], %199 {strides = array<i32>} : memref<484x416xbf16, #tpu.memory_space<vmem>>, vector<4x416xbf16>,
    %c0_220 = arith.constant 0 : index
    %c0_221 = arith.constant 0 : index
    %c157 = arith.constant 157 : index
    %201 = vector.load %arg2[%c0_220, %c0_221, %c157] : memref<1x4x702xbf16, #tpu.memory_space<vmem>>, vector<1x4x416xbf16>
    %202 = vector.shape_cast %201 : vector<1x4x416xbf16> to vector<4x416xbf16>
    %c268 = arith.constant 268 : index
    %c0_222 = arith.constant 0 : index
    %203 = vector.load %arg6[%c268, %c0_222] : memref<484x416xbf16, #tpu.memory_space<vmem>>, vector<4x416xbf16>
    tpu.vector_store %arg6[%c268, %c0_222], %202 {strides = array<i32>} : memref<484x416xbf16, #tpu.memory_space<vmem>>, vector<4x416xbf16>,
    %c0_223 = arith.constant 0 : index
    %c0_224 = arith.constant 0 : index
    %c158 = arith.constant 158 : index
    %204 = vector.load %arg2[%c0_223, %c0_224, %c158] : memref<1x4x702xbf16, #tpu.memory_space<vmem>>, vector<1x4x416xbf16>
    %205 = vector.shape_cast %204 : vector<1x4x416xbf16> to vector<4x416xbf16>
    %c272 = arith.constant 272 : index
    %c0_225 = arith.constant 0 : index
    %206 = vector.load %arg6[%c272, %c0_225] : memref<484x416xbf16, #tpu.memory_space<vmem>>, vector<4x416xbf16>
    tpu.vector_store %arg6[%c272, %c0_225], %205 {strides = array<i32>} : memref<484x416xbf16, #tpu.memory_space<vmem>>, vector<4x416xbf16>,
    %c0_226 = arith.constant 0 : index
    %c0_227 = arith.constant 0 : index
    %c159 = arith.constant 159 : index
    %207 = vector.load %arg2[%c0_226, %c0_227, %c159] : memref<1x4x702xbf16, #tpu.memory_space<vmem>>, vector<1x4x416xbf16>
    %208 = vector.shape_cast %207 : vector<1x4x416xbf16> to vector<4x416xbf16>
    %c276 = arith.constant 276 : index
    %c0_228 = arith.constant 0 : index
    %209 = vector.load %arg6[%c276, %c0_228] : memref<484x416xbf16, #tpu.memory_space<vmem>>, vector<4x416xbf16>
    tpu.vector_store %arg6[%c276, %c0_228], %208 {strides = array<i32>} : memref<484x416xbf16, #tpu.memory_space<vmem>>, vector<4x416xbf16>,
    %c0_229 = arith.constant 0 : index
    %c0_230 = arith.constant 0 : index
    %c160_231 = arith.constant 160 : index
    %210 = vector.load %arg2[%c0_229, %c0_230, %c160_231] : memref<1x4x702xbf16, #tpu.memory_space<vmem>>, vector<1x4x416xbf16>
    %211 = vector.shape_cast %210 : vector<1x4x416xbf16> to vector<4x416xbf16>
    %c280 = arith.constant 280 : index
    %c0_232 = arith.constant 0 : index
    %212 = vector.load %arg6[%c280, %c0_232] : memref<484x416xbf16, #tpu.memory_space<vmem>>, vector<4x416xbf16>
    tpu.vector_store %arg6[%c280, %c0_232], %211 {strides = array<i32>} : memref<484x416xbf16, #tpu.memory_space<vmem>>, vector<4x416xbf16>,
    %c0_233 = arith.constant 0 : index
    %c0_234 = arith.constant 0 : index
    %c161 = arith.constant 161 : index
    %213 = vector.load %arg2[%c0_233, %c0_234, %c161] : memref<1x4x702xbf16, #tpu.memory_space<vmem>>, vector<1x4x416xbf16>
    %214 = vector.shape_cast %213 : vector<1x4x416xbf16> to vector<4x416xbf16>
    %c284 = arith.constant 284 : index
    %c0_235 = arith.constant 0 : index
    %215 = vector.load %arg6[%c284, %c0_235] : memref<484x416xbf16, #tpu.memory_space<vmem>>, vector<4x416xbf16>
    tpu.vector_store %arg6[%c284, %c0_235], %214 {strides = array<i32>} : memref<484x416xbf16, #tpu.memory_space<vmem>>, vector<4x416xbf16>,
    %c0_236 = arith.constant 0 : index
    %c0_237 = arith.constant 0 : index
    %c162 = arith.constant 162 : index
    %216 = vector.load %arg2[%c0_236, %c0_237, %c162] : memref<1x4x702xbf16, #tpu.memory_space<vmem>>, vector<1x4x416xbf16>
    %217 = vector.shape_cast %216 : vector<1x4x416xbf16> to vector<4x416xbf16>
    %c288 = arith.constant 288 : index
    %c0_238 = arith.constant 0 : index
    %218 = vector.load %arg6[%c288, %c0_238] : memref<484x416xbf16, #tpu.memory_space<vmem>>, vector<4x416xbf16>
    tpu.vector_store %arg6[%c288, %c0_238], %217 {strides = array<i32>} : memref<484x416xbf16, #tpu.memory_space<vmem>>, vector<4x416xbf16>,
    %c0_239 = arith.constant 0 : index
    %c0_240 = arith.constant 0 : index
    %c163 = arith.constant 163 : index
    %219 = vector.load %arg2[%c0_239, %c0_240, %c163] : memref<1x4x702xbf16, #tpu.memory_space<vmem>>, vector<1x4x416xbf16>
    %220 = vector.shape_cast %219 : vector<1x4x416xbf16> to vector<4x416xbf16>
    %c292 = arith.constant 292 : index
    %c0_241 = arith.constant 0 : index
    %221 = vector.load %arg6[%c292, %c0_241] : memref<484x416xbf16, #tpu.memory_space<vmem>>, vector<4x416xbf16>
    tpu.vector_store %arg6[%c292, %c0_241], %220 {strides = array<i32>} : memref<484x416xbf16, #tpu.memory_space<vmem>>, vector<4x416xbf16>,
    %c0_242 = arith.constant 0 : index
    %c0_243 = arith.constant 0 : index
    %c164_244 = arith.constant 164 : index
    %222 = vector.load %arg2[%c0_242, %c0_243, %c164_244] : memref<1x4x702xbf16, #tpu.memory_space<vmem>>, vector<1x4x416xbf16>
    %223 = vector.shape_cast %222 : vector<1x4x416xbf16> to vector<4x416xbf16>
    %c296 = arith.constant 296 : index
    %c0_245 = arith.constant 0 : index
    %224 = vector.load %arg6[%c296, %c0_245] : memref<484x416xbf16, #tpu.memory_space<vmem>>, vector<4x416xbf16>
    tpu.vector_store %arg6[%c296, %c0_245], %223 {strides = array<i32>} : memref<484x416xbf16, #tpu.memory_space<vmem>>, vector<4x416xbf16>,
    %c0_246 = arith.constant 0 : index
    %c0_247 = arith.constant 0 : index
    %c165 = arith.constant 165 : index
    %225 = vector.load %arg2[%c0_246, %c0_247, %c165] : memref<1x4x702xbf16, #tpu.memory_space<vmem>>, vector<1x4x416xbf16>
    %226 = vector.shape_cast %225 : vector<1x4x416xbf16> to vector<4x416xbf16>
    %c300 = arith.constant 300 : index
    %c0_248 = arith.constant 0 : index
    %227 = vector.load %arg6[%c300, %c0_248] : memref<484x416xbf16, #tpu.memory_space<vmem>>, vector<4x416xbf16>
    tpu.vector_store %arg6[%c300, %c0_248], %226 {strides = array<i32>} : memref<484x416xbf16, #tpu.memory_space<vmem>>, vector<4x416xbf16>,
    %c0_249 = arith.constant 0 : index
    %c0_250 = arith.constant 0 : index
    %c166 = arith.constant 166 : index
    %228 = vector.load %arg2[%c0_249, %c0_250, %c166] : memref<1x4x702xbf16, #tpu.memory_space<vmem>>, vector<1x4x416xbf16>
    %229 = vector.shape_cast %228 : vector<1x4x416xbf16> to vector<4x416xbf16>
    %c304 = arith.constant 304 : index
    %c0_251 = arith.constant 0 : index
    %230 = vector.load %arg6[%c304, %c0_251] : memref<484x416xbf16, #tpu.memory_space<vmem>>, vector<4x416xbf16>
    tpu.vector_store %arg6[%c304, %c0_251], %229 {strides = array<i32>} : memref<484x416xbf16, #tpu.memory_space<vmem>>, vector<4x416xbf16>,
    %c0_252 = arith.constant 0 : index
    %c0_253 = arith.constant 0 : index
    %c182 = arith.constant 182 : index
    %231 = vector.load %arg2[%c0_252, %c0_253, %c182] : memref<1x4x702xbf16, #tpu.memory_space<vmem>>, vector<1x4x416xbf16>
    %232 = vector.shape_cast %231 : vector<1x4x416xbf16> to vector<4x416xbf16>
    %c308 = arith.constant 308 : index
    %c0_254 = arith.constant 0 : index
    %233 = vector.load %arg6[%c308, %c0_254] : memref<484x416xbf16, #tpu.memory_space<vmem>>, vector<4x416xbf16>
    tpu.vector_store %arg6[%c308, %c0_254], %232 {strides = array<i32>} : memref<484x416xbf16, #tpu.memory_space<vmem>>, vector<4x416xbf16>,
    %c0_255 = arith.constant 0 : index
    %c0_256 = arith.constant 0 : index
    %c183 = arith.constant 183 : index
    %234 = vector.load %arg2[%c0_255, %c0_256, %c183] : memref<1x4x702xbf16, #tpu.memory_space<vmem>>, vector<1x4x416xbf16>
    %235 = vector.shape_cast %234 : vector<1x4x416xbf16> to vector<4x416xbf16>
    %c312 = arith.constant 312 : index
    %c0_257 = arith.constant 0 : index
    %236 = vector.load %arg6[%c312, %c0_257] : memref<484x416xbf16, #tpu.memory_space<vmem>>, vector<4x416xbf16>
    tpu.vector_store %arg6[%c312, %c0_257], %235 {strides = array<i32>} : memref<484x416xbf16, #tpu.memory_space<vmem>>, vector<4x416xbf16>,
    %c0_258 = arith.constant 0 : index
    %c0_259 = arith.constant 0 : index
    %c184_260 = arith.constant 184 : index
    %237 = vector.load %arg2[%c0_258, %c0_259, %c184_260] : memref<1x4x702xbf16, #tpu.memory_space<vmem>>, vector<1x4x416xbf16>
    %238 = vector.shape_cast %237 : vector<1x4x416xbf16> to vector<4x416xbf16>
    %c316 = arith.constant 316 : index
    %c0_261 = arith.constant 0 : index
    %239 = vector.load %arg6[%c316, %c0_261] : memref<484x416xbf16, #tpu.memory_space<vmem>>, vector<4x416xbf16>
    tpu.vector_store %arg6[%c316, %c0_261], %238 {strides = array<i32>} : memref<484x416xbf16, #tpu.memory_space<vmem>>, vector<4x416xbf16>,
    %c0_262 = arith.constant 0 : index
    %c0_263 = arith.constant 0 : index
    %c185 = arith.constant 185 : index
    %240 = vector.load %arg2[%c0_262, %c0_263, %c185] : memref<1x4x702xbf16, #tpu.memory_space<vmem>>, vector<1x4x416xbf16>
    %241 = vector.shape_cast %240 : vector<1x4x416xbf16> to vector<4x416xbf16>
    %c320 = arith.constant 320 : index
    %c0_264 = arith.constant 0 : index
    %242 = vector.load %arg6[%c320, %c0_264] : memref<484x416xbf16, #tpu.memory_space<vmem>>, vector<4x416xbf16>
    tpu.vector_store %arg6[%c320, %c0_264], %241 {strides = array<i32>} : memref<484x416xbf16, #tpu.memory_space<vmem>>, vector<4x416xbf16>,
    %c0_265 = arith.constant 0 : index
    %c0_266 = arith.constant 0 : index
    %c186 = arith.constant 186 : index
    %243 = vector.load %arg2[%c0_265, %c0_266, %c186] : memref<1x4x702xbf16, #tpu.memory_space<vmem>>, vector<1x4x416xbf16>
    %244 = vector.shape_cast %243 : vector<1x4x416xbf16> to vector<4x416xbf16>
    %c324 = arith.constant 324 : index
    %c0_267 = arith.constant 0 : index
    %245 = vector.load %arg6[%c324, %c0_267] : memref<484x416xbf16, #tpu.memory_space<vmem>>, vector<4x416xbf16>
    tpu.vector_store %arg6[%c324, %c0_267], %244 {strides = array<i32>} : memref<484x416xbf16, #tpu.memory_space<vmem>>, vector<4x416xbf16>,
    %c0_268 = arith.constant 0 : index
    %c0_269 = arith.constant 0 : index
    %c187 = arith.constant 187 : index
    %246 = vector.load %arg2[%c0_268, %c0_269, %c187] : memref<1x4x702xbf16, #tpu.memory_space<vmem>>, vector<1x4x416xbf16>
    %247 = vector.shape_cast %246 : vector<1x4x416xbf16> to vector<4x416xbf16>
    %c328 = arith.constant 328 : index
    %c0_270 = arith.constant 0 : index
    %248 = vector.load %arg6[%c328, %c0_270] : memref<484x416xbf16, #tpu.memory_space<vmem>>, vector<4x416xbf16>
    tpu.vector_store %arg6[%c328, %c0_270], %247 {strides = array<i32>} : memref<484x416xbf16, #tpu.memory_space<vmem>>, vector<4x416xbf16>,
    %c0_271 = arith.constant 0 : index
    %c0_272 = arith.constant 0 : index
    %c188_273 = arith.constant 188 : index
    %249 = vector.load %arg2[%c0_271, %c0_272, %c188_273] : memref<1x4x702xbf16, #tpu.memory_space<vmem>>, vector<1x4x416xbf16>
    %250 = vector.shape_cast %249 : vector<1x4x416xbf16> to vector<4x416xbf16>
    %c332 = arith.constant 332 : index
    %c0_274 = arith.constant 0 : index
    %251 = vector.load %arg6[%c332, %c0_274] : memref<484x416xbf16, #tpu.memory_space<vmem>>, vector<4x416xbf16>
    tpu.vector_store %arg6[%c332, %c0_274], %250 {strides = array<i32>} : memref<484x416xbf16, #tpu.memory_space<vmem>>, vector<4x416xbf16>,
    %c0_275 = arith.constant 0 : index
    %c0_276 = arith.constant 0 : index
    %c189 = arith.constant 189 : index
    %252 = vector.load %arg2[%c0_275, %c0_276, %c189] : memref<1x4x702xbf16, #tpu.memory_space<vmem>>, vector<1x4x416xbf16>
    %253 = vector.shape_cast %252 : vector<1x4x416xbf16> to vector<4x416xbf16>
    %c336 = arith.constant 336 : index
    %c0_277 = arith.constant 0 : index
    %254 = vector.load %arg6[%c336, %c0_277] : memref<484x416xbf16, #tpu.memory_space<vmem>>, vector<4x416xbf16>
    tpu.vector_store %arg6[%c336, %c0_277], %253 {strides = array<i32>} : memref<484x416xbf16, #tpu.memory_space<vmem>>, vector<4x416xbf16>,
    %c0_278 = arith.constant 0 : index
    %c0_279 = arith.constant 0 : index
    %c190 = arith.constant 190 : index
    %255 = vector.load %arg2[%c0_278, %c0_279, %c190] : memref<1x4x702xbf16, #tpu.memory_space<vmem>>, vector<1x4x416xbf16>
    %256 = vector.shape_cast %255 : vector<1x4x416xbf16> to vector<4x416xbf16>
    %c340 = arith.constant 340 : index
    %c0_280 = arith.constant 0 : index
    %257 = vector.load %arg6[%c340, %c0_280] : memref<484x416xbf16, #tpu.memory_space<vmem>>, vector<4x416xbf16>
    tpu.vector_store %arg6[%c340, %c0_280], %256 {strides = array<i32>} : memref<484x416xbf16, #tpu.memory_space<vmem>>, vector<4x416xbf16>,
    %c0_281 = arith.constant 0 : index
    %c0_282 = arith.constant 0 : index
    %c191 = arith.constant 191 : index
    %258 = vector.load %arg2[%c0_281, %c0_282, %c191] : memref<1x4x702xbf16, #tpu.memory_space<vmem>>, vector<1x4x416xbf16>
    %259 = vector.shape_cast %258 : vector<1x4x416xbf16> to vector<4x416xbf16>
    %c344 = arith.constant 344 : index
    %c0_283 = arith.constant 0 : index
    %260 = vector.load %arg6[%c344, %c0_283] : memref<484x416xbf16, #tpu.memory_space<vmem>>, vector<4x416xbf16>
    tpu.vector_store %arg6[%c344, %c0_283], %259 {strides = array<i32>} : memref<484x416xbf16, #tpu.memory_space<vmem>>, vector<4x416xbf16>,
    %c0_284 = arith.constant 0 : index
    %c0_285 = arith.constant 0 : index
    %c192_286 = arith.constant 192 : index
    %261 = vector.load %arg2[%c0_284, %c0_285, %c192_286] : memref<1x4x702xbf16, #tpu.memory_space<vmem>>, vector<1x4x416xbf16>
    %262 = vector.shape_cast %261 : vector<1x4x416xbf16> to vector<4x416xbf16>
    %c348 = arith.constant 348 : index
    %c0_287 = arith.constant 0 : index
    %263 = vector.load %arg6[%c348, %c0_287] : memref<484x416xbf16, #tpu.memory_space<vmem>>, vector<4x416xbf16>
    tpu.vector_store %arg6[%c348, %c0_287], %262 {strides = array<i32>} : memref<484x416xbf16, #tpu.memory_space<vmem>>, vector<4x416xbf16>,
    %c0_288 = arith.constant 0 : index
    %c0_289 = arith.constant 0 : index
    %c208_290 = arith.constant 208 : index
    %264 = vector.load %arg2[%c0_288, %c0_289, %c208_290] : memref<1x4x702xbf16, #tpu.memory_space<vmem>>, vector<1x4x416xbf16>
    %265 = vector.shape_cast %264 : vector<1x4x416xbf16> to vector<4x416xbf16>
    %c352 = arith.constant 352 : index
    %c0_291 = arith.constant 0 : index
    %266 = vector.load %arg6[%c352, %c0_291] : memref<484x416xbf16, #tpu.memory_space<vmem>>, vector<4x416xbf16>
    tpu.vector_store %arg6[%c352, %c0_291], %265 {strides = array<i32>} : memref<484x416xbf16, #tpu.memory_space<vmem>>, vector<4x416xbf16>,
    %c0_292 = arith.constant 0 : index
    %c0_293 = arith.constant 0 : index
    %c209 = arith.constant 209 : index
    %267 = vector.load %arg2[%c0_292, %c0_293, %c209] : memref<1x4x702xbf16, #tpu.memory_space<vmem>>, vector<1x4x416xbf16>
    %268 = vector.shape_cast %267 : vector<1x4x416xbf16> to vector<4x416xbf16>
    %c356 = arith.constant 356 : index
    %c0_294 = arith.constant 0 : index
    %269 = vector.load %arg6[%c356, %c0_294] : memref<484x416xbf16, #tpu.memory_space<vmem>>, vector<4x416xbf16>
    tpu.vector_store %arg6[%c356, %c0_294], %268 {strides = array<i32>} : memref<484x416xbf16, #tpu.memory_space<vmem>>, vector<4x416xbf16>,
    %c0_295 = arith.constant 0 : index
    %c0_296 = arith.constant 0 : index
    %c210 = arith.constant 210 : index
    %270 = vector.load %arg2[%c0_295, %c0_296, %c210] : memref<1x4x702xbf16, #tpu.memory_space<vmem>>, vector<1x4x416xbf16>
    %271 = vector.shape_cast %270 : vector<1x4x416xbf16> to vector<4x416xbf16>
    %c360 = arith.constant 360 : index
    %c0_297 = arith.constant 0 : index
    %272 = vector.load %arg6[%c360, %c0_297] : memref<484x416xbf16, #tpu.memory_space<vmem>>, vector<4x416xbf16>
    tpu.vector_store %arg6[%c360, %c0_297], %271 {strides = array<i32>} : memref<484x416xbf16, #tpu.memory_space<vmem>>, vector<4x416xbf16>,
    %c0_298 = arith.constant 0 : index
    %c0_299 = arith.constant 0 : index
    %c211 = arith.constant 211 : index
    %273 = vector.load %arg2[%c0_298, %c0_299, %c211] : memref<1x4x702xbf16, #tpu.memory_space<vmem>>, vector<1x4x416xbf16>
    %274 = vector.shape_cast %273 : vector<1x4x416xbf16> to vector<4x416xbf16>
    %c364 = arith.constant 364 : index
    %c0_300 = arith.constant 0 : index
    %275 = vector.load %arg6[%c364, %c0_300] : memref<484x416xbf16, #tpu.memory_space<vmem>>, vector<4x416xbf16>
    tpu.vector_store %arg6[%c364, %c0_300], %274 {strides = array<i32>} : memref<484x416xbf16, #tpu.memory_space<vmem>>, vector<4x416xbf16>,
    %c0_301 = arith.constant 0 : index
    %c0_302 = arith.constant 0 : index
    %c212_303 = arith.constant 212 : index
    %276 = vector.load %arg2[%c0_301, %c0_302, %c212_303] : memref<1x4x702xbf16, #tpu.memory_space<vmem>>, vector<1x4x416xbf16>
    %277 = vector.shape_cast %276 : vector<1x4x416xbf16> to vector<4x416xbf16>
    %c368 = arith.constant 368 : index
    %c0_304 = arith.constant 0 : index
    %278 = vector.load %arg6[%c368, %c0_304] : memref<484x416xbf16, #tpu.memory_space<vmem>>, vector<4x416xbf16>
    tpu.vector_store %arg6[%c368, %c0_304], %277 {strides = array<i32>} : memref<484x416xbf16, #tpu.memory_space<vmem>>, vector<4x416xbf16>,
    %c0_305 = arith.constant 0 : index
    %c0_306 = arith.constant 0 : index
    %c213 = arith.constant 213 : index
    %279 = vector.load %arg2[%c0_305, %c0_306, %c213] : memref<1x4x702xbf16, #tpu.memory_space<vmem>>, vector<1x4x416xbf16>
    %280 = vector.shape_cast %279 : vector<1x4x416xbf16> to vector<4x416xbf16>
    %c372 = arith.constant 372 : index
    %c0_307 = arith.constant 0 : index
    %281 = vector.load %arg6[%c372, %c0_307] : memref<484x416xbf16, #tpu.memory_space<vmem>>, vector<4x416xbf16>
    tpu.vector_store %arg6[%c372, %c0_307], %280 {strides = array<i32>} : memref<484x416xbf16, #tpu.memory_space<vmem>>, vector<4x416xbf16>,
    %c0_308 = arith.constant 0 : index
    %c0_309 = arith.constant 0 : index
    %c214 = arith.constant 214 : index
    %282 = vector.load %arg2[%c0_308, %c0_309, %c214] : memref<1x4x702xbf16, #tpu.memory_space<vmem>>, vector<1x4x416xbf16>
    %283 = vector.shape_cast %282 : vector<1x4x416xbf16> to vector<4x416xbf16>
    %c376 = arith.constant 376 : index
    %c0_310 = arith.constant 0 : index
    %284 = vector.load %arg6[%c376, %c0_310] : memref<484x416xbf16, #tpu.memory_space<vmem>>, vector<4x416xbf16>
    tpu.vector_store %arg6[%c376, %c0_310], %283 {strides = array<i32>} : memref<484x416xbf16, #tpu.memory_space<vmem>>, vector<4x416xbf16>,
    %c0_311 = arith.constant 0 : index
    %c0_312 = arith.constant 0 : index
    %c215 = arith.constant 215 : index
    %285 = vector.load %arg2[%c0_311, %c0_312, %c215] : memref<1x4x702xbf16, #tpu.memory_space<vmem>>, vector<1x4x416xbf16>
    %286 = vector.shape_cast %285 : vector<1x4x416xbf16> to vector<4x416xbf16>
    %c380 = arith.constant 380 : index
    %c0_313 = arith.constant 0 : index
    %287 = vector.load %arg6[%c380, %c0_313] : memref<484x416xbf16, #tpu.memory_space<vmem>>, vector<4x416xbf16>
    tpu.vector_store %arg6[%c380, %c0_313], %286 {strides = array<i32>} : memref<484x416xbf16, #tpu.memory_space<vmem>>, vector<4x416xbf16>,
    %c0_314 = arith.constant 0 : index
    %c0_315 = arith.constant 0 : index
    %c216_316 = arith.constant 216 : index
    %288 = vector.load %arg2[%c0_314, %c0_315, %c216_316] : memref<1x4x702xbf16, #tpu.memory_space<vmem>>, vector<1x4x416xbf16>
    %289 = vector.shape_cast %288 : vector<1x4x416xbf16> to vector<4x416xbf16>
    %c384 = arith.constant 384 : index
    %c0_317 = arith.constant 0 : index
    %290 = vector.load %arg6[%c384, %c0_317] : memref<484x416xbf16, #tpu.memory_space<vmem>>, vector<4x416xbf16>
    tpu.vector_store %arg6[%c384, %c0_317], %289 {strides = array<i32>} : memref<484x416xbf16, #tpu.memory_space<vmem>>, vector<4x416xbf16>,
    %c0_318 = arith.constant 0 : index
    %c0_319 = arith.constant 0 : index
    %c217 = arith.constant 217 : index
    %291 = vector.load %arg2[%c0_318, %c0_319, %c217] : memref<1x4x702xbf16, #tpu.memory_space<vmem>>, vector<1x4x416xbf16>
    %292 = vector.shape_cast %291 : vector<1x4x416xbf16> to vector<4x416xbf16>
    %c388 = arith.constant 388 : index
    %c0_320 = arith.constant 0 : index
    %293 = vector.load %arg6[%c388, %c0_320] : memref<484x416xbf16, #tpu.memory_space<vmem>>, vector<4x416xbf16>
    tpu.vector_store %arg6[%c388, %c0_320], %292 {strides = array<i32>} : memref<484x416xbf16, #tpu.memory_space<vmem>>, vector<4x416xbf16>,
    %c0_321 = arith.constant 0 : index
    %c0_322 = arith.constant 0 : index
    %c218 = arith.constant 218 : index
    %294 = vector.load %arg2[%c0_321, %c0_322, %c218] : memref<1x4x702xbf16, #tpu.memory_space<vmem>>, vector<1x4x416xbf16>
    %295 = vector.shape_cast %294 : vector<1x4x416xbf16> to vector<4x416xbf16>
    %c392 = arith.constant 392 : index
    %c0_323 = arith.constant 0 : index
    %296 = vector.load %arg6[%c392, %c0_323] : memref<484x416xbf16, #tpu.memory_space<vmem>>, vector<4x416xbf16>
    tpu.vector_store %arg6[%c392, %c0_323], %295 {strides = array<i32>} : memref<484x416xbf16, #tpu.memory_space<vmem>>, vector<4x416xbf16>,
    %c0_324 = arith.constant 0 : index
    %c0_325 = arith.constant 0 : index
    %c234 = arith.constant 234 : index
    %297 = vector.load %arg2[%c0_324, %c0_325, %c234] : memref<1x4x702xbf16, #tpu.memory_space<vmem>>, vector<1x4x416xbf16>
    %298 = vector.shape_cast %297 : vector<1x4x416xbf16> to vector<4x416xbf16>
    %c396 = arith.constant 396 : index
    %c0_326 = arith.constant 0 : index
    %299 = vector.load %arg6[%c396, %c0_326] : memref<484x416xbf16, #tpu.memory_space<vmem>>, vector<4x416xbf16>
    tpu.vector_store %arg6[%c396, %c0_326], %298 {strides = array<i32>} : memref<484x416xbf16, #tpu.memory_space<vmem>>, vector<4x416xbf16>,
    %c0_327 = arith.constant 0 : index
    %c0_328 = arith.constant 0 : index
    %c235 = arith.constant 235 : index
    %300 = vector.load %arg2[%c0_327, %c0_328, %c235] : memref<1x4x702xbf16, #tpu.memory_space<vmem>>, vector<1x4x416xbf16>
    %301 = vector.shape_cast %300 : vector<1x4x416xbf16> to vector<4x416xbf16>
    %c400 = arith.constant 400 : index
    %c0_329 = arith.constant 0 : index
    %302 = vector.load %arg6[%c400, %c0_329] : memref<484x416xbf16, #tpu.memory_space<vmem>>, vector<4x416xbf16>
    tpu.vector_store %arg6[%c400, %c0_329], %301 {strides = array<i32>} : memref<484x416xbf16, #tpu.memory_space<vmem>>, vector<4x416xbf16>,
    %c0_330 = arith.constant 0 : index
    %c0_331 = arith.constant 0 : index
    %c236_332 = arith.constant 236 : index
    %303 = vector.load %arg2[%c0_330, %c0_331, %c236_332] : memref<1x4x702xbf16, #tpu.memory_space<vmem>>, vector<1x4x416xbf16>
    %304 = vector.shape_cast %303 : vector<1x4x416xbf16> to vector<4x416xbf16>
    %c404 = arith.constant 404 : index
    %c0_333 = arith.constant 0 : index
    %305 = vector.load %arg6[%c404, %c0_333] : memref<484x416xbf16, #tpu.memory_space<vmem>>, vector<4x416xbf16>
    tpu.vector_store %arg6[%c404, %c0_333], %304 {strides = array<i32>} : memref<484x416xbf16, #tpu.memory_space<vmem>>, vector<4x416xbf16>,
    %c0_334 = arith.constant 0 : index
    %c0_335 = arith.constant 0 : index
    %c237 = arith.constant 237 : index
    %306 = vector.load %arg2[%c0_334, %c0_335, %c237] : memref<1x4x702xbf16, #tpu.memory_space<vmem>>, vector<1x4x416xbf16>
    %307 = vector.shape_cast %306 : vector<1x4x416xbf16> to vector<4x416xbf16>
    %c408 = arith.constant 408 : index
    %c0_336 = arith.constant 0 : index
    %308 = vector.load %arg6[%c408, %c0_336] : memref<484x416xbf16, #tpu.memory_space<vmem>>, vector<4x416xbf16>
    tpu.vector_store %arg6[%c408, %c0_336], %307 {strides = array<i32>} : memref<484x416xbf16, #tpu.memory_space<vmem>>, vector<4x416xbf16>,
    %c0_337 = arith.constant 0 : index
    %c0_338 = arith.constant 0 : index
    %c238 = arith.constant 238 : index
    %309 = vector.load %arg2[%c0_337, %c0_338, %c238] : memref<1x4x702xbf16, #tpu.memory_space<vmem>>, vector<1x4x416xbf16>
    %310 = vector.shape_cast %309 : vector<1x4x416xbf16> to vector<4x416xbf16>
    %c412 = arith.constant 412 : index
    %c0_339 = arith.constant 0 : index
    %311 = vector.load %arg6[%c412, %c0_339] : memref<484x416xbf16, #tpu.memory_space<vmem>>, vector<4x416xbf16>
    tpu.vector_store %arg6[%c412, %c0_339], %310 {strides = array<i32>} : memref<484x416xbf16, #tpu.memory_space<vmem>>, vector<4x416xbf16>,
    %c0_340 = arith.constant 0 : index
    %c0_341 = arith.constant 0 : index
    %c239 = arith.constant 239 : index
    %312 = vector.load %arg2[%c0_340, %c0_341, %c239] : memref<1x4x702xbf16, #tpu.memory_space<vmem>>, vector<1x4x416xbf16>
    %313 = vector.shape_cast %312 : vector<1x4x416xbf16> to vector<4x416xbf16>
    %c416 = arith.constant 416 : index
    %c0_342 = arith.constant 0 : index
    %314 = vector.load %arg6[%c416, %c0_342] : memref<484x416xbf16, #tpu.memory_space<vmem>>, vector<4x416xbf16>
    tpu.vector_store %arg6[%c416, %c0_342], %313 {strides = array<i32>} : memref<484x416xbf16, #tpu.memory_space<vmem>>, vector<4x416xbf16>,
    %c0_343 = arith.constant 0 : index
    %c0_344 = arith.constant 0 : index
    %c240_345 = arith.constant 240 : index
    %315 = vector.load %arg2[%c0_343, %c0_344, %c240_345] : memref<1x4x702xbf16, #tpu.memory_space<vmem>>, vector<1x4x416xbf16>
    %316 = vector.shape_cast %315 : vector<1x4x416xbf16> to vector<4x416xbf16>
    %c420 = arith.constant 420 : index
    %c0_346 = arith.constant 0 : index
    %317 = vector.load %arg6[%c420, %c0_346] : memref<484x416xbf16, #tpu.memory_space<vmem>>, vector<4x416xbf16>
    tpu.vector_store %arg6[%c420, %c0_346], %316 {strides = array<i32>} : memref<484x416xbf16, #tpu.memory_space<vmem>>, vector<4x416xbf16>,
    %c0_347 = arith.constant 0 : index
    %c0_348 = arith.constant 0 : index
    %c241 = arith.constant 241 : index
    %318 = vector.load %arg2[%c0_347, %c0_348, %c241] : memref<1x4x702xbf16, #tpu.memory_space<vmem>>, vector<1x4x416xbf16>
    %319 = vector.shape_cast %318 : vector<1x4x416xbf16> to vector<4x416xbf16>
    %c424 = arith.constant 424 : index
    %c0_349 = arith.constant 0 : index
    %320 = vector.load %arg6[%c424, %c0_349] : memref<484x416xbf16, #tpu.memory_space<vmem>>, vector<4x416xbf16>
    tpu.vector_store %arg6[%c424, %c0_349], %319 {strides = array<i32>} : memref<484x416xbf16, #tpu.memory_space<vmem>>, vector<4x416xbf16>,
    %c0_350 = arith.constant 0 : index
    %c0_351 = arith.constant 0 : index
    %c242 = arith.constant 242 : index
    %321 = vector.load %arg2[%c0_350, %c0_351, %c242] : memref<1x4x702xbf16, #tpu.memory_space<vmem>>, vector<1x4x416xbf16>
    %322 = vector.shape_cast %321 : vector<1x4x416xbf16> to vector<4x416xbf16>
    %c428 = arith.constant 428 : index
    %c0_352 = arith.constant 0 : index
    %323 = vector.load %arg6[%c428, %c0_352] : memref<484x416xbf16, #tpu.memory_space<vmem>>, vector<4x416xbf16>
    tpu.vector_store %arg6[%c428, %c0_352], %322 {strides = array<i32>} : memref<484x416xbf16, #tpu.memory_space<vmem>>, vector<4x416xbf16>,
    %c0_353 = arith.constant 0 : index
    %c0_354 = arith.constant 0 : index
    %c243 = arith.constant 243 : index
    %324 = vector.load %arg2[%c0_353, %c0_354, %c243] : memref<1x4x702xbf16, #tpu.memory_space<vmem>>, vector<1x4x416xbf16>
    %325 = vector.shape_cast %324 : vector<1x4x416xbf16> to vector<4x416xbf16>
    %c432 = arith.constant 432 : index
    %c0_355 = arith.constant 0 : index
    %326 = vector.load %arg6[%c432, %c0_355] : memref<484x416xbf16, #tpu.memory_space<vmem>>, vector<4x416xbf16>
    tpu.vector_store %arg6[%c432, %c0_355], %325 {strides = array<i32>} : memref<484x416xbf16, #tpu.memory_space<vmem>>, vector<4x416xbf16>,
    %c0_356 = arith.constant 0 : index
    %c0_357 = arith.constant 0 : index
    %c244_358 = arith.constant 244 : index
    %327 = vector.load %arg2[%c0_356, %c0_357, %c244_358] : memref<1x4x702xbf16, #tpu.memory_space<vmem>>, vector<1x4x416xbf16>
    %328 = vector.shape_cast %327 : vector<1x4x416xbf16> to vector<4x416xbf16>
    %c436 = arith.constant 436 : index
    %c0_359 = arith.constant 0 : index
    %329 = vector.load %arg6[%c436, %c0_359] : memref<484x416xbf16, #tpu.memory_space<vmem>>, vector<4x416xbf16>
    tpu.vector_store %arg6[%c436, %c0_359], %328 {strides = array<i32>} : memref<484x416xbf16, #tpu.memory_space<vmem>>, vector<4x416xbf16>,
    %c0_360 = arith.constant 0 : index
    %c0_361 = arith.constant 0 : index
    %c260_362 = arith.constant 260 : index
    %330 = vector.load %arg2[%c0_360, %c0_361, %c260_362] : memref<1x4x702xbf16, #tpu.memory_space<vmem>>, vector<1x4x416xbf16>
    %331 = vector.shape_cast %330 : vector<1x4x416xbf16> to vector<4x416xbf16>
    %c440 = arith.constant 440 : index
    %c0_363 = arith.constant 0 : index
    %332 = vector.load %arg6[%c440, %c0_363] : memref<484x416xbf16, #tpu.memory_space<vmem>>, vector<4x416xbf16>
    tpu.vector_store %arg6[%c440, %c0_363], %331 {strides = array<i32>} : memref<484x416xbf16, #tpu.memory_space<vmem>>, vector<4x416xbf16>,
    %c0_364 = arith.constant 0 : index
    %c0_365 = arith.constant 0 : index
    %c261 = arith.constant 261 : index
    %333 = vector.load %arg2[%c0_364, %c0_365, %c261] : memref<1x4x702xbf16, #tpu.memory_space<vmem>>, vector<1x4x416xbf16>
    %334 = vector.shape_cast %333 : vector<1x4x416xbf16> to vector<4x416xbf16>
    %c444 = arith.constant 444 : index
    %c0_366 = arith.constant 0 : index
    %335 = vector.load %arg6[%c444, %c0_366] : memref<484x416xbf16, #tpu.memory_space<vmem>>, vector<4x416xbf16>
    tpu.vector_store %arg6[%c444, %c0_366], %334 {strides = array<i32>} : memref<484x416xbf16, #tpu.memory_space<vmem>>, vector<4x416xbf16>,
    %c0_367 = arith.constant 0 : index
    %c0_368 = arith.constant 0 : index
    %c262 = arith.constant 262 : index
    %336 = vector.load %arg2[%c0_367, %c0_368, %c262] : memref<1x4x702xbf16, #tpu.memory_space<vmem>>, vector<1x4x416xbf16>
    %337 = vector.shape_cast %336 : vector<1x4x416xbf16> to vector<4x416xbf16>
    %c448 = arith.constant 448 : index
    %c0_369 = arith.constant 0 : index
    %338 = vector.load %arg6[%c448, %c0_369] : memref<484x416xbf16, #tpu.memory_space<vmem>>, vector<4x416xbf16>
    tpu.vector_store %arg6[%c448, %c0_369], %337 {strides = array<i32>} : memref<484x416xbf16, #tpu.memory_space<vmem>>, vector<4x416xbf16>,
    %c0_370 = arith.constant 0 : index
    %c0_371 = arith.constant 0 : index
    %c263 = arith.constant 263 : index
    %339 = vector.load %arg2[%c0_370, %c0_371, %c263] : memref<1x4x702xbf16, #tpu.memory_space<vmem>>, vector<1x4x416xbf16>
    %340 = vector.shape_cast %339 : vector<1x4x416xbf16> to vector<4x416xbf16>
    %c452 = arith.constant 452 : index
    %c0_372 = arith.constant 0 : index
    %341 = vector.load %arg6[%c452, %c0_372] : memref<484x416xbf16, #tpu.memory_space<vmem>>, vector<4x416xbf16>
    tpu.vector_store %arg6[%c452, %c0_372], %340 {strides = array<i32>} : memref<484x416xbf16, #tpu.memory_space<vmem>>, vector<4x416xbf16>,
    %c0_373 = arith.constant 0 : index
    %c0_374 = arith.constant 0 : index
    %c264_375 = arith.constant 264 : index
    %342 = vector.load %arg2[%c0_373, %c0_374, %c264_375] : memref<1x4x702xbf16, #tpu.memory_space<vmem>>, vector<1x4x416xbf16>
    %343 = vector.shape_cast %342 : vector<1x4x416xbf16> to vector<4x416xbf16>
    %c456 = arith.constant 456 : index
    %c0_376 = arith.constant 0 : index
    %344 = vector.load %arg6[%c456, %c0_376] : memref<484x416xbf16, #tpu.memory_space<vmem>>, vector<4x416xbf16>
    tpu.vector_store %arg6[%c456, %c0_376], %343 {strides = array<i32>} : memref<484x416xbf16, #tpu.memory_space<vmem>>, vector<4x416xbf16>,
    %c0_377 = arith.constant 0 : index
    %c0_378 = arith.constant 0 : index
    %c265 = arith.constant 265 : index
    %345 = vector.load %arg2[%c0_377, %c0_378, %c265] : memref<1x4x702xbf16, #tpu.memory_space<vmem>>, vector<1x4x416xbf16>
    %346 = vector.shape_cast %345 : vector<1x4x416xbf16> to vector<4x416xbf16>
    %c460 = arith.constant 460 : index
    %c0_379 = arith.constant 0 : index
    %347 = vector.load %arg6[%c460, %c0_379] : memref<484x416xbf16, #tpu.memory_space<vmem>>, vector<4x416xbf16>
    tpu.vector_store %arg6[%c460, %c0_379], %346 {strides = array<i32>} : memref<484x416xbf16, #tpu.memory_space<vmem>>, vector<4x416xbf16>,
    %c0_380 = arith.constant 0 : index
    %c0_381 = arith.constant 0 : index
    %c266 = arith.constant 266 : index
    %348 = vector.load %arg2[%c0_380, %c0_381, %c266] : memref<1x4x702xbf16, #tpu.memory_space<vmem>>, vector<1x4x416xbf16>
    %349 = vector.shape_cast %348 : vector<1x4x416xbf16> to vector<4x416xbf16>
    %c464 = arith.constant 464 : index
    %c0_382 = arith.constant 0 : index
    %350 = vector.load %arg6[%c464, %c0_382] : memref<484x416xbf16, #tpu.memory_space<vmem>>, vector<4x416xbf16>
    tpu.vector_store %arg6[%c464, %c0_382], %349 {strides = array<i32>} : memref<484x416xbf16, #tpu.memory_space<vmem>>, vector<4x416xbf16>,
    %c0_383 = arith.constant 0 : index
    %c0_384 = arith.constant 0 : index
    %c267 = arith.constant 267 : index
    %351 = vector.load %arg2[%c0_383, %c0_384, %c267] : memref<1x4x702xbf16, #tpu.memory_space<vmem>>, vector<1x4x416xbf16>
    %352 = vector.shape_cast %351 : vector<1x4x416xbf16> to vector<4x416xbf16>
    %c468 = arith.constant 468 : index
    %c0_385 = arith.constant 0 : index
    %353 = vector.load %arg6[%c468, %c0_385] : memref<484x416xbf16, #tpu.memory_space<vmem>>, vector<4x416xbf16>
    tpu.vector_store %arg6[%c468, %c0_385], %352 {strides = array<i32>} : memref<484x416xbf16, #tpu.memory_space<vmem>>, vector<4x416xbf16>,
    %c0_386 = arith.constant 0 : index
    %c0_387 = arith.constant 0 : index
    %c268_388 = arith.constant 268 : index
    %354 = vector.load %arg2[%c0_386, %c0_387, %c268_388] : memref<1x4x702xbf16, #tpu.memory_space<vmem>>, vector<1x4x416xbf16>
    %355 = vector.shape_cast %354 : vector<1x4x416xbf16> to vector<4x416xbf16>
    %c472 = arith.constant 472 : index
    %c0_389 = arith.constant 0 : index
    %356 = vector.load %arg6[%c472, %c0_389] : memref<484x416xbf16, #tpu.memory_space<vmem>>, vector<4x416xbf16>
    tpu.vector_store %arg6[%c472, %c0_389], %355 {strides = array<i32>} : memref<484x416xbf16, #tpu.memory_space<vmem>>, vector<4x416xbf16>,
    %c0_390 = arith.constant 0 : index
    %c0_391 = arith.constant 0 : index
    %c269 = arith.constant 269 : index
    %357 = vector.load %arg2[%c0_390, %c0_391, %c269] : memref<1x4x702xbf16, #tpu.memory_space<vmem>>, vector<1x4x416xbf16>
    %358 = vector.shape_cast %357 : vector<1x4x416xbf16> to vector<4x416xbf16>
    %c476 = arith.constant 476 : index
    %c0_392 = arith.constant 0 : index
    %359 = vector.load %arg6[%c476, %c0_392] : memref<484x416xbf16, #tpu.memory_space<vmem>>, vector<4x416xbf16>
    tpu.vector_store %arg6[%c476, %c0_392], %358 {strides = array<i32>} : memref<484x416xbf16, #tpu.memory_space<vmem>>, vector<4x416xbf16>,
    %c0_393 = arith.constant 0 : index
    %c0_394 = arith.constant 0 : index
    %c270 = arith.constant 270 : index
    %360 = vector.load %arg2[%c0_393, %c0_394, %c270] : memref<1x4x702xbf16, #tpu.memory_space<vmem>>, vector<1x4x416xbf16>
    %361 = vector.shape_cast %360 : vector<1x4x416xbf16> to vector<4x416xbf16>
    %c480 = arith.constant 480 : index
    %c0_395 = arith.constant 0 : index
    %362 = vector.load %arg6[%c480, %c0_395] : memref<484x416xbf16, #tpu.memory_space<vmem>>, vector<4x416xbf16>
    tpu.vector_store %arg6[%c480, %c0_395], %361 {strides = array<i32>} : memref<484x416xbf16, #tpu.memory_space<vmem>>, vector<4x416xbf16>,
    %c0_396 = arith.constant 0 : index
    %c0_397 = arith.constant 0 : index
    %363 = vector.load %arg3[%c0_396, %c0_397] : memref<8x484xbf16, #tpu.memory_space<vmem>>, vector<8x484xbf16>
    %c0_398 = arith.constant 0 : index
    %c0_399 = arith.constant 0 : index
    %364 = vector.load %arg6[%c0_398, %c0_399] : memref<484x416xbf16, #tpu.memory_space<vmem>>, vector<484x416xbf16>
    %cst = arith.constant dense<0.000000e+00> : vector<8x416xf32>
    %365 = tpu.matmul %363, %364, %cst {dimension_numbers = #tpu.dot_dimension_numbers<[1], [0], [0], [1], [0, 0, 1, 1], [], []>} : vector<8x484xbf16>, vector<484x416xbf16>, vector<8x416xf32> -> vector<8x416xf32>
    %c0_400 = arith.constant 0 : index
    %c0_401 = arith.constant 0 : index
    %366 = vector.load %arg4[%c0_400, %c0_401] : memref<8x1xf32, #tpu.memory_space<vmem>>, vector<8x1xf32>
    %367 = vector.broadcast %366 : vector<8x1xf32> to vector<8x416xf32>
    %368 = arith.addf %365, %367 : vector<8x416xf32>
    %c0_402 = arith.constant 0 : index
    %c0_403 = arith.constant 0 : index
    %c0_404 = arith.constant 0 : index
    %369 = vector.load %arg5[%c0_402, %c0_403, %c0_404] : memref<1x8x416xf32, #tpu.memory_space<vmem>>, vector<1x8x416xf32>
    %370 = vector.shape_cast %369 : vector<1x8x416xf32> to vector<8x416xf32>
    %371 = vector.shape_cast %368 : vector<8x416xf32> to vector<1x8x416xf32>
    tpu.vector_store %arg5[%c0_402, %c0_403, %c0_404], %371 {strides = array<i32>} : memref<1x8x416xf32, #tpu.memory_space<vmem>>, vector<1x8x416xf32>,
    return
  }
  func.func @transform_0(%arg0: i32, %arg1: i32) -> (i32, i32, i32) {
    %c0_i32 = arith.constant 0 : i32
    %c0_i32_0 = arith.constant 0 : i32
    %c0_i32_1 = arith.constant 0 : i32
    return %arg0, %c0_i32, %c0_i32_0 : i32, i32, i32
  }
  func.func @transform_1(%arg0: i32, %arg1: i32) -> (i32, i32) {
    %c0_i32 = arith.constant 0 : i32
    %c0_i32_0 = arith.constant 0 : i32
    %c0_i32_1 = arith.constant 0 : i32
    return %c0_i32, %c0_i32_0 : i32, i32
  }
  func.func @transform_2(%arg0: i32, %arg1: i32) -> (i32, i32) {
    %c0_i32 = arith.constant 0 : i32
    %c0_i32_0 = arith.constant 0 : i32
    %c0_i32_1 = arith.constant 0 : i32
    return %c0_i32, %c0_i32_0 : i32, i32
  }
  func.func @transform_3(%arg0: i32, %arg1: i32) -> (i32, i32, i32) {
    %c0_i32 = arith.constant 0 : i32
    %c0_i32_0 = arith.constant 0 : i32
    return %arg0, %c0_i32, %arg1 : i32, i32, i32
  }
}

</mosaic_0001>

<bundles_post_ra>
// kernel: inception_block_v1.1
= control target key start
LH: loop header
LB: loop body
LE: loop exit
PB: predicated region body
PF: predicated region fallthrough
CT: control target
= control target key end

     0   :  { %s4840_s12 = smov 0   ;;  %s4842_s13 = smov 0   ;;  %s6200_s0 = inlined_call_operand.vmem [shape: bf16[2,4,702], index: 0, kind: input, shape index: {}]   ;;  %s6201_s1 = inlined_call_operand.vmem [shape: bf16[8,484], index: 1, kind: input, shape index: {}]   ;;  %s6202_s2 = inlined_call_operand.vmem [shape: f32[8,1], index: 2, kind: input, shape index: {}]   ;;  %s6203_s3 = inlined_call_operand.vmem [shape: f32[2,8,416], index: 3, kind: output, shape index: {}]  }
   0x1   :  { %s4844_s14 = smov 0  }
   0x2 LB: > { %s25_s15 = sadd.s32 1, %s4747_s13  ;;  %p4024_p0 = scmp.ge.s32.totalorder %s4751_s14, 1  ;;  %s4751_s14 = sphi %s4844_s14, %s13_s14   ;;  %s4747_s13 = sphi %s4842_s13, %s6404_s13   ;;  %s4743_s12 = sphi %s4840_s12, %s6403_s12  }
   0x3   : > { %p27_p1 = scmp.ge.s32.totalorder %s25_s15, 2  ;;  %p151_p2 = scmp.lt.s32.totalorder %s4751_s14, 3 }
   0x5   : > { %s6406_s15 = smov (%p27_p1, %s25_s15), 0  ;;  %p152_p3 = pnand %p4024_p0, %p151_p2 }
   0x6   : > { %p179_p4 = scmp.lt.s32.totalorder (!%p152_p3), %s4743_s12, 1  ;;  %s4753_s20 = smov (!%p152_p3), 24  }
   0x7   : > { %155 = sbr.rel (%p152_p3) target bundleno = 1392 (0x570), region = 32  ;;  %s4754_s21 = smov (!%p152_p3), 23  }
   0x8   : > { %s4755_s22 = smov (!%p152_p3), 127   ;;  %s4756_s23 = smov (!%p152_p3), 126  }
   0x9   : > { %s4757_s24 = smov (!%p152_p3), 125   ;;  %s6287_s25 = smov (!%p152_p3), 22  }
   0xa   : > { %s4759_s26 = smov (!%p152_p3), 124   ;;  %s4760_s27 = smov (!%p152_p3), 21  }
   0xb   : > { %s4761_s28 = smov (!%p152_p3), 123   ;;  %s4762_s29 = smov (!%p152_p3), 122  }
   0xc   : > { %s6408_s12 = smov (!%p179_p4, %s4743_s12), 1  ;;  %s4763_s30 = smov 20   ;;  %vm6236_vm0 = vcmask 1041408   ;;  %vm204_vm1 = vcmask 259076   ;;  %vm247_vm3 = vcmask 1031168   ;;  %vm221_vm4 = vcmask 1043456  }
   0xd   : > { %s4635_s16 = smul.u32 12, %s6408_s12  ;;  %s4764_s4 = smov 121   ;;  %vm4921_vm2 = vmor %vm204_vm1, %vm6236_vm0  ;;  %vm229_vm5 = vcmask 1043458   ;;  %vm230_vm6 = vcmask 261126   ;;  %vm223_vm8 = vcmask 1039360   ;;  %vm290_vm9 = vcmask 1014784  }
   0xe   : > { %s4765_s5 = smov 120   ;;  %s4766_s6 = smov 119   ;;  %vm4965_vm7 = vmor %vm230_vm6, %vm229_vm5  ;;  %vm312_vm10 = vcmask 1006592   ;;  %vm6289_vm11 = vcmask 990208   ;;  %vm269_vm12 = vcmask 1022976   ;;  %vm6277_vm13 = vcmask 982016  }
   0xf   : > { %s4864_s19 = scalar_lea.vmem %s6200_s0, %s4635_s16  ;;  %s4767_s7 = smov 19   ;;  %vm6275_vm14 = vcmask 965632   ;;  %vm333_vm15 = vcmask 998400   ;;  %vm441_vm1 = vcmask 834560   ;;  %vm6263_vm5 = vcmask 818176  }
  0x10   : > { %v1137_v0 = vld [vmem:[%s4864_s19 + $0x8] sm:$0x3]  ;;  %v4868_v1 = vld [vmem:[%s4864_s19] sm:$0xff]  ;;  %s6222_s8 = smov 118   ;;  %s4769_s9 = smov 102   ;;  %vm6292_vm6 = vcmask 973824  }
  0x11   : > { %1142 = vst [vmem:[#allocation1 + $0x10] ss:$2 sm:$0xff] %v1137_v0  ;;  %v1168_v2 = vld [vmem:[%s4864_s19 + $0x8] sm:$0x3]  ;;  %s4770_s10 = smov 101   ;;  %s4771_s11 = smov 18  }
  0x12   : > { %197 = vst [vmem:[#allocation1] ss:$2 sm:$0xff] %v4868_v1  ;;  %v1200_v6 = vld [vmem:[%s4864_s19 + $0x8] sm:$0x3]  ;;  %s6218_s16 = smov 100   ;;  %s6208_s17 = smov 99  }
  0x13   : > { %v1231_v10 = vld [vmem:[%s4864_s19 + $0x8] sm:$0x3]  ;;  %s6206_s18 = smov 98   ;;  %vm6239_vm0 = vcmask 793600  }
  0x14   : > { %v1263_v14 = vld [vmem:[%s4864_s19 + $0x8] sm:$0x3] }
  0x15   : > { %v1294_v23 = vld [vmem:[%s4864_s19 + $0x8] sm:$0x3] }
  0x16   : > { %v1326_v31 = vld [vmem:[%s4864_s19 + $0x8] sm:$0x3] }
  0x17   : > { %v1357_v39 = vld [vmem:[%s4864_s19 + $0x8] sm:$0x3] }
  0x18   : > { %v1147_v3 = vld.sshfl [vmem:[#allocation1 + $0x10] sm:$0xff pattern:$0x75643120]  ;;  %v1389_v49 = vld [vmem:[%s4864_s19 + $0x8] sm:$0x3] }
  0x19   : > { %1153 = vrot.lane.b32.xlu1 %v1147_v3, %s4753_s20  ;;  %1174 = vst [vmem:[#allocation1 + $0x11] ss:$2 sm:$0xff] %v1168_v2  ;;  %v198_v4 = vld.sshfl [vmem:[#allocation1] sm:$0xff pattern:$0x75643120] }
  0x1a   : > { %v4873_v5 = vld.sshfl [vmem:[#allocation1 + $0x8] sm:$0xff pattern:$0x75643120]  ;;  %202 = vst [vmem:[#allocation2] sm:$0x33] %v198_v4 }
  0x1b   : > { %210 = vst [vmem:[#allocation1 + $0x1] ss:$2 sm:$0xff] %v4868_v1  ;;  %v1420_v62 = vld [vmem:[%s4864_s19 + $0x8] sm:$0x3] }
  0x1c   : > { %206 = vst.msk [vmem:[#allocation2 + $0x8] sm:$0x33] %vm4921_vm2, %v4873_v5 }
  0x20   : > { %v1179_v7 = vld.sshfl [vmem:[#allocation1 + $0x10] sm:$0xff pattern:$0x75643120] }
  0x21   : > { %1185 = vrot.lane.b32.xlu1 %v1179_v7, %s4754_s21  ;;  %1205 = vst [vmem:[#allocation1 + $0x10] ss:$2 sm:$0xff] %v1200_v6 }
  0x22   : > { %v211_v8 = vld.sshfl [vmem:[#allocation1] sm:$0xff pattern:$0x75643120]  ;;  %v213_v9 = vld.sshfl [vmem:[#allocation1 + $0x8] sm:$0xff pattern:$0x75643120] }
  0x23   : > { %235 = vst [vmem:[#allocation1] ss:$2 sm:$0xff] %v4868_v1  ;;  %215 = vrot.lane.b32.xlu0 %v211_v8, %s4755_s22 }
  0x28   : > { %v1210_v11 = vld.sshfl [vmem:[#allocation1 + $0x10] sm:$0xff pattern:$0x75643120] }
  0x29   : > { %1237 = vst [vmem:[#allocation1 + $0x11] ss:$2 sm:$0xff] %v1231_v10 }
  0x2a   : > { %v236_v12 = vld.sshfl [vmem:[#allocation1] sm:$0xff pattern:$0x75643120]  ;;  %v238_v13 = vld.sshfl [vmem:[#allocation1 + $0x8] sm:$0xff pattern:$0x75643120] }
  0x2b   : > { %240 = vrot.lane.b32.xlu1 %v236_v12, %s4756_s23  ;;  %257 = vst [vmem:[#allocation1 + $0x1] ss:$2 sm:$0xff] %v4868_v1  ;;  %217 = vrot.lane.b32.xlu0 %v213_v9, %s4755_s22  ;;  %s4775_s22 = smov 17  }
  0x30   : > { %v1242_v15 = vld.sshfl [vmem:[#allocation1 + $0x10] sm:$0xff pattern:$0x75643120] }
  0x31   : > { %1268 = vst [vmem:[#allocation1 + $0x10] ss:$2 sm:$0xff] %v1263_v14 }
  0x32   : > { %v258_v16 = vld.sshfl [vmem:[#allocation1] sm:$0xff pattern:$0x75643120]  ;;  %v260_v17 = vld.sshfl [vmem:[#allocation1 + $0x8] sm:$0xff pattern:$0x75643120] }
  0x33   : > { %242 = vrot.lane.b32.xlu1 %v238_v13, %s4756_s23  ;;  %278 = vst [vmem:[#allocation1] ss:$2 sm:$0xff] %v4868_v1  ;;  %262 = vrot.lane.b32.xlu2 %v258_v16, %s4757_s24 }
  0x38   : > { %v1273_v20 = vld.sshfl [vmem:[#allocation1 + $0x10] sm:$0xff pattern:$0x75643120] }
  0x39   : > { %1300 = vst [vmem:[#allocation1 + $0x11] ss:$2 sm:$0xff] %v1294_v23 }
  0x3a   : > { %v281_v18 = vld.sshfl [vmem:[#allocation1 + $0x8] sm:$0xff pattern:$0x75643120]  ;;  %v279_v19 = vld.sshfl [vmem:[#allocation1] sm:$0xff pattern:$0x75643120] }
  0x3b   : > { %1216 = vrot.lane.b32.xlu1 %v1210_v11, %s6287_s25  ;;  %300 = vst [vmem:[#allocation1 + $0x1] ss:$2 sm:$0xff] %v4868_v1  ;;  %283 = vrot.lane.b32.xlu0 %v279_v19, %s4759_s26 }
  0x3c   : > { %264 = vrot.lane.b32.xlu2 %v260_v17, %s4757_s24 }
  0x40   : > { %v1305_v28 = vld.sshfl [vmem:[#allocation1 + $0x10] sm:$0xff pattern:$0x75643120] }
  0x41   : > { %1331 = vst [vmem:[#allocation1 + $0x10] ss:$2 sm:$0xff] %v1326_v31  ;;  %v2393_v31 = vld [vmem:[%s4864_s19 + $0xa] sm:$0x3] }
  0x42   : > { %v301_v21 = vld.sshfl [vmem:[#allocation1] sm:$0xff pattern:$0x75643120]  ;;  %v303_v22 = vld.sshfl [vmem:[#allocation1 + $0x8] sm:$0xff pattern:$0x75643120] }
  0x43   : > { %1248 = vrot.lane.b32.xlu1 %v1242_v15, %s4760_s27  ;;  %321 = vst [vmem:[#allocation1] ss:$2 sm:$0xff] %v4868_v1  ;;  %307 = vrot.lane.b32.xlu0 %v303_v22, %s4761_s28 }
  0x44   : > { %305 = vrot.lane.b32.xlu2 %v301_v21, %s4761_s28 }
  0x48   : > { %v1336_v38 = vld.sshfl [vmem:[#allocation1 + $0x10] sm:$0xff pattern:$0x75643120] }
  0x49   : > { %1363 = vst [vmem:[#allocation1 + $0x11] ss:$2 sm:$0xff] %v1357_v39  ;;  %v2424_v39 = vld [vmem:[%s4864_s19 + $0xa] sm:$0x3] }
  0x4a   : > { %v322_v24 = vld.sshfl [vmem:[#allocation1] sm:$0xff pattern:$0x75643120]  ;;  %v324_v25 = vld.sshfl [vmem:[#allocation1 + $0x8] sm:$0xff pattern:$0x75643120] }
  0x4b   : > { %285 = vrot.lane.b32.xlu1 %v281_v18, %s4759_s26  ;;  %343 = vst [vmem:[#allocation1 + $0x1] ss:$2 sm:$0xff] %v4868_v1 }
  0x4c   : > { %328 = vrot.lane.b32.xlu2 %v324_v25, %s4762_s29  ;;  %v1452_v25 = vld [vmem:[%s4864_s19 + $0x8] sm:$0x3] }
  0x50   : > { %v1368_v48 = vld.sshfl [vmem:[#allocation1 + $0x10] sm:$0xff pattern:$0x75643120] }
  0x51   : > { %1394 = vst [vmem:[#allocation1 + $0x10] ss:$2 sm:$0xff] %v1389_v49  ;;  %v2454_v49 = vld [vmem:[%s4864_s19 + $0xa] sm:$0x3] }
  0x52   : > { %v346_v26 = vld.sshfl [vmem:[#allocation1 + $0x8] sm:$0xff pattern:$0x75643120]  ;;  %v344_v27 = vld.sshfl [vmem:[#allocation1] sm:$0xff pattern:$0x75643120] }
  0x53   : > { %1279 = vrot.lane.b32.xlu1 %v1273_v20, %s4763_s30  ;;  %364 = vst [vmem:[#allocation1] ss:$2 sm:$0xff] %v4868_v1  ;;  %348 = vrot.lane.b32.xlu0 %v344_v27, %s4764_s4 }
  0x58   : > { %v1399_v61 = vld.sshfl [vmem:[#allocation1 + $0x10] sm:$0xff pattern:$0x75643120] }
  0x59   : > { %1426 = vst [vmem:[#allocation1 + $0x11] ss:$2 sm:$0xff] %v1420_v62 }
  0x5a   : > { %v365_v29 = vld.sshfl [vmem:[#allocation1] sm:$0xff pattern:$0x75643120]  ;;  %v367_v30 = vld.sshfl [vmem:[#allocation1 + $0x8] sm:$0xff pattern:$0x75643120] }
  0x5b   : > { %326 = vrot.lane.b32.xlu1 %v322_v24, %s4762_s29  ;;  %386 = vst [vmem:[#allocation1 + $0x1] ss:$2 sm:$0xff] %v4868_v1  ;;  %371 = vrot.lane.b32.xlu0 %v367_v30, %s4765_s5 }
  0x5c   : > { %369 = vrot.lane.b32.xlu2 %v365_v29, %s4765_s5 }
  0x60   : > { %v1431_v22 = vld.sshfl [vmem:[#allocation1 + $0x10] sm:$0xff pattern:$0x75643120] }
  0x61   : > { %1457 = vst [vmem:[#allocation1 + $0x10] ss:$2 sm:$0xff] %v1452_v25 }
  0x62   : > { %v387_v32 = vld.sshfl [vmem:[#allocation1] sm:$0xff pattern:$0x75643120]  ;;  %v389_v33 = vld.sshfl [vmem:[#allocation1 + $0x8] sm:$0xff pattern:$0x75643120] }
  0x63   : > { %350 = vrot.lane.b32.xlu1 %v346_v26, %s4764_s4  ;;  %407 = vst [vmem:[#allocation1] ss:$2 sm:$0xff] %v4868_v1 }
  0x64   : > { %393 = vrot.lane.b32.xlu2 %v389_v33, %s4766_s6 }
  0x6a   : > { %v410_v34 = vld.sshfl [vmem:[#allocation1 + $0x8] sm:$0xff pattern:$0x75643120]  ;;  %v408_v35 = vld.sshfl [vmem:[#allocation1] sm:$0xff pattern:$0x75643120] }
  0x6b   : > { %1311 = vrot.lane.b32.xlu1 %v1305_v28, %s4767_s7  ;;  %429 = vst [vmem:[#allocation1 + $0x1] ss:$2 sm:$0xff] %v4868_v1  ;;  %412 = vrot.lane.b32.xlu0 %v408_v35, %s6222_s8 }
  0x72   : > { %v430_v36 = vld.sshfl [vmem:[#allocation1] sm:$0xff pattern:$0x75643120]  ;;  %v432_v37 = vld.sshfl [vmem:[#allocation1 + $0x8] sm:$0xff pattern:$0x75643120] }
  0x73   : > { %391 = vrot.lane.b32.xlu1 %v387_v32, %s4766_s6  ;;  %450 = vst [vmem:[#allocation1] ss:$2 sm:$0xff] %v4868_v1  ;;  %436 = vrot.lane.b32.xlu0 %v432_v37, %s4769_s9 }
  0x74   : > { %434 = vrot.lane.b32.xlu2 %v430_v36, %s4769_s9  ;;  %s6210_s9 = smov 97  }
  0x7a   : > { %v451_v40 = vld.sshfl [vmem:[#allocation1] sm:$0xff pattern:$0x75643120]  ;;  %v453_v41 = vld.sshfl [vmem:[#allocation1 + $0x8] sm:$0xff pattern:$0x75643120] }
  0x7b   : > { %414 = vrot.lane.b32.xlu1 %v410_v34, %s6222_s8  ;;  %472 = vst [vmem:[#allocation1 + $0x1] ss:$2 sm:$0xff] %v4868_v1  ;;  %v1462_v34 = vld.sshfl [vmem:[#allocation1 + $0x10] sm:$0xff pattern:$0x75643120]  ;;  %s6226_s8 = smov 72  }
  0x7c   : > { %457 = vrot.lane.b32.xlu2 %v453_v41, %s4770_s10  ;;  %2399 = vst [vmem:[#allocation1 + $0x11] ss:$2 sm:$0xff] %v2393_v31 }
  0x82   : > { %v475_v42 = vld.sshfl [vmem:[#allocation1 + $0x8] sm:$0xff pattern:$0x75643120]  ;;  %v473_v43 = vld.sshfl [vmem:[#allocation1] sm:$0xff pattern:$0x75643120] }
  0x83   : > { %1342 = vrot.lane.b32.xlu1 %v1336_v38, %s4771_s11  ;;  %477 = vrot.lane.b32.xlu0 %v473_v43, %s6218_s16  ;;  %493 = vst [vmem:[#allocation1] ss:$2 sm:$0xff] %v4868_v1  ;;  %v4999_v43 = vld.sshfl [vmem:[#allocation1 + $0x10] sm:$0xff pattern:$0x75643120] }
  0x84   : > { %2429 = vst [vmem:[#allocation1 + $0x10] ss:$2 sm:$0xff] %v2424_v39 }
  0x8a   : > { %v494_v45 = vld.sshfl [vmem:[#allocation1] sm:$0xff pattern:$0x75643120]  ;;  %v496_v46 = vld.sshfl [vmem:[#allocation1 + $0x8] sm:$0xff pattern:$0x75643120] }
  0x8b   : > { %455 = vrot.lane.b32.xlu1 %v451_v40, %s4770_s10  ;;  %v4928_v47 = vpop.permute.xlu1 %1153  ;;  %515 = vst [vmem:[#allocation1 + $0x1] ss:$2 sm:$0xff] %v4868_v1  ;;  %500 = vrot.lane.b32.xlu0 %v496_v46, %s6208_s17  ;;  %s6204_s10 = smov 96  }
  0x8c   : > { %498 = vrot.lane.b32.xlu2 %v494_v45, %s6208_s17  ;;  %s6214_s17 = smov 94  }
  0x8d   : > { %v263_v40 = vpop.permute.xlu2 %262 }
  0x92   : > { %v516_v50 = vld.sshfl [vmem:[#allocation1] sm:$0xff pattern:$0x75643120]  ;;  %v518_v51 = vld.sshfl [vmem:[#allocation1 + $0x8] sm:$0xff pattern:$0x75643120] }
  0x93   : > { %479 = vrot.lane.b32.xlu1 %v475_v42, %s6218_s16  ;;  %v4935_v52 = vpop.permute.xlu1 %1185  ;;  %536 = vst [vmem:[#allocation1] ss:$2 sm:$0xff] %v4868_v1  ;;  %s4785_s16 = smov 75  }
  0x94   : > { %522 = vrot.lane.b32.xlu2 %v518_v51, %s6206_s18 }
  0x95   : > { %v216_v8 = vpop.permute.xlu0 %215 }
  0x96   : > { %v219_v10 = vrot.slane %v216_v8, 4 }
  0x9a   : > { %v539_v53 = vld.sshfl [vmem:[#allocation1 + $0x8] sm:$0xff pattern:$0x75643120]  ;;  %v537_v54 = vld.sshfl [vmem:[#allocation1] sm:$0xff pattern:$0x75643120] }
  0x9b   : > { %1374 = vrot.lane.b32.xlu1 %v1368_v48, %s4775_s22  ;;  %541 = vrot.lane.b32.xlu0 %v537_v54, %s6210_s9  ;;  %558 = vst [vmem:[#allocation1 + $0x1] ss:$2 sm:$0xff] %v4868_v1  ;;  %v5006_v54 = vld.sshfl [vmem:[#allocation1 + $0x10] sm:$0xff pattern:$0x75643120] }
  0x9c   : > { %2460 = vst [vmem:[#allocation1 + $0x11] ss:$2 sm:$0xff] %v2454_v49 }
  0x9d   : > { %v241_v55 = vpop.permute.xlu1 %240  ;;  %v218_v13 = vpop.permute.xlu0 %217 }
  0x9e   : > { %v244_v58 = vrot.slane %v241_v55, 4  ;;  %v220_v15 = vrot.slane %v218_v13, 4 }
  0xa0   : > { %v222_v18 = vsel %vm221_vm4, %v219_v10, %v220_v15  ;;  %v225_v19 = vsel %vm223_vm8, %v218_v13, %v220_v15 }
  0xa1   : > { %v224_v20 = vsel %vm223_vm8, %v216_v8, %v222_v18  ;;  %232 = vst.msk [vmem:[#allocation2 + $0x8] sm:$0xcc] %vm4965_vm7, %v225_v19  ;;  %vm6242_vm8 = vcmask 809984  }
  0xa2   : > { %v561_v56 = vld.sshfl [vmem:[#allocation1 + $0x8] sm:$0xff pattern:$0x75643120]  ;;  %v559_v57 = vld.sshfl [vmem:[#allocation1] sm:$0xff pattern:$0x75643120] }
  0xa3   : > { %520 = vrot.lane.b32.xlu1 %v516_v50, %s6206_s18  ;;  %565 = vrot.lane.b32.xlu0 %v561_v56, %s6204_s10  ;;  %579 = vst [vmem:[#allocation1] ss:$2 sm:$0xff] %v4868_v1  ;;  %s4779_s18 = smov 16   ;;  %v266_v50 = vrot.slane %v263_v40, 4  ;;  %v265_v56 = vpop.permute.xlu2 %264 }
  0xa4   : > { %563 = vrot.lane.b32.xlu2 %v559_v57, %s6204_s10  ;;  %s6216_s10 = smov 95   ;;  %228 = vst [vmem:[#allocation2] sm:$0xcc] %v224_v20 }
  0xa5   : > { %v243_v59 = vpop.permute.xlu1 %242 }
  0xa6   : > { %v245_v60 = vrot.slane %v243_v59, 4 }
  0xa8   : > { %v246_v63 = vsel %vm221_vm4, %v244_v58, %v245_v60  ;;  %v249_v0 = vsel %vm247_vm3, %v243_v59, %v245_v60  ;;  %v267_v59 = vrot.slane %v265_v56, 4 }
  0xa9   : > { %v248_v2 = vsel %vm247_vm3, %v241_v55, %v246_v63  ;;  %253 = vst.msk [vmem:[#allocation2 + $0x18] sm:$0x33] %vm4921_vm2, %v249_v0 }
  0xaa   : > { %252 = vst [vmem:[#allocation2 + $0x10] sm:$0x33] %v248_v2  ;;  %v580_v3 = vld.sshfl [vmem:[#allocation1] sm:$0xff pattern:$0x75643120]  ;;  %v271_v62 = vsel %vm269_vm12, %v265_v56, %v267_v59 }
  0xab   : > { %543 = vrot.lane.b32.xlu1 %v539_v53, %s6210_s9  ;;  %v582_v4 = vld.sshfl [vmem:[#allocation1 + $0x8] sm:$0xff pattern:$0x75643120]  ;;  %s6212_s9 = smov 93   ;;  %275 = vst.msk [vmem:[#allocation2 + $0x18] sm:$0xcc] %vm4965_vm7, %v271_v62  ;;  %v306_v8 = vpop.permute.xlu2 %305 }
  0xac   : > { %601 = vst [vmem:[#allocation1 + $0x1] ss:$2 sm:$0xff] %v4868_v1  ;;  %586 = vrot.lane.b32.xlu2 %v582_v4, %s6216_s10  ;;  %v2485_v2 = vld [vmem:[%s4864_s19 + $0xa] sm:$0x3] }
  0xad   : > { %v4955_v5 = vpop.permute.xlu1 %1216  ;;  %v284_v27 = vpop.permute.xlu0 %283 }
  0xae   : > { %v287_v28 = vrot.slane %v284_v27, 4 }
  0xb3   : > { %1405 = vrot.lane.b32.xlu1 %v1399_v61, %s4779_s18  ;;  %v602_v6 = vld.sshfl [vmem:[#allocation1] sm:$0xff pattern:$0x75643120]  ;;  %v604_v7 = vld.sshfl [vmem:[#allocation1 + $0x8] sm:$0xff pattern:$0x75643120]  ;;  %v268_v61 = vsel %vm221_vm4, %v266_v50, %v267_v59 }
  0xb4   : > { %606 = vrot.lane.b32.xlu0 %v602_v6, %s6214_s17  ;;  %622 = vst [vmem:[#allocation1] ss:$2 sm:$0xff] %v4868_v1  ;;  %v270_v0 = vsel %vm269_vm12, %v263_v40, %v268_v61  ;;  %v5021_v6 = vld.sshfl [vmem:[#allocation1 + $0x10] sm:$0xff pattern:$0x75643120] }
  0xb5   : > { %v4960_v9 = vpop.permute.xlu1 %1248  ;;  %v4989_v36 = vpop.permute.xlu0 %307  ;;  %274 = vst [vmem:[#allocation2 + $0x10] sm:$0xcc] %v270_v0 }
  0xb6   : > { %v310_v37 = vrot.slane %v4989_v36, 4  ;;  %2490 = vst [vmem:[#allocation1 + $0x10] ss:$2 sm:$0xff] %v2485_v2 }
  0xb8   : > { %v314_v38 = vsel %vm312_vm10, %v4989_v36, %v310_v37 }
  0xb9   : > { %318 = vst.msk [vmem:[#allocation2 + $0x28] sm:$0xcc] %vm4965_vm7, %v314_v38 }
  0xbb   : > { %584 = vrot.lane.b32.xlu1 %v580_v3, %s6216_s10  ;;  %v625_v11 = vld.sshfl [vmem:[#allocation1 + $0x8] sm:$0xff pattern:$0x75643120]  ;;  %v623_v12 = vld.sshfl [vmem:[#allocation1] sm:$0xff pattern:$0x75643120] }
  0xbc   : > { %629 = vrot.lane.b32.xlu0 %v625_v11, %s6212_s9  ;;  %644 = vst [vmem:[#allocation1 + $0x1] ss:$2 sm:$0xff] %v4868_v1  ;;  %627 = vrot.lane.b32.xlu2 %v623_v12, %s6212_s9  ;;  %s6220_s9 = smov 92   ;;  %s4784_s10 = smov 76   ;;  %v309_v12 = vrot.slane %v306_v8, 4 }
  0xbd   : > { %v286_v16 = vpop.permute.xlu1 %285 }
  0xbe   : > { %v288_v17 = vrot.slane %v286_v16, 4  ;;  %v311_v15 = vsel %vm221_vm4, %v309_v12, %v310_v37 }
  0xc0   : > { %v292_v21 = vsel %vm290_vm9, %v286_v16, %v288_v17  ;;  %v289_v29 = vsel %vm221_vm4, %v287_v28, %v288_v17  ;;  %v313_v16 = vsel %vm312_vm10, %v306_v8, %v311_v15 }
  0xc1   : > { %296 = vst.msk [vmem:[#allocation2 + $0x28] sm:$0x33] %vm4921_vm2, %v292_v21  ;;  %v291_v30 = vsel %vm290_vm9, %v284_v27, %v289_v29  ;;  %v329_v27 = vpop.permute.xlu2 %328 }
  0xc2   : > { %295 = vst [vmem:[#allocation2 + $0x20] sm:$0x33] %v291_v30  ;;  %v331_v30 = vrot.slane %v329_v27, 4 }
  0xc3   : > { %608 = vrot.lane.b32.xlu1 %v604_v7, %s6214_s17  ;;  %v645_v23 = vld.sshfl [vmem:[#allocation1] sm:$0xff pattern:$0x75643120]  ;;  %v647_v24 = vld.sshfl [vmem:[#allocation1 + $0x8] sm:$0xff pattern:$0x75643120] }
  0xc4   : > { %665 = vst [vmem:[#allocation1] ss:$2 sm:$0xff] %v4868_v1  ;;  %651 = vrot.lane.b32.xlu2 %v647_v24, %s6220_s9  ;;  %s4783_s17 = smov 15  }
  0xc5   : > { %v4980_v26 = vpop.permute.xlu1 %1279  ;;  %v349_v55 = vpop.permute.xlu0 %348  ;;  %317 = vst [vmem:[#allocation2 + $0x20] sm:$0xcc] %v313_v16 }
  0xc6   : > { %v352_v58 = vrot.slane %v349_v55, 4 }
  0xc9   : > { %v370_v40 = vpop.permute.xlu2 %369 }
  0xcb   : > { %1437 = vrot.lane.b32.xlu1 %v1431_v22, %s4783_s17  ;;  %v666_v32 = vld.sshfl [vmem:[#allocation1] sm:$0xff pattern:$0x75643120]  ;;  %v668_v33 = vld.sshfl [vmem:[#allocation1 + $0x8] sm:$0xff pattern:$0x75643120] }
  0xcc   : > { %670 = vrot.lane.b32.xlu0 %v666_v32, %s4784_s10  ;;  %687 = vst [vmem:[#allocation1 + $0x1] ss:$2 sm:$0xff] %v4868_v1 }
  0xcd   : > { %v4987_v35 = vpop.permute.xlu1 %326  ;;  %v372_v7 = vpop.permute.xlu0 %371 }
  0xce   : > { %v374_v11 = vrot.slane %v372_v7, 4  ;;  %v330_v22 = vrot.slane %v4987_v35, 4 }
  0xd0   : > { %v378_v13 = vsel %vm6277_vm13, %v372_v7, %v374_v11  ;;  %v332_v32 = vsel %vm221_vm4, %v330_v22, %v331_v30 }
  0xd1   : > { %382 = vst.msk [vmem:[#allocation2 + $0x48] sm:$0x33] %vm4921_vm2, %v378_v13  ;;  %v334_v36 = vsel %vm333_vm15, %v4987_v35, %v332_v32  ;;  %v373_v35 = vrot.slane %v370_v40, 4  ;;  %v394_v61 = vpop.permute.xlu2 %393 }
  0xd2   : > { %338 = vst [vmem:[#allocation2 + $0x30] sm:$0x33] %v334_v36  ;;  %v396_v0 = vrot.slane %v394_v61, 4 }
  0xd3   : > { %649 = vrot.lane.b32.xlu1 %v645_v23, %s6220_s9  ;;  %v690_v41 = vld.sshfl [vmem:[#allocation1 + $0x8] sm:$0xff pattern:$0x75643120]  ;;  %v688_v42 = vld.sshfl [vmem:[#allocation1] sm:$0xff pattern:$0x75643120] }
  0xd4   : > { %694 = vrot.lane.b32.xlu0 %v690_v41, %s4785_s16  ;;  %708 = vst [vmem:[#allocation1] ss:$2 sm:$0xff] %v4868_v1  ;;  %692 = vrot.lane.b32.xlu2 %v688_v42, %s4785_s16  ;;  %s6224_s16 = smov 74   ;;  %s4788_s9 = smov 73  }
  0xd5   : > { %v351_v45 = vpop.permute.xlu1 %350 }
  0xd6   : > { %v353_v46 = vrot.slane %v351_v45, 4 }
  0xd8   : > { %v357_v48 = vsel %vm6289_vm11, %v351_v45, %v353_v46  ;;  %v354_v60 = vsel %vm221_vm4, %v352_v58, %v353_v46  ;;  %v375_v46 = vsel %vm221_vm4, %v373_v35, %v374_v11 }
  0xd9   : > { %361 = vst.msk [vmem:[#allocation2 + $0x38] sm:$0xcc] %vm4965_vm7, %v357_v48  ;;  %v356_v63 = vsel %vm6289_vm11, %v349_v55, %v354_v60  ;;  %v377_v48 = vsel %vm6277_vm13, %v370_v40, %v375_v46  ;;  %v435_v15 = vpop.permute.xlu2 %434  ;;  %vm1191_vm13 = vcmask 187392  }
  0xda   : > { %360 = vst [vmem:[#allocation2 + $0x30] sm:$0xcc] %v356_v63 }
  0xdb   : > { %672 = vrot.lane.b32.xlu1 %v668_v33, %s4784_s10  ;;  %v709_v51 = vld.sshfl [vmem:[#allocation1] sm:$0xff pattern:$0x75643120]  ;;  %v711_v53 = vld.sshfl [vmem:[#allocation1 + $0x8] sm:$0xff pattern:$0x75643120]  ;;  %v335_v33 = vsel %vm333_vm15, %v329_v27, %v331_v30 }
  0xdc   : > { %730 = vst [vmem:[#allocation1 + $0x1] ss:$2 sm:$0xff] %v4868_v1  ;;  %715 = vrot.lane.b32.xlu2 %v711_v53, %s6224_s16  ;;  %s4787_s10 = smov 14  }
  0xdd   : > { %v5009_v57 = vpop.permute.xlu1 %1311  ;;  %v413_v25 = vpop.permute.xlu0 %412  ;;  %339 = vst.msk [vmem:[#allocation2 + $0x38] sm:$0x33] %vm4921_vm2, %v335_v33 }
  0xde   : > { %v416_v29 = vrot.slane %v413_v25, 4  ;;  %381 = vst [vmem:[#allocation2 + $0x40] sm:$0x33] %v377_v48 }
  0xe1   : > { %v458_v32 = vpop.permute.xlu2 %457 }
  0xe3   : > { %v731_v3 = vld.sshfl [vmem:[#allocation1] sm:$0xff pattern:$0x75643120]  ;;  %v733_v4 = vld.sshfl [vmem:[#allocation1 + $0x8] sm:$0xff pattern:$0x75643120]  ;;  %1468 = vrot.lane.b32.xlu1 %v1462_v34, %s4787_s10 }
  0xe4   : > { %735 = vrot.lane.b32.xlu0 %v731_v3, %s4788_s9  ;;  %751 = vst [vmem:[#allocation1] ss:$2 sm:$0xff] %v4868_v1 }
  0xe5   : > { %v5024_v10 = vpop.permute.xlu1 %391  ;;  %v437_v39 = vpop.permute.xlu0 %436 }
  0xe6   : > { %v439_v42 = vrot.slane %v437_v39, 4  ;;  %v395_v56 = vrot.slane %v5024_v10, 4 }
  0xe8   : > { %v443_v45 = vsel %vm441_vm1, %v437_v39, %v439_v42  ;;  %v397_v3 = vsel %vm221_vm4, %v395_v56, %v396_v0 }
  0xe9   : > { %447 = vst.msk [vmem:[#allocation2 + $0x58] sm:$0xcc] %vm4965_vm7, %v443_v45  ;;  %v399_v8 = vsel %vm6292_vm6, %v5024_v10, %v397_v3  ;;  %v438_v10 = vrot.slane %v435_v15, 4  ;;  %v499_v48 = vpop.permute.xlu2 %498 }
  0xea   : > { %403 = vst [vmem:[#allocation2 + $0x40] sm:$0xcc] %v399_v8 }
  0xeb   : > { %v754_v17 = vld.sshfl [vmem:[#allocation1 + $0x8] sm:$0xff pattern:$0x75643120]  ;;  %v752_v18 = vld.sshfl [vmem:[#allocation1] sm:$0xff pattern:$0x75643120]  ;;  %713 = vrot.lane.b32.xlu1 %v709_v51, %s6224_s16 }
  0xec   : > { %758 = vrot.lane.b32.xlu0 %v754_v17, %s6226_s8  ;;  %773 = vst [vmem:[#allocation1 + $0x1] ss:$2 sm:$0xff] %v4868_v1  ;;  %756 = vrot.lane.b32.xlu2 %v752_v18, %s6226_s8  ;;  %s6228_s16 = smov 71   ;;  %s6230_s8 = smov 70  }
  0xed   : > { %v415_v19 = vpop.permute.xlu1 %414 }
  0xee   : > { %v417_v20 = vrot.slane %v415_v19, 4 }
  0xf0   : > { %v421_v21 = vsel %vm6275_vm14, %v415_v19, %v417_v20  ;;  %v418_v31 = vsel %vm221_vm4, %v416_v29, %v417_v20  ;;  %v440_v19 = vsel %vm221_vm4, %v438_v10, %v439_v42 }
  0xf1   : > { %425 = vst.msk [vmem:[#allocation2 + $0x58] sm:$0x33] %vm4921_vm2, %v421_v21  ;;  %v420_v34 = vsel %vm6275_vm14, %v413_v25, %v418_v31  ;;  %v442_v20 = vsel %vm441_vm1, %v435_v15, %v440_v19  ;;  %vm462_vm1 = vcmask 826368   ;;  %vm6284_vm14 = vcmask 334848  }
  0xf2   : > { %424 = vst [vmem:[#allocation2 + $0x50] sm:$0x33] %v420_v34  ;;  %v460_v34 = vrot.slane %v458_v32, 4 }
  0xf3   : > { %v774_v23 = vld.sshfl [vmem:[#allocation1] sm:$0xff pattern:$0x75643120]  ;;  %v776_v24 = vld.sshfl [vmem:[#allocation1 + $0x8] sm:$0xff pattern:$0x75643120]  ;;  %737 = vrot.lane.b32.xlu1 %v733_v4, %s4788_s9  ;;  %v400_v4 = vsel %vm6292_vm6, %v394_v61, %v396_v0  ;;  %v523_v0 = vpop.permute.xlu2 %522 }
  0xf4   : > { %794 = vst [vmem:[#allocation1] ss:$2 sm:$0xff] %v4868_v1  ;;  %780 = vrot.lane.b32.xlu2 %v776_v24, %s6228_s16  ;;  %v525_v3 = vrot.slane %v523_v0, 4 }
  0xf5   : > { %v5042_v28 = vpop.permute.xlu1 %1342  ;;  %v478_v60 = vpop.permute.xlu0 %477  ;;  %404 = vst.msk [vmem:[#allocation2 + $0x48] sm:$0xcc] %vm4965_vm7, %v400_v4 }
  0xf6   : > { %v481_v63 = vrot.slane %v478_v60, 4  ;;  %446 = vst [vmem:[#allocation2 + $0x50] sm:$0xcc] %v442_v20 }
  0xfb   : > { %v795_v37 = vld.sshfl [vmem:[#allocation1] sm:$0xff pattern:$0x75643120]  ;;  %v797_v38 = vld.sshfl [vmem:[#allocation1 + $0x8] sm:$0xff pattern:$0x75643120]  ;;  %778 = vrot.lane.b32.xlu1 %v774_v23, %s6228_s16 }
  0xfc   : > { %799 = vrot.lane.b32.xlu0 %v795_v37, %s6230_s8  ;;  %816 = vst [vmem:[#allocation1 + $0x1] ss:$2 sm:$0xff] %v4868_v1  ;;  %s6237_s16 = smov 69  }
  0xfd   : > { %v5055_v41 = vpop.permute.xlu1 %455  ;;  %v501_v13 = vpop.permute.xlu0 %500 }
  0xfe   : > { %v503_v17 = vrot.slane %v501_v13, 4  ;;  %v459_v27 = vrot.slane %v5055_v41, 4 }
 0x100   : > { %v507_v18 = vsel %vm6242_vm8, %v501_v13, %v503_v17  ;;  %v461_v37 = vsel %vm221_vm4, %v459_v27, %v460_v34 }
 0x101   : > { %511 = vst.msk [vmem:[#allocation2 + $0x78] sm:$0x33] %vm4921_vm2, %v507_v18  ;;  %v463_v40 = vsel %vm462_vm1, %v5055_v41, %v461_v37 }
 0x102   : > { %467 = vst [vmem:[#allocation2 + $0x60] sm:$0x33] %v463_v40 }
 0x103   : > { %v819_v49 = vld.sshfl [vmem:[#allocation1 + $0x8] sm:$0xff pattern:$0x75643120]  ;;  %v817_v50 = vld.sshfl [vmem:[#allocation1] sm:$0xff pattern:$0x75643120]  ;;  %801 = vrot.lane.b32.xlu1 %v797_v38, %s6230_s8  ;;  %v464_v38 = vsel %vm462_vm1, %v458_v32, %v460_v34 }
 0x104   : > { %823 = vrot.lane.b32.xlu0 %v819_v49, %s6237_s16  ;;  %837 = vst [vmem:[#allocation1] ss:$2 sm:$0xff] %v4868_v1  ;;  %821 = vrot.lane.b32.xlu2 %v817_v50, %s6237_s16  ;;  %s6232_s8 = smov 68   ;;  %s4796_s16 = smov 50   ;;  %v502_v50 = vrot.slane %v499_v48, 4  ;;  %vm6245_vm1 = vcmask 801792  }
 0x105   : > { %v480_v51 = vpop.permute.xlu1 %479  ;;  %468 = vst.msk [vmem:[#allocation2 + $0x68] sm:$0x33] %vm4921_vm2, %v464_v38 }
 0x106   : > { %v482_v53 = vrot.slane %v480_v51, 4 }
 0x108   : > { %v486_v55 = vsel %vm6263_vm5, %v480_v51, %v482_v53  ;;  %v483_v2 = vsel %vm221_vm4, %v481_v63, %v482_v53  ;;  %v504_v51 = vsel %vm221_vm4, %v502_v50, %v503_v17 }
 0x109   : > { %490 = vst.msk [vmem:[#allocation2 + $0x68] sm:$0xcc] %vm4965_vm7, %v486_v55  ;;  %v485_v7 = vsel %vm6263_vm5, %v478_v60, %v483_v2  ;;  %v506_v53 = vsel %vm6242_vm8, %v499_v48, %v504_v51  ;;  %vm6250_vm8 = vcmask 769024   ;;  %vm6265_vm5 = vcmask 596992  }
 0x10a   : > { %489 = vst [vmem:[#allocation2 + $0x60] sm:$0xcc] %v485_v7 }
 0x10b   : > { %v838_v58 = vld.sshfl [vmem:[#allocation1] sm:$0xff pattern:$0x75643120]  ;;  %v840_v59 = vld.sshfl [vmem:[#allocation1 + $0x8] sm:$0xff pattern:$0x75643120] }
 0x10c   : > { %859 = vst [vmem:[#allocation1 + $0x1] ss:$2 sm:$0xff] %v4868_v1  ;;  %842 = vrot.lane.b32.xlu1 %v838_v58, %s6232_s8  ;;  %844 = vrot.lane.b32.xlu2 %v840_v59, %s6232_s8  ;;  %s6234_s8 = smov 67  }
 0x10d   : > { %v5073_v62 = vpop.permute.xlu1 %1374  ;;  %v542_v31 = vpop.permute.xlu0 %541  ;;  %510 = vst [vmem:[#allocation2 + $0x70] sm:$0x33] %v506_v53 }
 0x10e   : > { %v545_v33 = vrot.slane %v542_v31, 4 }
 0x113   : > { %v860_v11 = vld.sshfl [vmem:[#allocation1] sm:$0xff pattern:$0x75643120]  ;;  %v862_v12 = vld.sshfl [vmem:[#allocation1 + $0x8] sm:$0xff pattern:$0x75643120] }
 0x114   : > { %864 = vrot.lane.b32.xlu0 %v860_v11, %s6234_s8  ;;  %880 = vst [vmem:[#allocation1] ss:$2 sm:$0xff] %v4868_v1  ;;  %866 = vrot.lane.b32.xlu1 %v862_v12, %s6234_s8  ;;  %s6240_s8 = smov 66   ;;  %v529_v11 = vsel %vm6245_vm1, %v523_v0, %v525_v3 }
 0x115   : > { %v5086_v16 = vpop.permute.xlu1 %520  ;;  %v566_v46 = vpop.permute.xlu0 %565  ;;  %533 = vst.msk [vmem:[#allocation2 + $0x78] sm:$0xcc] %vm4965_vm7, %v529_v11 }
 0x116   : > { %v568_v49 = vrot.slane %v566_v46, 4  ;;  %v524_v59 = vrot.slane %v5086_v16, 4 }
 0x118   : > { %v526_v8 = vsel %vm221_vm4, %v524_v59, %v525_v3 }
 0x119   : > { %v528_v12 = vsel %vm6245_vm1, %v5086_v16, %v526_v8  ;;  %v564_v16 = vpop.permute.xlu2 %563  ;;  %vm6257_vm1 = vcmask 760832  }
 0x11a   : > { %532 = vst [vmem:[#allocation2 + $0x70] sm:$0xcc] %v528_v12 }
 0x11b   : > { %v883_v21 = vld.sshfl [vmem:[#allocation1 + $0x8] sm:$0xff pattern:$0x75643120]  ;;  %v881_v22 = vld.sshfl [vmem:[#allocation1] sm:$0xff pattern:$0x75643120] }
 0x11c   : > { %887 = vrot.lane.b32.xlu0 %v883_v21, %s6240_s8  ;;  %902 = vst [vmem:[#allocation1 + $0x1] ss:$2 sm:$0xff] %v4868_v1  ;;  %885 = vrot.lane.b32.xlu2 %v881_v22, %s6240_s8  ;;  %s6248_s8 = smov 48   ;;  %v567_v21 = vrot.slane %v564_v16, 4 }
 0x11d   : > { %v544_v23 = vpop.permute.xlu1 %543 }
 0x11e   : > { %v546_v24 = vrot.slane %v544_v23, 4 }
 0x120   : > { %v550_v25 = vsel %vm6239_vm0, %v544_v23, %v546_v24  ;;  %v547_v36 = vsel %vm221_vm4, %v545_v33, %v546_v24  ;;  %v569_v23 = vsel %vm221_vm4, %v567_v21, %v568_v49 }
 0x121   : > { %554 = vst.msk [vmem:[#allocation2 + $0x88] sm:$0x33] %vm4921_vm2, %v550_v25  ;;  %v549_v39 = vsel %vm6239_vm0, %v542_v31, %v547_v36  ;;  %vm6254_vm0 = vcmask 785408   ;;  %v587_v34 = vpop.permute.xlu2 %586 }
 0x122   : > { %553 = vst [vmem:[#allocation2 + $0x80] sm:$0x33] %v549_v39  ;;  %v572_v41 = vsel %vm6254_vm0, %v566_v46, %v568_v49  ;;  %v571_v24 = vsel %vm6254_vm0, %v564_v16, %v569_v23  ;;  %v589_v36 = vrot.slane %v587_v34, 4  ;;  %vm677_vm0 = vcmask 621568  }
 0x123   : > { %v903_v29 = vld.sshfl [vmem:[#allocation1] sm:$0xff pattern:$0x75643120]  ;;  %v905_v30 = vld.sshfl [vmem:[#allocation1 + $0x8] sm:$0xff pattern:$0x75643120] }
 0x124   : > { %923 = vst [vmem:[#allocation1] ss:$2 sm:$0xff] %v4868_v1  ;;  %909 = vrot.lane.b32.xlu2 %v905_v30, %s4796_s16  ;;  %907 = vrot.lane.b32.xlu1 %v903_v29, %s4796_s16  ;;  %s4797_s16 = smov 49  }
 0x125   : > { %v5107_v42 = vpop.permute.xlu1 %1405  ;;  %576 = vst.msk [vmem:[#allocation2 + $0x88] sm:$0xcc] %vm4965_vm7, %v572_v41 }
 0x126   : > { %v607_v63 = vpop.permute.xlu0 %606  ;;  %575 = vst [vmem:[#allocation2 + $0x80] sm:$0xcc] %v571_v24 }
 0x127   : > { %v610_v2 = vrot.slane %v607_v63, 4 }
 0x129   : > { %v628_v49 = vpop.permute.xlu2 %627 }
 0x12a   : > { %v631_v41 = vrot.slane %v628_v49, 4 }
 0x12b   : > { %v924_v35 = vld.sshfl [vmem:[#allocation1] sm:$0xff pattern:$0x75643120]  ;;  %v926_v45 = vld.sshfl [vmem:[#allocation1 + $0x8] sm:$0xff pattern:$0x75643120] }
 0x12c   : > { %928 = vrot.lane.b32.xlu0 %v924_v35, %s4797_s16  ;;  %945 = vst [vmem:[#allocation1 + $0x1] ss:$2 sm:$0xff] %v4868_v1  ;;  %930 = vrot.lane.b32.xlu1 %v926_v45, %s4797_s16  ;;  %s6243_s16 = smov 47  }
 0x12d   : > { %v5115_v58 = vpop.permute.xlu1 %584 }
 0x12e   : > { %v630_v19 = vpop.permute.xlu0 %629  ;;  %v588_v30 = vrot.slane %v5115_v58, 4 }
 0x12f   : > { %v632_v20 = vrot.slane %v630_v19, 4 }
 0x130   : > { %v590_v38 = vsel %vm221_vm4, %v588_v30, %v589_v36 }
 0x131   : > { %v636_v22 = vsel %vm6257_vm1, %v630_v19, %v632_v20 }
 0x132   : > { %640 = vst.msk [vmem:[#allocation2 + $0xa8] sm:$0x33] %vm4921_vm2, %v636_v22 }
 0x133   : > { %v948_v55 = vld.sshfl [vmem:[#allocation1 + $0x8] sm:$0xff pattern:$0x75643120]  ;;  %v946_v56 = vld.sshfl [vmem:[#allocation1] sm:$0xff pattern:$0x75643120] }
 0x134   : > { %952 = vrot.lane.b32.xlu0 %v948_v55, %s6248_s8  ;;  %966 = vst [vmem:[#allocation1] ss:$2 sm:$0xff] %v4868_v1  ;;  %950 = vrot.lane.b32.xlu2 %v946_v56, %s6248_s8  ;;  %s6260_s8 = smov 44   ;;  %v633_v56 = vsel %vm221_vm4, %v631_v41, %v632_v20 }
 0x135   : > { %v609_v4 = vpop.permute.xlu1 %608 }
 0x136   : > { %v611_v7 = vrot.slane %v609_v4, 4 }
 0x138   : > { %v612_v13 = vsel %vm221_vm4, %v610_v2, %v611_v7  ;;  %v615_v17 = vsel %vm6250_vm8, %v609_v4, %v611_v7  ;;  %v652_v4 = vpop.permute.xlu2 %651 }
 0x139   : > { %v614_v15 = vsel %vm6250_vm8, %v607_v63, %v612_v13  ;;  %619 = vst.msk [vmem:[#allocation2 + $0x98] sm:$0xcc] %vm4965_vm7, %v615_v17  ;;  %vm6253_vm8 = vcmask 777216   ;;  %v654_v7 = vrot.slane %v652_v4, 4 }
 0x13a   : > { %618 = vst [vmem:[#allocation2 + $0x90] sm:$0xcc] %v614_v15  ;;  %v593_v39 = vsel %vm6253_vm8, %v587_v34, %v589_v36  ;;  %v592_v40 = vsel %vm6253_vm8, %v5115_v58, %v590_v38  ;;  %vm699_vm8 = vcmask 613376   ;;  %v635_v58 = vsel %vm6257_vm1, %v628_v49, %v633_v56 }
 0x13b   : > { %v967_v60 = vld.sshfl [vmem:[#allocation1] sm:$0xff pattern:$0x75643120]  ;;  %v969_v61 = vld.sshfl [vmem:[#allocation1 + $0x8] sm:$0xff pattern:$0x75643120] }
 0x13c   : > { %988 = vst [vmem:[#allocation1 + $0x1] ss:$2 sm:$0xff] %v4868_v1  ;;  %973 = vrot.lane.b32.xlu2 %v969_v61, %s6243_s16  ;;  %971 = vrot.lane.b32.xlu1 %v967_v60, %s6243_s16  ;;  %s6246_s16 = smov 46   ;;  %vm6262_vm1 = vcmask 752640  }
 0x13d   : > { %v5143_v29 = vpop.permute.xlu1 %1437  ;;  %597 = vst.msk [vmem:[#allocation2 + $0x98] sm:$0x33] %vm4921_vm2, %v593_v39  ;;  %v658_v12 = vsel %vm6262_vm1, %v652_v4, %v654_v7 }
 0x13e   : > { %v671_v33 = vpop.permute.xlu0 %670  ;;  %596 = vst [vmem:[#allocation2 + $0x90] sm:$0x33] %v592_v40 }
 0x13f   : > { %v674_v46 = vrot.slane %v671_v33, 4  ;;  %639 = vst [vmem:[#allocation2 + $0xa0] sm:$0x33] %v635_v58 }
 0x140   : > { %662 = vst.msk [vmem:[#allocation2 + $0xa8] sm:$0xcc] %vm4965_vm7, %v658_v12 }
 0x143   : > { %v989_v10 = vld.sshfl [vmem:[#allocation1] sm:$0xff pattern:$0x75643120]  ;;  %v991_v18 = vld.sshfl [vmem:[#allocation1 + $0x8] sm:$0xff pattern:$0x75643120] }
 0x144   : > { %993 = vrot.lane.b32.xlu0 %v989_v10, %s6246_s16  ;;  %1009 = vst [vmem:[#allocation1] ss:$2 sm:$0xff] %v4868_v1  ;;  %995 = vrot.lane.b32.xlu1 %v991_v18, %s6246_s16  ;;  %s6251_s16 = smov 45   ;;  %v693_v18 = vpop.permute.xlu2 %692 }
 0x145   : > { %v650_v37 = vpop.permute.xlu1 %649  ;;  %v696_v16 = vrot.slane %v693_v18, 4 }
 0x146   : > { %v695_v48 = vpop.permute.xlu0 %694  ;;  %v653_v61 = vrot.slane %v650_v37, 4 }
 0x147   : > { %v697_v50 = vrot.slane %v695_v48, 4 }
 0x148   : > { %v655_v11 = vsel %vm221_vm4, %v653_v61, %v654_v7 }
 0x149   : > { %v701_v55 = vsel %vm699_vm8, %v695_v48, %v697_v50  ;;  %v657_v13 = vsel %vm6262_vm1, %v650_v37, %v655_v11  ;;  %v698_v22 = vsel %vm221_vm4, %v696_v16, %v697_v50  ;;  %vm6264_vm1 = vcmask 605184  }
 0x14a   : > { %705 = vst.msk [vmem:[#allocation2 + $0xb8] sm:$0xcc] %vm4965_vm7, %v701_v55  ;;  %v700_v23 = vsel %vm699_vm8, %v693_v18, %v698_v22  ;;  %vm6268_vm8 = vcmask 564224  }
 0x14b   : > { %v1012_v25 = vld.sshfl [vmem:[#allocation1 + $0x8] sm:$0xff pattern:$0x75643120]  ;;  %v1010_v27 = vld.sshfl [vmem:[#allocation1] sm:$0xff pattern:$0x75643120] }
 0x14c   : > { %1016 = vrot.lane.b32.xlu0 %v1012_v25, %s6251_s16  ;;  %1031 = vst [vmem:[#allocation1 + $0x1] ss:$2 sm:$0xff] %v4868_v1  ;;  %1014 = vrot.lane.b32.xlu2 %v1010_v27, %s6251_s16  ;;  %s6255_s16 = smov 43  }
 0x14d   : > { %v673_v51 = vpop.permute.xlu1 %672  ;;  %661 = vst [vmem:[#allocation2 + $0xa0] sm:$0xcc] %v657_v13 }
 0x14e   : > { %v675_v53 = vrot.slane %v673_v51, 4  ;;  %704 = vst [vmem:[#allocation2 + $0xb0] sm:$0xcc] %v700_v23 }
 0x150   : > { %v676_v59 = vsel %vm221_vm4, %v674_v46, %v675_v53  ;;  %v679_v63 = vsel %vm677_vm0, %v673_v51, %v675_v53 }
 0x151   : > { %v678_v60 = vsel %vm677_vm0, %v671_v33, %v676_v59  ;;  %683 = vst.msk [vmem:[#allocation2 + $0xb8] sm:$0x33] %vm4921_vm2, %v679_v63  ;;  %vm6273_vm0 = vcmask 588800  }
 0x152   : > { %682 = vst [vmem:[#allocation2 + $0xb0] sm:$0x33] %v678_v60 }
 0x153   : > { %v1032_v31 = vld.sshfl [vmem:[#allocation1] sm:$0xff pattern:$0x75643120]  ;;  %v1034_v32 = vld.sshfl [vmem:[#allocation1 + $0x8] sm:$0xff pattern:$0x75643120] }
 0x154   : > { %1052 = vst [vmem:[#allocation1] ss:$2 sm:$0xff] %v4868_v1  ;;  %1038 = vrot.lane.b32.xlu2 %v1034_v32, %s6260_s8  ;;  %1036 = vrot.lane.b32.xlu1 %v1032_v31, %s6260_s8  ;;  %v5159_v1 = vld [vmem:[%s4864_s19] sm:$0xff]  ;;  %s4806_s8 = smov 40   ;;  %v716_v32 = vpop.permute.xlu2 %715 }
 0x155   : > { %v5175_v8 = vpop.permute.xlu1 %1468  ;;  %v718_v33 = vrot.slane %v716_v32, 4 }
 0x156   : > { %v736_v3 = vpop.permute.xlu0 %735 }
 0x157   : > { %v739_v30 = vrot.slane %v736_v3, 4  ;;  %v722_v38 = vsel %vm6264_vm1, %v716_v32, %v718_v33 }
 0x158   : > { %726 = vst.msk [vmem:[#allocation2 + $0xc8] sm:$0x33] %vm4921_vm2, %v722_v38 }
 0x15b   : > { %v1053_v35 = vld.sshfl [vmem:[#allocation1] sm:$0xff pattern:$0x75643120]  ;;  %v1055_v45 = vld.sshfl [vmem:[#allocation1 + $0x8] sm:$0xff pattern:$0x75643120] }
 0x15c   : > { %1057 = vrot.lane.b32.xlu0 %v1053_v35, %s6255_s16  ;;  %1074 = vst [vmem:[#allocation1 + $0x1] ss:$2 sm:$0xff] %v5159_v1  ;;  %1059 = vrot.lane.b32.xlu1 %v1055_v45, %s6255_s16  ;;  %s6258_s16 = smov 42   ;;  %v757_v50 = vpop.permute.xlu2 %756 }
 0x15d   : > { %v714_v20 = vpop.permute.xlu1 %713  ;;  %v760_v51 = vrot.slane %v757_v50, 4 }
 0x15e   : > { %v759_v10 = vpop.permute.xlu0 %758  ;;  %v717_v24 = vrot.slane %v714_v20, 4 }
 0x15f   : > { %v761_v19 = vrot.slane %v759_v10, 4 }
 0x160   : > { %v719_v37 = vsel %vm221_vm4, %v717_v24, %v718_v33 }
 0x161   : > { %v765_v21 = vsel %vm6273_vm0, %v759_v10, %v761_v19  ;;  %v721_v39 = vsel %vm6264_vm1, %v714_v20, %v719_v37  ;;  %v762_v56 = vsel %vm221_vm4, %v760_v51, %v761_v19  ;;  %vm6266_vm1 = vcmask 580608  }
 0x162   : > { %769 = vst.msk [vmem:[#allocation2 + $0xd8] sm:$0x33] %vm4921_vm2, %v765_v21  ;;  %v764_v58 = vsel %vm6273_vm0, %v757_v50, %v762_v56  ;;  %vm1043_vm0 = vcmask 359424  }
 0x163   : > { %v1077_v0 = vld.sshfl [vmem:[#allocation1 + $0x8] sm:$0xff pattern:$0x75643120]  ;;  %v1075_v2 = vld.sshfl [vmem:[#allocation1] sm:$0xff pattern:$0x75643120] }
 0x164   : > { %1081 = vrot.lane.b32.xlu0 %v1077_v0, %s6258_s16  ;;  %1095 = vst [vmem:[#allocation1] ss:$2 sm:$0xff] %v5159_v1  ;;  %1079 = vrot.lane.b32.xlu2 %v1075_v2, %s6258_s16  ;;  %s4805_s16 = smov 41   ;;  %v781_v0 = vpop.permute.xlu2 %780 }
 0x165   : > { %v738_v34 = vpop.permute.xlu1 %737  ;;  %725 = vst [vmem:[#allocation2 + $0xc0] sm:$0x33] %v721_v39  ;;  %v783_v2 = vrot.slane %v781_v0, 4 }
 0x166   : > { %v740_v36 = vrot.slane %v738_v34, 4  ;;  %768 = vst [vmem:[#allocation2 + $0xd0] sm:$0x33] %v764_v58 }
 0x167   : > { %v787_v12 = vsel %vm6266_vm1, %v781_v0, %v783_v2 }
 0x168   : > { %v741_v40 = vsel %vm221_vm4, %v739_v30, %v740_v36  ;;  %v744_v45 = vsel %vm6265_vm5, %v738_v34, %v740_v36  ;;  %791 = vst.msk [vmem:[#allocation2 + $0xd8] sm:$0xcc] %vm4965_vm7, %v787_v12 }
 0x169   : > { %v743_v35 = vsel %vm6265_vm5, %v736_v3, %v741_v40  ;;  %748 = vst.msk [vmem:[#allocation2 + $0xc8] sm:$0xcc] %vm4965_vm7, %v744_v45  ;;  %vm6267_vm5 = vcmask 572416  }
 0x16a   : > { %747 = vst [vmem:[#allocation2 + $0xc0] sm:$0xcc] %v743_v35 }
 0x16b   : > { %v1096_v15 = vld.sshfl [vmem:[#allocation1] sm:$0xff pattern:$0x75643120]  ;;  %v1098_v17 = vld.sshfl [vmem:[#allocation1 + $0x8] sm:$0xff pattern:$0x75643120] }
 0x16c   : > { %1117 = vst [vmem:[#allocation1 + $0x1] ss:$2 sm:$0xff] %v5159_v1  ;;  %1102 = vrot.lane.b32.xlu2 %v1098_v17, %s4805_s16  ;;  %1100 = vrot.lane.b32.xlu1 %v1096_v15, %s4805_s16  ;;  %v822_v16 = vpop.permute.xlu2 %821 }
 0x16d   : > { %v779_v53 = vpop.permute.xlu1 %778  ;;  %v825_v20 = vrot.slane %v822_v16, 4 }
 0x16e   : > { %v800_v31 = vpop.permute.xlu0 %799  ;;  %v782_v59 = vrot.slane %v779_v53, 4 }
 0x16f   : > { %v803_v63 = vrot.slane %v800_v31, 4 }
 0x170   : > { %v784_v11 = vsel %vm221_vm4, %v782_v59, %v783_v2 }
 0x171   : > { %v786_v13 = vsel %vm6266_vm1, %v779_v53, %v784_v11  ;;  %vm6270_vm1 = vcmask 539648   ;;  %v4126_v59 = vld [vmem:[#allocation2 + $0xc0] sm:$0xf]  ;;  %v4537_v11 = vld [vmem:[#allocation2 + $0xac] sm:$0xf0] }
 0x172   : > { %790 = vst [vmem:[#allocation2 + $0xd0] sm:$0xcc] %v786_v13 }
 0x173   : > { %v1118_v25 = vld.sshfl [vmem:[#allocation1] sm:$0xff pattern:$0x75643120]  ;;  %v1120_v27 = vld.sshfl [vmem:[#allocation1 + $0x8] sm:$0xff pattern:$0x75643120] }
 0x174   : > { %1122 = vrot.lane.b32.xlu0 %v1118_v25, %s4806_s8  ;;  %1139 = vst [vmem:[#allocation1] ss:$2 sm:$0xff] %v5159_v1  ;;  %1124 = vrot.lane.b32.xlu1 %v1120_v27, %s4806_s8  ;;  %v845_v34 = vpop.permute.xlu2 %844 }
 0x175   : > { %v802_v3 = vpop.permute.xlu1 %801  ;;  %v847_v36 = vrot.slane %v845_v34, 4 }
 0x176   : > { %v824_v49 = vpop.permute.xlu0 %823  ;;  %v804_v7 = vrot.slane %v802_v3, 4 }
 0x177   : > { %v826_v41 = vrot.slane %v824_v49, 4 }
 0x178   : > { %v805_v15 = vsel %vm221_vm4, %v803_v63, %v804_v7  ;;  %v808_v10 = vsel %vm6267_vm5, %v802_v3, %v804_v7  ;;  %v4110_v7 = vld [vmem:[#allocation2 + $0xa0] sm:$0xf] }
 0x179   : > { %v830_v55 = vsel %vm6268_vm8, %v824_v49, %v826_v41  ;;  %v807_v17 = vsel %vm6267_vm5, %v800_v31, %v805_v15  ;;  %812 = vst.msk [vmem:[#allocation2 + $0xe8] sm:$0x33] %vm4921_vm2, %v808_v10  ;;  %v827_v24 = vsel %vm221_vm4, %v825_v20, %v826_v41  ;;  %vm6271_vm5 = vcmask 556032  }
 0x17a   : > { %834 = vst.msk [vmem:[#allocation2 + $0xe8] sm:$0xcc] %vm4965_vm7, %v830_v55  ;;  %v829_v25 = vsel %vm6268_vm8, %v822_v16, %v827_v24  ;;  %vm6269_vm8 = vcmask 547840   ;;  %v851_v40 = vsel %vm6271_vm5, %v845_v34, %v847_v36  ;;  %v4111_v10 = vor.u32 %v4537_v11, %v4110_v7  ;;  %v4533_v16 = vld [vmem:[#allocation2 + $0x8c] sm:$0xf0] }
 0x17b   : > { %v1145_v46 = vld.sshfl [vmem:[#allocation1 + $0x8] sm:$0xff pattern:$0x75643120]  ;;  %v1143_v48 = vld.sshfl [vmem:[#allocation1] sm:$0xff pattern:$0x75643120] }
 0x17c   : > { %1151 = vrot.lane.b32.xlu0 %v1145_v46, %s4753_s20  ;;  %1171 = vst [vmem:[#allocation1 + $0x1] ss:$2 sm:$0xff] %v5159_v1  ;;  %1149 = vrot.lane.b32.xlu2 %v1143_v48, %s4753_s20  ;;  %v886_v41 = vpop.permute.xlu2 %885  ;;  %v4078_v24 = vld [vmem:[#allocation2 + $0x60] sm:$0xf]  ;;  %v4525_v34 = vld [vmem:[#allocation2 + $0x4c] sm:$0xf0] }
 0x17d   : > { %811 = vst [vmem:[#allocation2 + $0xe0] sm:$0x33] %v807_v17  ;;  %v889_v51 = vrot.slane %v886_v41, 4  ;;  %s6297_s20 = smov 118  }
 0x17e   : > { %v843_v21 = vpop.permute.xlu1 %842  ;;  %833 = vst [vmem:[#allocation2 + $0xe0] sm:$0xcc] %v829_v25  ;;  %v4529_v25 = vld [vmem:[#allocation2 + $0x6c] sm:$0xf0] }
 0x17f   : > { %v846_v30 = vrot.slane %v843_v21, 4  ;;  %855 = vst.msk [vmem:[#allocation2 + $0xf8] sm:$0x33] %vm4921_vm2, %v851_v40  ;;  %v4046_v40 = vld [vmem:[#allocation2 + $0x20] sm:$0xf] }
 0x181   : > { %v848_v39 = vsel %vm221_vm4, %v846_v30, %v847_v36  ;;  %v4544_v14 = vld [vmem:[#allocation2 + $0xec] sm:$0xf] }
 0x182   : > { %v850_v35 = vsel %vm6271_vm5, %v843_v21, %v848_v39  ;;  %vm978_vm5 = vcmask 384000  }
 0x183   : > { %v1177_v60 = vld.sshfl [vmem:[#allocation1 + $0x8] sm:$0xff pattern:$0x75643120]  ;;  %v1175_v61 = vld.sshfl [vmem:[#allocation1] sm:$0xff pattern:$0x75643120] }
 0x184   : > { %1183 = vrot.lane.b32.xlu0 %v1177_v60, %s4754_s21  ;;  %1202 = vst [vmem:[#allocation1] ss:$2 sm:$0xff] %v5159_v1  ;;  %1181 = vrot.lane.b32.xlu2 %v1175_v61, %s4754_s21  ;;  %v4541_v61 = vld [vmem:[#allocation2 + $0xcc] sm:$0xf0]  ;;  %s4807_s21 = smov 117  }
 0x185   : > { %854 = vst [vmem:[#allocation2 + $0xf0] sm:$0x33] %v850_v35  ;;  %v4142_v55 = vld [vmem:[#allocation2 + $0xe0] sm:$0xf]  ;;  %v4127_v3 = vor.u32 %v4541_v61, %v4126_v59  ;;  %v4521_v35 = vld [vmem:[#allocation2 + $0x2c] sm:$0xf0] }
 0x186   : > { %v865_v4 = vpop.permute.xlu0 %864  ;;  %v867_v37 = vpop.permute.xlu1 %866 }
 0x187   : > { %v868_v33 = vrot.slane %v865_v4, 4  ;;  %v869_v38 = vrot.slane %v867_v37, 4 }
 0x189   : > { %v870_v45 = vsel %vm221_vm4, %v868_v33, %v869_v38  ;;  %v873_v48 = vsel %vm6269_vm8, %v867_v37, %v869_v38  ;;  %v4062_v33 = vld [vmem:[#allocation2 + $0x40] sm:$0xf] }
 0x18a   : > { %v872_v46 = vsel %vm6269_vm8, %v865_v4, %v870_v45  ;;  %877 = vst.msk [vmem:[#allocation2 + $0xf8] sm:$0xcc] %vm4965_vm7, %v873_v48  ;;  %vm914_vm8 = vcmask 408576   ;;  %v5254_v4 = vpop.permute.xlu2 %909  ;;  %v4063_v38 = vor.u32 %v4525_v34, %v4062_v33 }
 0x18b   : > { %v1208_v18 = vld.sshfl [vmem:[#allocation1 + $0x8] sm:$0xff pattern:$0x75643120]  ;;  %v1206_v19 = vld.sshfl [vmem:[#allocation1] sm:$0xff pattern:$0x75643120] }
 0x18c   : > { %1214 = vrot.lane.b32.xlu0 %v1208_v18, %s6287_s25  ;;  %1234 = vst [vmem:[#allocation1 + $0x1] ss:$2 sm:$0xff] %v5159_v1  ;;  %1212 = vrot.lane.b32.xlu2 %v1206_v19, %s6287_s25  ;;  %v912_v12 = vrot.slane %v5254_v4, 4  ;;  %v4094_v19 = vld [vmem:[#allocation2 + $0x80] sm:$0xf]  ;;  %s6303_s25 = smov 95  }
 0x18d   : > { %876 = vst [vmem:[#allocation2 + $0xf0] sm:$0xcc] %v872_v46 }
 0x18e   : > { %v888_v22 = vpop.permute.xlu0 %887  ;;  %v916_v17 = vsel %vm914_vm8, %v5254_v4, %v912_v12 }
 0x18f   : > { %v890_v23 = vrot.slane %v888_v22, 4  ;;  %920 = vst.msk [vmem:[#allocation2 + $0x108] sm:$0xcc] %vm4965_vm7, %v916_v17 }
 0x191   : > { %v894_v27 = vsel %vm6270_vm1, %v888_v22, %v890_v23  ;;  %v891_v56 = vsel %vm221_vm4, %v889_v51, %v890_v23  ;;  %v4095_v22 = vor.u32 %v4533_v16, %v4094_v19 }
 0x192   : > { %898 = vst.msk [vmem:[#allocation2 + $0x108] sm:$0x33] %vm4921_vm2, %v894_v27  ;;  %v893_v58 = vsel %vm6270_vm1, %v886_v41, %v891_v56  ;;  %vm6272_vm1 = vcmask 392192   ;;  %v951_v23 = vpop.permute.xlu2 %950  ;;  %v4517_v41 = vld [vmem:[#allocation2 + $0xc] sm:$0xf0] }
 0x193   : > { %v1240_v31 = vld.sshfl [vmem:[#allocation1 + $0x8] sm:$0xff pattern:$0x75643120]  ;;  %v1238_v32 = vld.sshfl [vmem:[#allocation1] sm:$0xff pattern:$0x75643120] }
 0x194   : > { %1246 = vrot.lane.b32.xlu0 %v1240_v31, %s4760_s27  ;;  %1265 = vst [vmem:[#allocation1] ss:$2 sm:$0xff] %v5159_v1  ;;  %1244 = vrot.lane.b32.xlu2 %v1238_v32, %s4760_s27  ;;  %v4545_v60 = vld [vmem:[#allocation2 + $0xec] sm:$0xf0]  ;;  %v954_v27 = vrot.slane %v951_v23, 4  ;;  %v4079_v31 = vor.u32 %v4529_v25, %v4078_v24 }
 0x195   : > { %897 = vst [vmem:[#allocation2 + $0x100] sm:$0x33] %v893_v58  ;;  %v4143_v63 = vor.u32 %v4545_v60, %v4142_v55 }
 0x197   : > { %3726 = vmatpush.bf16.msra.mxu0 %v4143_v63 }
 0x19a   : > { %v5274_v39 = vpop.permute.xlu2 %973 }
 0x19b   : > { %v1271_v49 = vld.sshfl [vmem:[#allocation1 + $0x8] sm:$0xff pattern:$0x75643120]  ;;  %v1269_v50 = vld.sshfl [vmem:[#allocation1] sm:$0xff pattern:$0x75643120]  ;;  %3727 = vmatpush.bf16.msra.mxu0 %v4127_v3 }
 0x19c   : > { %1277 = vrot.lane.b32.xlu0 %v1271_v49, %s4763_s30  ;;  %1297 = vst [vmem:[#allocation1 + $0x1] ss:$2 sm:$0xff] %v5159_v1  ;;  %1275 = vrot.lane.b32.xlu2 %v1269_v50, %s4763_s30  ;;  %v976_v45 = vrot.slane %v5274_v39, 4  ;;  %v4047_v49 = vor.u32 %v4521_v35, %v4046_v40  ;;  %v4030_v50 = vld [vmem:[#allocation2] sm:$0xf] }
 0x19d   : > { %v4031_v56 = vor.u32 %v4517_v41, %v4030_v50 }
 0x19e   : > { %v5248_v53 = vpop.permute.xlu0 %928  ;;  %v980_v48 = vsel %vm978_vm5, %v5274_v39, %v976_v45 }
 0x19f   : > { %3728 = vmatpush.bf16.msra.mxu0 %v4111_v10  ;;  %984 = vst.msk [vmem:[#allocation2 + $0x128] sm:$0x33] %vm4921_vm2, %v980_v48 }
 0x1a3   : > { %v1303_v0 = vld.sshfl [vmem:[#allocation1 + $0x8] sm:$0xff pattern:$0x75643120]  ;;  %v1301_v2 = vld.sshfl [vmem:[#allocation1] sm:$0xff pattern:$0x75643120]  ;;  %3729 = vmatpush.bf16.msra.mxu0 %v4095_v22 }
 0x1a4   : > { %1309 = vrot.lane.b32.xlu0 %v1303_v0, %s4767_s7  ;;  %1328 = vst [vmem:[#allocation1] ss:$2 sm:$0xff] %v5159_v1  ;;  %1307 = vrot.lane.b32.xlu2 %v1301_v2, %s4767_s7 }
 0x1a6   : > { %v953_v13 = vpop.permute.xlu0 %952  ;;  %v1015_v58 = vpop.permute.xlu2 %1014 }
 0x1a7   : > { %v955_v15 = vrot.slane %v953_v13, 4  ;;  %3730 = vmatpush.bf16.msra.mxu0 %v4079_v31  ;;  %v1018_v59 = vrot.slane %v1015_v58, 4 }
 0x1a9   : > { %v959_v18 = vsel %vm6272_vm1, %v953_v13, %v955_v15  ;;  %v956_v30 = vsel %vm221_vm4, %v954_v27, %v955_v15  ;;  %v5301_v15 = vld [vmem:[%s4864_s19 + $0x2] sm:$0xff] }
 0x1aa   : > { %963 = vst.msk [vmem:[#allocation2 + $0x118] sm:$0xcc] %vm4965_vm7, %v959_v18  ;;  %v958_v32 = vsel %vm6272_vm1, %v951_v23, %v956_v30  ;;  %vm6274_vm1 = vcmask 367616  }
 0x1ab   : > { %v1334_v20 = vld.sshfl [vmem:[#allocation1 + $0x8] sm:$0xff pattern:$0x75643120]  ;;  %v1332_v21 = vld.sshfl [vmem:[#allocation1] sm:$0xff pattern:$0x75643120]  ;;  %3731 = vmatpush.bf16.msra.mxu0 %v4063_v38 }
 0x1ac   : > { %1340 = vrot.lane.b32.xlu0 %v1334_v20, %s4771_s11  ;;  %1360 = vst [vmem:[#allocation1 + $0x1] ss:$2 sm:$0xff] %v5159_v1  ;;  %1338 = vrot.lane.b32.xlu2 %v1332_v21, %s4771_s11 }
 0x1ad   : > { %962 = vst [vmem:[#allocation2 + $0x110] sm:$0xcc] %v958_v32 }
 0x1ae   : > { %v5297_v11 = vpop.permute.xlu2 %1038 }
 0x1af   : > { %3732 = vmatpush.bf16.msra.mxu0 %v4047_v49  ;;  %v1041_v13 = vrot.slane %v5297_v11, 4 }
 0x1b1   : > { %v1045_v17 = vsel %vm1043_vm0, %v5297_v11, %v1041_v13 }
 0x1b2   : > { %1049 = vst.msk [vmem:[#allocation2 + $0x138] sm:$0xcc] %vm4965_vm7, %v1045_v17 }
 0x1b3   : > { %v1366_v36 = vld.sshfl [vmem:[#allocation1 + $0x8] sm:$0xff pattern:$0x75643120]  ;;  %v1364_v37 = vld.sshfl [vmem:[#allocation1] sm:$0xff pattern:$0x75643120]  ;;  %3733 = vmatpush.bf16.msra.mxu0 %v4031_v56 }
 0x1b4   : > { %1372 = vrot.lane.b32.xlu0 %v1366_v36, %s4775_s22  ;;  %1391 = vst [vmem:[#allocation1] ss:$2 sm:$0xff] %v5159_v1  ;;  %1370 = vrot.lane.b32.xlu2 %v1364_v37, %s4775_s22 }
 0x1b6   : > { %v5278_v46 = vpop.permute.xlu0 %993 }
 0x1bb   : > { %v1397_v51 = vld.sshfl [vmem:[#allocation1 + $0x8] sm:$0xff pattern:$0x75643120]  ;;  %v1395_v55 = vld.sshfl [vmem:[#allocation1] sm:$0xff pattern:$0x75643120] }
 0x1bc   : > { %1403 = vrot.lane.b32.xlu0 %v1397_v51, %s4779_s18  ;;  %1423 = vst [vmem:[#allocation1 + $0x1] ss:$2 sm:$0xff] %v5159_v1  ;;  %1401 = vrot.lane.b32.xlu2 %v1395_v55, %s4779_s18  ;;  %v1157_v51 = vrot.slane %v4928_v47, 4 }
 0x1be   : > { %v1017_v60 = vpop.permute.xlu0 %1016  ;;  %v1080_v20 = vpop.permute.xlu2 %1079 }
 0x1bf   : > { %v1019_v61 = vrot.slane %v1017_v60, 4  ;;  %v1083_v21 = vrot.slane %v1080_v20, 4 }
 0x1c1   : > { %v1023_v63 = vsel %vm6274_vm1, %v1017_v60, %v1019_v61  ;;  %v1020_v0 = vsel %vm221_vm4, %v1018_v59, %v1019_v61 }
 0x1c2   : > { %1027 = vst.msk [vmem:[#allocation2 + $0x138] sm:$0x33] %vm4921_vm2, %v1023_v63  ;;  %v1022_v2 = vsel %vm6274_vm1, %v1015_v58, %v1020_v0  ;;  %vm6276_vm1 = vcmask 343040  }
 0x1c3   : > { %v1429_v3 = vld.sshfl [vmem:[#allocation1 + $0x8] sm:$0xff pattern:$0x75643120]  ;;  %v1427_v7 = vld.sshfl [vmem:[#allocation1] sm:$0xff pattern:$0x75643120] }
 0x1c4   : > { %1435 = vrot.lane.b32.xlu0 %v1429_v3, %s4783_s17  ;;  %1454 = vst [vmem:[#allocation1] ss:$2 sm:$0xff] %v5159_v1  ;;  %1433 = vrot.lane.b32.xlu2 %v1427_v7, %s4783_s17  ;;  %v1189_v3 = vrot.slane %v4935_v52, 4 }
 0x1c5   : > { %1026 = vst [vmem:[#allocation2 + $0x130] sm:$0x33] %v1022_v2 }
 0x1c6   : > { %v5322_v32 = vpop.permute.xlu2 %1102 }
 0x1c7   : > { %v1105_v33 = vrot.slane %v5322_v32, 4 }
 0x1c9   : > { %v1109_v34 = vsel %vm6284_vm14, %v5322_v32, %v1105_v33 }
 0x1ca   : > { %1113 = vst.msk [vmem:[#allocation2 + $0x158] sm:$0x33] %vm4921_vm2, %v1109_v34 }
 0x1cb   : > { %v1460_v10 = vld.sshfl [vmem:[#allocation1 + $0x8] sm:$0xff pattern:$0x75643120]  ;;  %v1458_v18 = vld.sshfl [vmem:[#allocation1] sm:$0xff pattern:$0x75643120] }
 0x1cc   : > { %1466 = vrot.lane.b32.xlu0 %v1460_v10, %s4787_s10  ;;  %1485 = vst [vmem:[#allocation1 + $0x1] ss:$2 sm:$0xff] %v5301_v15  ;;  %1464 = vrot.lane.b32.xlu2 %v1458_v18, %s4787_s10 }
 0x1ce   : > { %v5312_v1 = vpop.permute.xlu0 %1057 }
 0x1cf   : > { %v1061_v11 = vrot.slane %v5312_v1, 4 }
 0x1d3   : > { %v1488_v19 = vld.sshfl [vmem:[#allocation1 + $0x8] sm:$0xff pattern:$0x75643120]  ;;  %v1486_v16 = vld.sshfl [vmem:[#allocation1] sm:$0xff pattern:$0x75643120] }
 0x1d4   : > { %1492 = vrot.lane.b32.xlu0 %v1488_v19, %s4756_s23  ;;  %1505 = vst [vmem:[#allocation1] ss:$2 sm:$0xff] %v5301_v15  ;;  %1490 = vrot.lane.b32.xlu2 %v1486_v16, %s4756_s23  ;;  %v908_v16 = vpop.permute.xlu1 %907  ;;  %s4808_s23 = smov 116  }
 0x1d6   : > { %v1082_v22 = vpop.permute.xlu0 %1081  ;;  %v1150_v38 = vpop.permute.xlu2 %1149 }
 0x1d7   : > { %v1084_v23 = vrot.slane %v1082_v22, 4  ;;  %v1155_v49 = vrot.slane %v1150_v38, 4 }
 0x1d9   : > { %v1088_v24 = vsel %vm6276_vm1, %v1082_v22, %v1084_v23  ;;  %v1085_v25 = vsel %vm221_vm4, %v1083_v21, %v1084_v23  ;;  %v911_v22 = vrot.slane %v908_v16, 4 }
 0x1da   : > { %1092 = vst.msk [vmem:[#allocation2 + $0x148] sm:$0xcc] %vm4965_vm7, %v1088_v24  ;;  %v1087_v27 = vsel %vm6276_vm1, %v1080_v20, %v1085_v25  ;;  %vm1159_vm1 = vcmask 195584   ;;  %v1220_v25 = vrot.slane %v4955_v5, 4 }
 0x1db   : > { %v1506_v30 = vld.sshfl [vmem:[#allocation1] sm:$0xff pattern:$0x75643120]  ;;  %v1508_v31 = vld.sshfl [vmem:[#allocation1 + $0x8] sm:$0xff pattern:$0x75643120] }
 0x1dc   : > { %1510 = vrot.lane.b32.xlu1 %v1506_v30, %s4757_s24  ;;  %1526 = vst [vmem:[#allocation1 + $0x1] ss:$2 sm:$0xff] %v5301_v15  ;;  %1512 = vrot.lane.b32.xlu2 %v1508_v31, %s4757_s24  ;;  %v913_v30 = vsel %vm221_vm4, %v911_v22, %v912_v12  ;;  %v931_v4 = vpop.permute.xlu1 %930  ;;  %v997_v22 = vrot.slane %v5278_v46, 4  ;;  %s6298_s24 = smov 100  }
 0x1dd   : > { %1091 = vst [vmem:[#allocation2 + $0x140] sm:$0xcc] %v1087_v27  ;;  %v915_v31 = vsel %vm914_vm8, %v908_v16, %v913_v30  ;;  %vm6281_vm8 = vcmask 171008  }
 0x1de   : > { %v1182_v50 = vpop.permute.xlu2 %1181  ;;  %919 = vst [vmem:[#allocation2 + $0x100] sm:$0xcc] %v915_v31 }
 0x1df   : > { %v1187_v0 = vrot.slane %v1182_v50, 4 }
 0x1e3   : > { %v1529_v36 = vld.sshfl [vmem:[#allocation1 + $0x8] sm:$0xff pattern:$0x75643120]  ;;  %v1527_v37 = vld.sshfl [vmem:[#allocation1] sm:$0xff pattern:$0x75643120] }
 0x1e4   : > { %1533 = vrot.lane.b32.xlu1 %v1529_v36, %s4759_s26  ;;  %1531 = vrot.lane.b32.xlu0 %v1527_v37, %s4759_s26  ;;  %1546 = vst [vmem:[#allocation1] ss:$2 sm:$0xff] %v5301_v15 }
 0x1e6   : > { %v5337_v40 = vpop.permute.xlu0 %1122  ;;  %v1213_v47 = vpop.permute.xlu2 %1212 }
 0x1e7   : > { %v1218_v52 = vrot.slane %v1213_v47, 4 }
 0x1eb   : > { %v1549_v35 = vld.sshfl [vmem:[#allocation1 + $0x8] sm:$0xff pattern:$0x75643120]  ;;  %v1547_v48 = vld.sshfl [vmem:[#allocation1] sm:$0xff pattern:$0x75643120] }
 0x1ec   : > { %1553 = vrot.lane.b32.xlu0 %v1549_v35, %s4761_s28  ;;  %1567 = vst [vmem:[#allocation1 + $0x1] ss:$2 sm:$0xff] %v5301_v15  ;;  %1551 = vrot.lane.b32.xlu2 %v1547_v48, %s4761_s28 }
 0x1ee   : > { %v1152_v41 = vpop.permute.xlu0 %1151  ;;  %v1245_v23 = vpop.permute.xlu2 %1244 }
 0x1ef   : > { %v1156_v55 = vrot.slane %v1152_v41, 4  ;;  %v1250_v48 = vrot.slane %v1245_v23, 4 }
 0x1f1   : > { %v1161_v56 = vsel %vm221_vm4, %v1156_v55, %v1157_v51  ;;  %v1158_v58 = vsel %vm221_vm4, %v1155_v49, %v1156_v55  ;;  %v933_v49 = vrot.slane %v931_v4, 4 }
 0x1f2   : > { %v1162_v59 = vsel %vm1159_vm1, %v1152_v41, %v1161_v56  ;;  %v1160_v60 = vsel %vm1159_vm1, %v1150_v38, %v1158_v58  ;;  %vm6278_vm1 = vcmask 179200   ;;  %v932_v38 = vrot.slane %v5248_v53, 4 }
 0x1f3   : > { %1166 = vst.msk [vmem:[#allocation2 + $0x168] sm:$0x33] %vm4921_vm2, %v1162_v59  ;;  %v1568_v61 = vld.sshfl [vmem:[#allocation1] sm:$0xff pattern:$0x75643120]  ;;  %v1252_v41 = vrot.slane %v4960_v9, 4 }
 0x1f4   : > { %v1570_v63 = vld.sshfl [vmem:[#allocation1 + $0x8] sm:$0xff pattern:$0x75643120]  ;;  %1572 = vrot.lane.b32.xlu1 %v1568_v61, %s4762_s29  ;;  %1165 = vst [vmem:[#allocation2 + $0x160] sm:$0x33] %v1160_v60  ;;  %v934_v56 = vsel %vm221_vm4, %v932_v38, %v933_v49 }
 0x1f5   : > { %1587 = vst [vmem:[#allocation1] ss:$2 sm:$0xff] %v5301_v15  ;;  %1574 = vrot.lane.b32.xlu2 %v1570_v63, %s4762_s29 }
 0x1f6   : > { %v1184_v2 = vpop.permute.xlu0 %1183 }
 0x1f7   : > { %v1188_v7 = vrot.slane %v1184_v2, 4 }
 0x1f9   : > { %v1193_v17 = vsel %vm221_vm4, %v1188_v7, %v1189_v3  ;;  %v1190_v10 = vsel %vm221_vm4, %v1187_v0, %v1188_v7  ;;  %v972_v0 = vpop.permute.xlu1 %971 }
 0x1fa   : > { %v1194_v18 = vsel %vm1191_vm13, %v1184_v2, %v1193_v17  ;;  %v1192_v19 = vsel %vm1191_vm13, %v1182_v50, %v1190_v10  ;;  %vm935_vm13 = vcmask 400384   ;;  %v1276_v50 = vpop.permute.xlu2 %1275  ;;  %v975_v7 = vrot.slane %v972_v0, 4 }
 0x1fb   : > { %1198 = vst.msk [vmem:[#allocation2 + $0x168] sm:$0xcc] %vm4965_vm7, %v1194_v18  ;;  %v937_v58 = vsel %vm935_vm13, %v931_v4, %v933_v49  ;;  %v936_v59 = vsel %vm935_vm13, %v5248_v53, %v934_v56  ;;  %v1283_v53 = vrot.slane %v4980_v26, 4  ;;  %v1281_v3 = vrot.slane %v1276_v50, 4 }
 0x1fc   : > { %v1590_v20 = vld.sshfl [vmem:[#allocation1 + $0x8] sm:$0xff pattern:$0x75643120]  ;;  %v1588_v21 = vld.sshfl [vmem:[#allocation1] sm:$0xff pattern:$0x75643120] }
 0x1fd   : > { %1594 = vrot.lane.b32.xlu1 %v1590_v20, %s4764_s4  ;;  %1592 = vrot.lane.b32.xlu0 %v1588_v21, %s4764_s4  ;;  %1608 = vst [vmem:[#allocation1 + $0x1] ss:$2 sm:$0xff] %v5301_v15  ;;  %vm6279_vm13 = vcmask 162816  }
 0x1fe   : > { %v1215_v24 = vpop.permute.xlu0 %1214  ;;  %1197 = vst [vmem:[#allocation2 + $0x160] sm:$0xcc] %v1192_v19  ;;  %v977_v19 = vsel %vm221_vm4, %v975_v7, %v976_v45 }
 0x1ff   : > { %v1219_v27 = vrot.slane %v1215_v24, 4  ;;  %941 = vst.msk [vmem:[#allocation2 + $0x118] sm:$0x33] %vm4921_vm2, %v937_v58  ;;  %v979_v16 = vsel %vm978_vm5, %v972_v0, %v977_v19 }
 0x200   : > { %940 = vst [vmem:[#allocation2 + $0x110] sm:$0x33] %v936_v59 }
 0x201   : > { %v1224_v34 = vsel %vm221_vm4, %v1219_v27, %v1220_v25  ;;  %v1221_v36 = vsel %vm221_vm4, %v1218_v52, %v1219_v27  ;;  %983 = vst [vmem:[#allocation2 + $0x120] sm:$0x33] %v979_v16  ;;  %v996_v39 = vpop.permute.xlu1 %995 }
 0x202   : > { %v1225_v37 = vsel %vm6278_vm1, %v1215_v24, %v1224_v34  ;;  %v1223_v5 = vsel %vm6278_vm1, %v1213_v47, %v1221_v36  ;;  %v1308_v17 = vpop.permute.xlu2 %1307  ;;  %vm1000_vm1 = vcmask 375808   ;;  %v1315_v24 = vrot.slane %v5009_v57, 4 }
 0x203   : > { %1229 = vst.msk [vmem:[#allocation2 + $0x178] sm:$0x33] %vm4921_vm2, %v1225_v37  ;;  %v1313_v25 = vrot.slane %v1308_v17, 4  ;;  %v998_v27 = vrot.slane %v996_v39, 4 }
 0x204   : > { %v1611_v35 = vld.sshfl [vmem:[#allocation1 + $0x8] sm:$0xff pattern:$0x75643120]  ;;  %v1609_v12 = vld.sshfl [vmem:[#allocation1] sm:$0xff pattern:$0x75643120] }
 0x205   : > { %1615 = vrot.lane.b32.xlu0 %v1611_v35, %s4765_s5  ;;  %1628 = vst [vmem:[#allocation1] ss:$2 sm:$0xff] %v5301_v15  ;;  %1613 = vrot.lane.b32.xlu2 %v1609_v12, %s4765_s5  ;;  %v999_v36 = vsel %vm221_vm4, %v997_v22, %v998_v27  ;;  %v1002_v37 = vsel %vm1000_vm1, %v996_v39, %v998_v27 }
 0x206   : > { %v1247_v51 = vpop.permute.xlu0 %1246  ;;  %1228 = vst [vmem:[#allocation2 + $0x170] sm:$0x33] %v1223_v5  ;;  %v1001_v57 = vsel %vm1000_vm1, %v5278_v46, %v999_v36 }
 0x207   : > { %v1251_v55 = vrot.slane %v1247_v51, 4  ;;  %1006 = vst.msk [vmem:[#allocation2 + $0x128] sm:$0xcc] %vm4965_vm7, %v1002_v37  ;;  %v1441_v37 = vrot.slane %v5143_v29, 4 }
 0x208   : > { %1005 = vst [vmem:[#allocation2 + $0x120] sm:$0xcc] %v1001_v57 }
 0x209   : > { %v1256_v60 = vsel %vm221_vm4, %v1251_v55, %v1252_v41  ;;  %v1253_v61 = vsel %vm221_vm4, %v1250_v48, %v1251_v55  ;;  %v1037_v12 = vpop.permute.xlu1 %1036  ;;  %v1346_v48 = vrot.slane %v5042_v28, 4 }
 0x20a   : > { %v1257_v9 = vsel %vm6281_vm8, %v1247_v51, %v1256_v60  ;;  %v1255_v63 = vsel %vm6281_vm8, %v1245_v23, %v1253_v61  ;;  %v1339_v30 = vpop.permute.xlu2 %1338  ;;  %v1040_v49 = vrot.slane %v1037_v12, 4  ;;  %vm1064_vm8 = vcmask 351232  }
 0x20b   : > { %1261 = vst.msk [vmem:[#allocation2 + $0x178] sm:$0xcc] %vm4965_vm7, %v1257_v9  ;;  %v1344_v46 = vrot.slane %v1339_v30, 4 }
 0x20c   : > { %v1629_v47 = vld.sshfl [vmem:[#allocation1] sm:$0xff pattern:$0x75643120]  ;;  %v1631_v2 = vld.sshfl [vmem:[#allocation1 + $0x8] sm:$0xff pattern:$0x75643120]  ;;  %v1042_v56 = vsel %vm221_vm4, %v1040_v49, %v1041_v13 }
 0x20d   : > { %1633 = vrot.lane.b32.xlu1 %v1629_v47, %s4766_s6  ;;  %1649 = vst [vmem:[#allocation1 + $0x1] ss:$2 sm:$0xff] %v5301_v15  ;;  %1635 = vrot.lane.b32.xlu2 %v1631_v2, %s4766_s6  ;;  %v1044_v58 = vsel %vm1043_vm0, %v1037_v12, %v1042_v56  ;;  %v1472_v56 = vrot.slane %v5175_v8, 4 }
 0x20e   : > { %v1278_v10 = vpop.permute.xlu0 %1277  ;;  %1260 = vst [vmem:[#allocation2 + $0x170] sm:$0xcc] %v1255_v63  ;;  %v1378_v63 = vrot.slane %v5073_v62, 4 }
 0x20f   : > { %v1282_v18 = vrot.slane %v1278_v10, 4  ;;  %1048 = vst [vmem:[#allocation2 + $0x130] sm:$0xcc] %v1044_v58 }
 0x211   : > { %v1287_v26 = vsel %vm221_vm4, %v1282_v18, %v1283_v53  ;;  %v1284_v20 = vsel %vm221_vm4, %v1281_v3, %v1282_v18  ;;  %v1060_v9 = vpop.permute.xlu1 %1059 }
 0x212   : > { %v1288_v21 = vsel %vm6279_vm13, %v1278_v10, %v1287_v26  ;;  %v1286_v52 = vsel %vm6279_vm13, %v1276_v50, %v1284_v20  ;;  %vm6280_vm13 = vcmask 154624   ;;  %v1371_v50 = vpop.permute.xlu2 %1370  ;;  %v1062_v47 = vrot.slane %v1060_v9, 4 }
 0x213   : > { %1292 = vst.msk [vmem:[#allocation2 + $0x188] sm:$0x33] %vm4921_vm2, %v1288_v21  ;;  %v1376_v0 = vrot.slane %v1371_v50, 4 }
 0x214   : > { %v1652_v23 = vld.sshfl [vmem:[#allocation1 + $0x8] sm:$0xff pattern:$0x75643120]  ;;  %v1650_v45 = vld.sshfl [vmem:[#allocation1] sm:$0xff pattern:$0x75643120]  ;;  %v1066_v10 = vsel %vm1064_vm8, %v1060_v9, %v1062_v47 }
 0x215   : > { %1656 = vrot.lane.b32.xlu1 %v1652_v23, %s6297_s20  ;;  %1654 = vrot.lane.b32.xlu0 %v1650_v45, %s6297_s20  ;;  %1291 = vst [vmem:[#allocation2 + $0x180] sm:$0x33] %v1286_v52  ;;  %v1409_v52 = vrot.slane %v5107_v42, 4 }
 0x216   : > { %v1310_v31 = vpop.permute.xlu0 %1309  ;;  %1669 = vst [vmem:[#allocation1] ss:$2 sm:$0xff] %v5301_v15 }
 0x217   : > { %v1314_v34 = vrot.slane %v1310_v31, 4  ;;  %1070 = vst.msk [vmem:[#allocation2 + $0x148] sm:$0x33] %vm4921_vm2, %v1066_v10 }
 0x219   : > { %v1319_v38 = vsel %vm221_vm4, %v1314_v34, %v1315_v24  ;;  %v1316_v5 = vsel %vm221_vm4, %v1313_v25, %v1314_v34  ;;  %v1101_v21 = vpop.permute.xlu1 %1100  ;;  %v1126_v34 = vrot.slane %v5337_v40, 4 }
 0x21a   : > { %v1320_v4 = vsel %vm6280_vm13, %v1310_v31, %v1319_v38  ;;  %v1318_v35 = vsel %vm6280_vm13, %v1308_v17, %v1316_v5  ;;  %vm6282_vm13 = vcmask 146432   ;;  %v1402_v2 = vpop.permute.xlu2 %1401  ;;  %v1063_v17 = vsel %vm221_vm4, %v1061_v11, %v1062_v47 }
 0x21b   : > { %1324 = vst.msk [vmem:[#allocation2 + $0x188] sm:$0xcc] %vm4965_vm7, %v1320_v4  ;;  %v1065_v18 = vsel %vm1064_vm8, %v5312_v1, %v1063_v17  ;;  %v1407_v1 = vrot.slane %v1402_v2, 4  ;;  %v1104_v22 = vrot.slane %v1101_v21, 4 }
 0x21c   : > { %1323 = vst [vmem:[#allocation2 + $0x180] sm:$0xcc] %v1318_v35 }
 0x21d   : > { %v1670_v41 = vld.sshfl [vmem:[#allocation1] sm:$0xff pattern:$0x75643120]  ;;  %v1672_v51 = vld.sshfl [vmem:[#allocation1 + $0x8] sm:$0xff pattern:$0x75643120]  ;;  %v1106_v25 = vsel %vm221_vm4, %v1104_v22, %v1105_v33 }
 0x21e   : > { %v1341_v55 = vpop.permute.xlu0 %1340  ;;  %1691 = vst [vmem:[#allocation1 + $0x1] ss:$2 sm:$0xff] %v5301_v15  ;;  %1676 = vrot.lane.b32.xlu0 %v1672_v51, %s4807_s21  ;;  %1674 = vrot.lane.b32.xlu2 %v1670_v41, %s4807_s21  ;;  %v1108_v42 = vsel %vm6284_vm14, %v1101_v21, %v1106_v25  ;;  %vm6286_vm14 = vcmask 326656  }
 0x21f   : > { %v1345_v28 = vrot.slane %v1341_v55, 4  ;;  %1069 = vst [vmem:[#allocation2 + $0x140] sm:$0x33] %v1065_v18 }
 0x220   : > { %1112 = vst [vmem:[#allocation2 + $0x150] sm:$0x33] %v1108_v42 }
 0x221   : > { %v1350_v59 = vsel %vm221_vm4, %v1345_v28, %v1346_v48  ;;  %v1347_v60 = vsel %vm221_vm4, %v1344_v46, %v1345_v28  ;;  %v1125_v36 = vpop.permute.xlu1 %1124 }
 0x222   : > { %v1351_v13 = vsel %vm6282_vm13, %v1341_v55, %v1350_v59  ;;  %v1349_v61 = vsel %vm6282_vm13, %v1339_v30, %v1347_v60  ;;  %vm6283_vm13 = vcmask 138240   ;;  %v1434_v39 = vpop.permute.xlu2 %1433  ;;  %v1127_v38 = vrot.slane %v1125_v36, 4 }
 0x223   : > { %1355 = vst.msk [vmem:[#allocation2 + $0x198] sm:$0x33] %vm4921_vm2, %v1351_v13  ;;  %v1439_v57 = vrot.slane %v1434_v39, 4 }
 0x224   : > { %1354 = vst [vmem:[#allocation2 + $0x190] sm:$0x33] %v1349_v61  ;;  %v1128_v48 = vsel %vm221_vm4, %v1126_v34, %v1127_v38  ;;  %v1131_v46 = vsel %vm6286_vm14, %v1125_v36, %v1127_v38 }
 0x225   : > { %v1692_v53 = vld.sshfl [vmem:[#allocation1] sm:$0xff pattern:$0x75643120]  ;;  %v1694_v3 = vld.sshfl [vmem:[#allocation1 + $0x8] sm:$0xff pattern:$0x75643120]  ;;  %v1130_v49 = vsel %vm6286_vm14, %v5337_v40, %v1128_v48 }
 0x226   : > { %v1373_v7 = vpop.permute.xlu0 %1372  ;;  %1696 = vrot.lane.b32.xlu1 %v1692_v53, %s4808_s23  ;;  %1712 = vst [vmem:[#allocation1] ss:$2 sm:$0xff] %v5301_v15  ;;  %1698 = vrot.lane.b32.xlu2 %v1694_v3, %s4808_s23  ;;  %vm1474_vm14 = vcmask 113664  }
 0x227   : > { %v1377_v62 = vrot.slane %v1373_v7, 4  ;;  %1135 = vst.msk [vmem:[#allocation2 + $0x158] sm:$0xcc] %vm4965_vm7, %v1131_v46 }
 0x228   : > { %1134 = vst [vmem:[#allocation2 + $0x150] sm:$0xcc] %v1130_v49 }
 0x229   : > { %v1382_v19 = vsel %vm221_vm4, %v1377_v62, %v1378_v63  ;;  %v1379_v16 = vsel %vm221_vm4, %v1376_v0, %v1377_v62 }
 0x22a   : > { %v1383_v26 = vsel %vm6283_vm13, %v1373_v7, %v1382_v19  ;;  %v1381_v20 = vsel %vm6283_vm13, %v1371_v50, %v1379_v16  ;;  %vm6285_vm13 = vcmask 130048   ;;  %v1465_v5 = vpop.permute.xlu2 %1464 }
 0x22b   : > { %1387 = vst.msk [vmem:[#allocation2 + $0x198] sm:$0xcc] %vm4965_vm7, %v1383_v26  ;;  %v1470_v28 = vrot.slane %v1465_v5, 4 }
 0x22c   : > { %1386 = vst [vmem:[#allocation2 + $0x190] sm:$0xcc] %v1381_v20 }
 0x22d   : > { %v1715_v23 = vld.sshfl [vmem:[#allocation1 + $0x8] sm:$0xff pattern:$0x75643120]  ;;  %v1713_v45 = vld.sshfl [vmem:[#allocation1] sm:$0xff pattern:$0x75643120] }
 0x22e   : > { %v1404_v24 = vpop.permute.xlu0 %1403  ;;  %1719 = vrot.lane.b32.xlu1 %v1715_v23, %s6298_s24  ;;  %1717 = vrot.lane.b32.xlu0 %v1713_v45, %s6298_s24  ;;  %1733 = vst [vmem:[#allocation1 + $0x1] ss:$2 sm:$0xff] %v5301_v15  ;;  %s6299_s24 = smov 99  }
 0x22f   : > { %v1408_v27 = vrot.slane %v1404_v24, 4 }
 0x231   : > { %v1413_v30 = vsel %vm221_vm4, %v1408_v27, %v1409_v52  ;;  %v1410_v31 = vsel %vm221_vm4, %v1407_v1, %v1408_v27 }
 0x232   : > { %v1414_v32 = vsel %vm6285_vm13, %v1404_v24, %v1413_v30  ;;  %v1412_v33 = vsel %vm6285_vm13, %v1402_v2, %v1410_v31  ;;  %vm1443_vm13 = vcmask 121856   ;;  %v1491_v40 = vpop.permute.xlu2 %1490 }
 0x233   : > { %1418 = vst.msk [vmem:[#allocation2 + $0x1a8] sm:$0x33] %vm4921_vm2, %v1414_v32  ;;  %v1494_v63 = vrot.slane %v1491_v40, 4 }
 0x234   : > { %1417 = vst [vmem:[#allocation2 + $0x1a0] sm:$0x33] %v1412_v33 }
 0x235   : > { %v1734_v4 = vld.sshfl [vmem:[#allocation1] sm:$0xff pattern:$0x75643120]  ;;  %v1736_v35 = vld.sshfl [vmem:[#allocation1 + $0x8] sm:$0xff pattern:$0x75643120] }
 0x236   : > { %v1436_v12 = vpop.permute.xlu0 %1435  ;;  %1753 = vst [vmem:[#allocation1] ss:$2 sm:$0xff] %v5301_v15  ;;  %1740 = vrot.lane.b32.xlu0 %v1736_v35, %s6299_s24  ;;  %1738 = vrot.lane.b32.xlu2 %v1734_v4, %s6299_s24  ;;  %s6300_s24 = smov 98  }
 0x237   : > { %v1440_v29 = vrot.slane %v1436_v12, 4 }
 0x239   : > { %v1445_v50 = vsel %vm221_vm4, %v1440_v29, %v1441_v37  ;;  %v1442_v41 = vsel %vm221_vm4, %v1439_v57, %v1440_v29 }
 0x23a   : > { %v1446_v51 = vsel %vm1443_vm13, %v1436_v12, %v1445_v50  ;;  %v1444_v55 = vsel %vm1443_vm13, %v1434_v39, %v1442_v41  ;;  %v1513_v0 = vpop.permute.xlu2 %1512 }
 0x23b   : > { %1450 = vst.msk [vmem:[#allocation2 + $0x1a8] sm:$0xcc] %vm4965_vm7, %v1446_v51  ;;  %v1515_v3 = vrot.slane %v1513_v0, 4 }
 0x23c   : > { %1449 = vst [vmem:[#allocation2 + $0x1a0] sm:$0xcc] %v1444_v55 }
 0x23d   : > { %v1754_v58 = vld.sshfl [vmem:[#allocation1] sm:$0xff pattern:$0x75643120]  ;;  %v1756_v59 = vld.sshfl [vmem:[#allocation1 + $0x8] sm:$0xff pattern:$0x75643120]  ;;  %v1518_v17 = vsel %vm269_vm12, %v1513_v0, %v1515_v3 }
 0x23e   : > { %v1467_v60 = vpop.permute.xlu0 %1466  ;;  %1758 = vrot.lane.b32.xlu1 %v1754_v58, %s6300_s24  ;;  %1774 = vst [vmem:[#allocation1 + $0x1] ss:$2 sm:$0xff] %v5301_v15  ;;  %1760 = vrot.lane.b32.xlu2 %v1756_v59, %s6300_s24  ;;  %s6301_s24 = smov 97  }
 0x23f   : > { %v1471_v11 = vrot.slane %v1467_v60, 4  ;;  %1522 = vst.msk [vmem:[#allocation2 + $0x1c8] sm:$0x33] %vm4921_vm2, %v1518_v17 }
 0x241   : > { %v1476_v13 = vsel %vm221_vm4, %v1471_v11, %v1472_v56  ;;  %v1473_v61 = vsel %vm221_vm4, %v1470_v28, %v1471_v11 }
 0x242   : > { %v1477_v8 = vsel %vm1474_vm14, %v1467_v60, %v1476_v13  ;;  %v1475_v9 = vsel %vm1474_vm14, %v1465_v5, %v1473_v61 }
 0x243   : > { %1481 = vst.msk [vmem:[#allocation2 + $0x1b8] sm:$0x33] %vm4921_vm2, %v1477_v8 }
 0x244   : > { %1480 = vst [vmem:[#allocation2 + $0x1b0] sm:$0x33] %v1475_v9 }
 0x245   : > { %v1777_v47 = vld.sshfl [vmem:[#allocation1 + $0x8] sm:$0xff pattern:$0x75643120]  ;;  %v1775_v2 = vld.sshfl [vmem:[#allocation1] sm:$0xff pattern:$0x75643120] }
 0x246   : > { %v1493_v53 = vpop.permute.xlu0 %1492  ;;  %1781 = vrot.lane.b32.xlu1 %v1777_v47, %s6301_s24  ;;  %1779 = vrot.lane.b32.xlu0 %v1775_v2, %s6301_s24  ;;  %1794 = vst [vmem:[#allocation1] ss:$2 sm:$0xff] %v5301_v15  ;;  %v1552_v19 = vpop.permute.xlu2 %1551  ;;  %s6302_s24 = smov 96  }
 0x247   : > { %v1495_v7 = vrot.slane %v1493_v53, 4  ;;  %v1555_v33 = vrot.slane %v1552_v19, 4 }
 0x249   : > { %v1498_v10 = vsel %vm247_vm3, %v1493_v53, %v1495_v7  ;;  %v1496_v62 = vsel %vm221_vm4, %v1494_v63, %v1495_v7 }
 0x24a   : > { %1502 = vst.msk [vmem:[#allocation2 + $0x1b8] sm:$0xcc] %vm4965_vm7, %v1498_v10  ;;  %v1497_v18 = vsel %vm247_vm3, %v1491_v40, %v1496_v62  ;;  %vm6307_vm3 = vcmask 982016  }
 0x24b   : > { %1501 = vst [vmem:[#allocation2 + $0x1b0] sm:$0xcc] %v1497_v18 }
 0x24d   : > { %v1795_v16 = vld.sshfl [vmem:[#allocation1] sm:$0xff pattern:$0x75643120]  ;;  %v1797_v26 = vld.sshfl [vmem:[#allocation1 + $0x8] sm:$0xff pattern:$0x75643120] }
 0x24e   : > { %v1511_v20 = vpop.permute.xlu1 %1510  ;;  %1815 = vst [vmem:[#allocation1 + $0x1] ss:$2 sm:$0xff] %v5301_v15  ;;  %1801 = vrot.lane.b32.xlu0 %v1797_v26, %s6302_s24  ;;  %1799 = vrot.lane.b32.xlu2 %v1795_v16, %s6302_s24  ;;  %s6305_s24 = smov 93  }
 0x24f   : > { %v1514_v21 = vrot.slane %v1511_v20, 4  ;;  %v1575_v22 = vpop.permute.xlu2 %1574 }
 0x250   : > { %v1577_v25 = vrot.slane %v1575_v22, 4 }
 0x251   : > { %v1516_v52 = vsel %vm221_vm4, %v1514_v21, %v1515_v3 }
 0x252   : > { %v1517_v1 = vsel %vm269_vm12, %v1511_v20, %v1516_v52  ;;  %v1580_v30 = vsel %vm333_vm15, %v1575_v22, %v1577_v25  ;;  %vm6308_vm12 = vmmov %vm6307_vm3 }
 0x253   : > { %1521 = vst [vmem:[#allocation2 + $0x1c0] sm:$0x33] %v1517_v1 }
 0x254   : > { %1584 = vst.msk [vmem:[#allocation2 + $0x1d8] sm:$0xcc] %vm4965_vm7, %v1580_v30 }
 0x255   : > { %v1816_v39 = vld.sshfl [vmem:[#allocation1] sm:$0xff pattern:$0x75643120]  ;;  %v1818_v23 = vld.sshfl [vmem:[#allocation1 + $0x8] sm:$0xff pattern:$0x75643120] }
 0x256   : > { %v1534_v45 = vpop.permute.xlu1 %1533  ;;  %v1532_v24 = vpop.permute.xlu0 %1531  ;;  %1820 = vrot.lane.b32.xlu1 %v1816_v39, %s6303_s25  ;;  %1835 = vst [vmem:[#allocation1] ss:$2 sm:$0xff] %v5301_v15  ;;  %1822 = vrot.lane.b32.xlu2 %v1818_v23, %s6303_s25  ;;  %s6304_s25 = smov 94  }
 0x257   : > { %v1536_v27 = vrot.slane %v1534_v45, 4  ;;  %v1535_v42 = vrot.slane %v1532_v24, 4 }
 0x259   : > { %v1539_v31 = vsel %vm290_vm9, %v1534_v45, %v1536_v27  ;;  %v1537_v34 = vsel %vm221_vm4, %v1535_v42, %v1536_v27 }
 0x25a   : > { %1543 = vst.msk [vmem:[#allocation2 + $0x1c8] sm:$0xcc] %vm4965_vm7, %v1539_v31  ;;  %v1538_v32 = vsel %vm290_vm9, %v1532_v24, %v1537_v34 }
 0x25b   : > { %1542 = vst [vmem:[#allocation2 + $0x1c0] sm:$0xcc] %v1538_v32 }
 0x25d   : > { %v1838_v36 = vld.sshfl [vmem:[#allocation1 + $0x8] sm:$0xff pattern:$0x75643120]  ;;  %v1836_v37 = vld.sshfl [vmem:[#allocation1] sm:$0xff pattern:$0x75643120] }
 0x25e   : > { %v1554_v57 = vpop.permute.xlu0 %1553  ;;  %1842 = vrot.lane.b32.xlu1 %v1838_v36, %s6304_s25  ;;  %1840 = vrot.lane.b32.xlu0 %v1836_v37, %s6304_s25  ;;  %1856 = vst [vmem:[#allocation1 + $0x1] ss:$2 sm:$0xff] %v5301_v15  ;;  %s6306_s25 = smov 92  }
 0x25f   : > { %v1556_v38 = vrot.slane %v1554_v57, 4  ;;  %v1614_v5 = vpop.permute.xlu2 %1613 }
 0x260   : > { %v1617_v0 = vrot.slane %v1614_v5, 4 }
 0x261   : > { %v1559_v4 = vsel %vm312_vm10, %v1554_v57, %v1556_v38  ;;  %v1557_v35 = vsel %vm221_vm4, %v1555_v33, %v1556_v38 }
 0x262   : > { %1563 = vst.msk [vmem:[#allocation2 + $0x1d8] sm:$0x33] %vm4921_vm2, %v1559_v4  ;;  %v1558_v12 = vsel %vm312_vm10, %v1552_v19, %v1557_v35  ;;  %v4254_v30 = vld [vmem:[#allocation2 + $0x1c0] sm:$0xf]  ;;  %v4571_v34 = vld [vmem:[#allocation2 + $0x1c4] sm:$0xf] }
 0x263   : > { %1562 = vst [vmem:[#allocation2 + $0x1d0] sm:$0x33] %v1558_v12  ;;  %v4238_v12 = vld [vmem:[#allocation2 + $0x1a0] sm:$0xf] }
 0x265   : > { %v1857_v48 = vld.sshfl [vmem:[#allocation1] sm:$0xff pattern:$0x75643120]  ;;  %v1859_v46 = vld.sshfl [vmem:[#allocation1 + $0x8] sm:$0xff pattern:$0x75643120] }
 0x266   : > { %v1573_v29 = vpop.permute.xlu1 %1572  ;;  %1876 = vst [vmem:[#allocation1] ss:$2 sm:$0xff] %v5301_v15  ;;  %1863 = vrot.lane.b32.xlu0 %v1859_v46, %s6305_s24  ;;  %1861 = vrot.lane.b32.xlu2 %v1857_v48, %s6305_s24  ;;  %s4809_s24 = smov 91   ;;  %v4569_v48 = vld [vmem:[#allocation2 + $0x1ac] sm:$0xf0] }
 0x267   : > { %v1576_v49 = vrot.slane %v1573_v29, 4  ;;  %v1636_v50 = vpop.permute.xlu2 %1635  ;;  %v4567_v46 = vld [vmem:[#allocation2 + $0x1a4] sm:$0xf] }
 0x268   : > { %v1638_v41 = vrot.slane %v1636_v50, 4 }
 0x269   : > { %v1578_v51 = vsel %vm221_vm4, %v1576_v49, %v1577_v25  ;;  %v4239_v49 = vor.u32 %v4569_v48, %v4238_v12 }
 0x26a   : > { %v1579_v55 = vsel %vm333_vm15, %v1573_v29, %v1578_v51  ;;  %v1641_v56 = vsel %vm6292_vm6, %v1636_v50, %v1638_v41  ;;  %v4240_v29 = vld [vmem:[#allocation2 + $0x1b0] sm:$0xf0]  ;;  %v4565_v51 = vld [vmem:[#allocation2 + $0x18c] sm:$0xf0] }
 0x26b   : > { %1583 = vst [vmem:[#allocation2 + $0x1d0] sm:$0xcc] %v1579_v55  ;;  %v4243_v50 = vor.u32 %v4567_v46, %v4240_v29  ;;  %v4563_v55 = vld [vmem:[#allocation2 + $0x184] sm:$0xf] }
 0x26c   : > { %1645 = vst.msk [vmem:[#allocation2 + $0x1f8] sm:$0x33] %vm4921_vm2, %v1641_v56  ;;  %v4224_v56 = vld [vmem:[#allocation2 + $0x190] sm:$0xf0] }
 0x26d   : > { %v1877_v28 = vld.sshfl [vmem:[#allocation1] sm:$0xff pattern:$0x75643120]  ;;  %v1879_v40 = vld.sshfl [vmem:[#allocation1 + $0x8] sm:$0xff pattern:$0x75643120] }
 0x26e   : > { %1881 = vrot.lane.b32.xlu1 %v1877_v28, %s6306_s25  ;;  %1897 = vst [vmem:[#allocation1 + $0x1] ss:$2 sm:$0xff] %v5301_v15  ;;  %1883 = vrot.lane.b32.xlu2 %v1879_v40, %s6306_s25  ;;  %s4810_s25 = smov 90  }
 0x26f   : > { %v1595_v58 = vpop.permute.xlu1 %1594  ;;  %v1593_v59 = vpop.permute.xlu0 %1592 }
 0x270   : > { %v1597_v60 = vrot.slane %v1595_v58, 4  ;;  %v1596_v11 = vrot.slane %v1593_v59, 4 }
 0x272   : > { %v1600_v13 = vsel %vm6289_vm11, %v1595_v58, %v1597_v60  ;;  %v1598_v61 = vsel %vm221_vm4, %v1596_v11, %v1597_v60  ;;  %v4573_v31 = vld [vmem:[#allocation2 + $0x1cc] sm:$0xf0]  ;;  %v4256_v36 = vld [vmem:[#allocation2 + $0x1d0] sm:$0xf0]  ;;  %v4206_v60 = vld [vmem:[#allocation2 + $0x160] sm:$0xf] }
 0x273   : > { %1604 = vst.msk [vmem:[#allocation2 + $0x1e8] sm:$0x33] %vm4921_vm2, %v1600_v13  ;;  %v1599_v8 = vsel %vm6289_vm11, %v1593_v59, %v1598_v61  ;;  %v4255_v4 = vor.u32 %v4573_v31, %v4254_v30  ;;  %v4259_v35 = vor.u32 %v4571_v34, %v4256_v36  ;;  %v4227_v59 = vor.u32 %v4563_v55, %v4224_v56  ;;  %v4561_v11 = vld [vmem:[#allocation2 + $0x16c] sm:$0xf0]  ;;  %v4559_v13 = vld [vmem:[#allocation2 + $0x164] sm:$0xf] }
 0x274   : > { %1603 = vst [vmem:[#allocation2 + $0x1e0] sm:$0x33] %v1599_v8  ;;  %v4208_v61 = vld [vmem:[#allocation2 + $0x170] sm:$0xf0]  ;;  %v4207_v8 = vor.u32 %v4561_v11, %v4206_v60  ;;  %vm6290_vm11 = vcmask 949248  }
 0x275   : > { %v1900_v9 = vld.sshfl [vmem:[#allocation1 + $0x8] sm:$0xff pattern:$0x75643120]  ;;  %v1898_v63 = vld.sshfl [vmem:[#allocation1] sm:$0xff pattern:$0x75643120] }
 0x276   : > { %1904 = vrot.lane.b32.xlu1 %v1900_v9, %s4809_s24  ;;  %1902 = vrot.lane.b32.xlu0 %v1898_v63, %s4809_s24  ;;  %1918 = vst [vmem:[#allocation1] ss:$2 sm:$0xff] %v5301_v15  ;;  %s6309_s24 = smov 74   ;;  %v4211_v9 = vor.u32 %v4559_v13, %v4208_v61  ;;  %v4190_v63 = vld [vmem:[#allocation2 + $0x140] sm:$0xf] }
 0x277   : > { %v1616_v47 = vpop.permute.xlu0 %1615 }
 0x278   : > { %v1618_v2 = vrot.slane %v1616_v47, 4  ;;  %v1675_v30 = vpop.permute.xlu2 %1674 }
 0x279   : > { %v1678_v34 = vrot.slane %v1675_v30, 4 }
 0x27a   : > { %v1621_v53 = vsel %vm6307_vm3, %v1616_v47, %v1618_v2  ;;  %v1619_v3 = vsel %vm221_vm4, %v1617_v0, %v1618_v2  ;;  %vm6310_vm3 = vcmask 965632   ;;  %v4557_v0 = vld [vmem:[#allocation2 + $0x14c] sm:$0xf0]  ;;  %v4555_v47 = vld [vmem:[#allocation2 + $0x144] sm:$0xf] }
 0x27b   : > { %1625 = vst.msk [vmem:[#allocation2 + $0x1e8] sm:$0xcc] %vm4965_vm7, %v1621_v53  ;;  %v1620_v7 = vsel %vm6308_vm12, %v1614_v5, %v1619_v3  ;;  %vm6311_vm12 = vmmov %vm6310_vm3  ;;  %v4192_v2 = vld [vmem:[#allocation2 + $0x150] sm:$0xf0] }
 0x27c   : > { %1624 = vst [vmem:[#allocation2 + $0x1e0] sm:$0xcc] %v1620_v7  ;;  %v4191_v7 = vor.u32 %v4557_v0, %v4190_v63 }
 0x27d   : > { %v1919_v17 = vld.sshfl [vmem:[#allocation1] sm:$0xff pattern:$0x75643120]  ;;  %v1921_v10 = vld.sshfl [vmem:[#allocation1 + $0x8] sm:$0xff pattern:$0x75643120] }
 0x27e   : > { %1940 = vst [vmem:[#allocation1 + $0x1] ss:$2 sm:$0xff] %v5301_v15  ;;  %1925 = vrot.lane.b32.xlu0 %v1921_v10, %s4810_s25  ;;  %1923 = vrot.lane.b32.xlu2 %v1919_v17, %s4810_s25  ;;  %s6313_s25 = smov 71   ;;  %v4195_v17 = vor.u32 %v4555_v47, %v4192_v2  ;;  %v4174_v10 = vld [vmem:[#allocation2 + $0x120] sm:$0xf] }
 0x27f   : > { %v1634_v62 = vpop.permute.xlu1 %1633 }
 0x280   : > { %v1637_v18 = vrot.slane %v1634_v62, 4  ;;  %v1699_v12 = vpop.permute.xlu2 %1698 }
 0x281   : > { %v1701_v46 = vrot.slane %v1699_v12, 4 }
 0x282   : > { %v1639_v19 = vsel %vm221_vm4, %v1637_v18, %v1638_v41  ;;  %v4222_v41 = vld [vmem:[#allocation2 + $0x180] sm:$0xf]  ;;  %v4551_v18 = vld [vmem:[#allocation2 + $0x124] sm:$0xf] }
 0x283   : > { %v1640_v16 = vsel %vm6292_vm6, %v1634_v62, %v1639_v19  ;;  %v4270_v27 = vld [vmem:[#allocation2 + $0x1e0] sm:$0xf]  ;;  %v4575_v42 = vld [vmem:[#allocation2 + $0x1e4] sm:$0xf]  ;;  %v4223_v58 = vor.u32 %v4565_v51, %v4222_v41  ;;  %v4553_v62 = vld [vmem:[#allocation2 + $0x12c] sm:$0xf0]  ;;  %v1705_v41 = vsel %vm6290_vm11, %v1699_v12, %v1701_v46 }
 0x284   : > { %1644 = vst [vmem:[#allocation2 + $0x1f0] sm:$0x33] %v1640_v16  ;;  %v4176_v19 = vld [vmem:[#allocation2 + $0x130] sm:$0xf0]  ;;  %v4158_v16 = vld [vmem:[#allocation2 + $0x100] sm:$0xf] }
 0x285   : > { %v1941_v26 = vld.sshfl [vmem:[#allocation1] sm:$0xff pattern:$0x75643120]  ;;  %v1943_v20 = vld.sshfl [vmem:[#allocation1 + $0x8] sm:$0xff pattern:$0x75643120] }
 0x286   : > { %1945 = vrot.lane.b32.xlu1 %v1941_v26, %s6309_s24  ;;  %1960 = vst [vmem:[#allocation1] ss:$2 sm:$0xff] %v5301_v15  ;;  %1947 = vrot.lane.b32.xlu2 %v1943_v20, %s6309_s24  ;;  %s6314_s24 = smov 70   ;;  %v4175_v26 = vor.u32 %v4553_v62, %v4174_v10  ;;  %v4179_v20 = vor.u32 %v4551_v18, %v4176_v19  ;;  %vm6350_vm6 = vcmask 564224  }
 0x287   : > { %v1657_v21 = vpop.permute.xlu1 %1656  ;;  %v1655_v52 = vpop.permute.xlu0 %1654  ;;  %1709 = vst.msk [vmem:[#allocation2 + $0x208] sm:$0xcc] %vm4965_vm7, %v1705_v41 }
 0x288   : > { %v1659_v1 = vrot.slane %v1657_v21, 4  ;;  %v1658_v22 = vrot.slane %v1655_v52, 4 }
 0x28a   : > { %v1662_v39 = vsel %vm6310_vm3, %v1657_v21, %v1659_v1  ;;  %v1660_v23 = vsel %vm221_vm4, %v1658_v22, %v1659_v1  ;;  %v4549_v21 = vld [vmem:[#allocation2 + $0x10c] sm:$0xf0]  ;;  %v4160_v1 = vld [vmem:[#allocation2 + $0x110] sm:$0xf0]  ;;  %vm6291_vm3 = vcmask 957440  }
 0x28b   : > { %1666 = vst.msk [vmem:[#allocation2 + $0x1f8] sm:$0xcc] %vm4965_vm7, %v1662_v39  ;;  %v1661_v45 = vsel %vm6311_vm12, %v1655_v52, %v1660_v23  ;;  %v4547_v52 = vld [vmem:[#allocation2 + $0x104] sm:$0xf]  ;;  %vm6317_vm12 = vcmask 818176  }
 0x28c   : > { %1665 = vst [vmem:[#allocation2 + $0x1f0] sm:$0xcc] %v1661_v45  ;;  %v4159_v45 = vor.u32 %v4549_v21, %v4158_v16 }
 0x28d   : > { %v1963_v24 = vld.sshfl [vmem:[#allocation1 + $0x8] sm:$0xff pattern:$0x75643120]  ;;  %v1961_v25 = vld.sshfl [vmem:[#allocation1] sm:$0xff pattern:$0x75643120] }
 0x28e   : > { %1967 = vrot.lane.b32.xlu1 %v1963_v24, %s4788_s9  ;;  %1965 = vrot.lane.b32.xlu0 %v1961_v25, %s4788_s9  ;;  %1981 = vst [vmem:[#allocation1 + $0x1] ss:$2 sm:$0xff] %v5301_v15  ;;  %s6312_s9 = smov 72   ;;  %v4163_v24 = vor.u32 %v4547_v52, %v4160_v1 }
 0x293   : > { %v4577_v32 = vld [vmem:[#allocation2 + $0x1ec] sm:$0xf0]  ;;  %v4272_v33 = vld [vmem:[#allocation2 + $0x1f0] sm:$0xf0] }
 0x294   : > { %v4271_v37 = vor.u32 %v4577_v32, %v4270_v27  ;;  %v4275_v57 = vor.u32 %v4575_v42, %v4272_v33  ;;  %v1677_v42 = vpop.permute.xlu0 %1676 }
 0x295   : > { %v1982_v38 = vld.sshfl [vmem:[#allocation1] sm:$0xff pattern:$0x75643120]  ;;  %v1984_v5 = vld.sshfl [vmem:[#allocation1 + $0x8] sm:$0xff pattern:$0x75643120] }
 0x296   : > { %3739 = vmatpush.bf16.msra.mxu1 %v4271_v37  ;;  %3791 = vmatpush.bf16.msrb.mxu0 %v4275_v57  ;;  %2001 = vst [vmem:[#allocation1] ss:$2 sm:$0xff] %v5301_v15  ;;  %v1679_v31 = vrot.slane %v1677_v42, 4 }
 0x297   : > { %1988 = vrot.lane.b32.xlu0 %v1984_v5, %s6312_s9  ;;  %1986 = vrot.lane.b32.xlu2 %v1982_v38, %s6312_s9  ;;  %s6315_s9 = smov 69   ;;  %v5582_v38 = vld [vmem:[%s4864_s19 + $0x2] sm:$0xff] }
 0x298   : > { %v1697_v23 = vpop.permute.xlu1 %1696  ;;  %v1683_v36 = vsel %vm6291_vm3, %v1677_v42, %v1679_v31  ;;  %v1680_v37 = vsel %vm221_vm4, %v1678_v34, %v1679_v31 }
 0x299   : > { %1687 = vst.msk [vmem:[#allocation2 + $0x208] sm:$0x33] %vm4921_vm2, %v1683_v36  ;;  %v1682_v57 = vsel %vm6291_vm3, %v1675_v30, %v1680_v37  ;;  %v1700_v5 = vrot.slane %v1697_v23, 4  ;;  %vm6322_vm3 = vcmask 793600  }
 0x29a   : > { %3740 = vmatpush.bf16.msra.mxu1 %v4255_v4  ;;  %3792 = vmatpush.bf16.msrb.mxu0 %v4259_v35  ;;  %1686 = vst [vmem:[#allocation2 + $0x200] sm:$0x33] %v1682_v57 }
 0x29d   : > { %v2002_v28 = vld.sshfl [vmem:[#allocation1] sm:$0xff pattern:$0x75643120]  ;;  %v2004_v40 = vld.sshfl [vmem:[#allocation1 + $0x8] sm:$0xff pattern:$0x75643120] }
 0x29e   : > { %3741 = vmatpush.bf16.msra.mxu1 %v4239_v49  ;;  %3793 = vmatpush.bf16.msrb.mxu0 %v4243_v50  ;;  %2022 = vst [vmem:[#allocation1 + $0x1] ss:$2 sm:$0xff] %v5301_v15  ;;  %v1702_v50 = vsel %vm221_vm4, %v1700_v5, %v1701_v46 }
 0x29f   : > { %2006 = vrot.lane.b32.xlu1 %v2002_v28, %s6313_s25  ;;  %2008 = vrot.lane.b32.xlu2 %v2004_v40, %s6313_s25  ;;  %s6316_s25 = smov 68   ;;  %v1704_v55 = vsel %vm6290_vm11, %v1697_v23, %v1702_v50  ;;  %vm6320_vm11 = vcmask 809984  }
 0x2a0   : > { %v1720_v32 = vpop.permute.xlu1 %1719  ;;  %v1718_v48 = vpop.permute.xlu0 %1717  ;;  %1708 = vst [vmem:[#allocation2 + $0x200] sm:$0xcc] %v1704_v55 }
 0x2a1   : > { %v1722_v33 = vrot.slane %v1720_v32, 4  ;;  %v1721_v29 = vrot.slane %v1718_v48, 4 }
 0x2a2   : > { %3742 = vmatpush.bf16.msra.mxu1 %v4223_v58  ;;  %3794 = vmatpush.bf16.msrb.mxu0 %v4227_v59  ;;  %v1739_v59 = vpop.permute.xlu2 %1738 }
 0x2a3   : > { %v1723_v51 = vsel %vm221_vm4, %v1721_v29, %v1722_v33  ;;  %v1742_v11 = vrot.slane %v1739_v59, 4 }
 0x2a4   : > { %v1724_v56 = vsel %vm6317_vm12, %v1718_v48, %v1723_v51 }
 0x2a5   : > { %v2025_v53 = vld.sshfl [vmem:[#allocation1 + $0x8] sm:$0xff pattern:$0x75643120]  ;;  %v2023_v3 = vld.sshfl [vmem:[#allocation1] sm:$0xff pattern:$0x75643120] }
 0x2a6   : > { %3743 = vmatpush.bf16.msra.mxu1 %v4207_v8  ;;  %3795 = vmatpush.bf16.msrb.mxu0 %v4211_v9  ;;  %2042 = vst [vmem:[#allocation1] ss:$2 sm:$0xff] %v5301_v15 }
 0x2a7   : > { %2029 = vrot.lane.b32.xlu1 %v2025_v53, %s6314_s24  ;;  %2027 = vrot.lane.b32.xlu0 %v2023_v3, %s6314_s24  ;;  %s6318_s24 = smov 67   ;;  %1728 = vst [vmem:[#allocation2 + $0x210] sm:$0x33] %v1724_v56 }
 0x2a8   : > { %v1741_v58 = vpop.permute.xlu0 %1740 }
 0x2a9   : > { %v1743_v60 = vrot.slane %v1741_v58, 4 }
 0x2aa   : > { %3744 = vmatpush.bf16.msra.mxu1 %v4191_v7  ;;  %3796 = vmatpush.bf16.msrb.mxu0 %v4195_v17  ;;  %v1761_v17 = vpop.permute.xlu2 %1760 }
 0x2ab   : > { %v1746_v8 = vsel %vm6320_vm11, %v1741_v58, %v1743_v60  ;;  %v1744_v9 = vsel %vm221_vm4, %v1742_v11, %v1743_v60  ;;  %v1763_v62 = vrot.slane %v1761_v17, 4 }
 0x2ac   : > { %1750 = vst.msk [vmem:[#allocation2 + $0x218] sm:$0xcc] %vm4965_vm7, %v1746_v8 }
 0x2ad   : > { %v2045_v22 = vld.sshfl [vmem:[#allocation1 + $0x8] sm:$0xff pattern:$0x75643120]  ;;  %v2043_v39 = vld.sshfl [vmem:[#allocation1] sm:$0xff pattern:$0x75643120] }
 0x2ae   : > { %3745 = vmatpush.bf16.msra.mxu1 %v4175_v26  ;;  %3797 = vmatpush.bf16.msrb.mxu0 %v4179_v20  ;;  %2063 = vst [vmem:[#allocation1 + $0x1] ss:$2 sm:$0xff] %v5301_v15 }
 0x2af   : > { %2049 = vrot.lane.b32.xlu1 %v2045_v22, %s6315_s9  ;;  %2047 = vrot.lane.b32.xlu2 %v2043_v39, %s6315_s9  ;;  %s6319_s9 = smov 66  }
 0x2b0   : > { %v1759_v49 = vpop.permute.xlu1 %1758 }
 0x2b1   : > { %v1762_v53 = vrot.slane %v1759_v49, 4 }
 0x2b2   : > { %3746 = vmatpush.bf16.msra.mxu1 %v4159_v45  ;;  %3798 = vmatpush.bf16.msrb.mxu0 %v4163_v24  ;;  %v1800_v23 = vpop.permute.xlu2 %1799 }
 0x2b3   : > { %v1764_v16 = vsel %vm221_vm4, %v1762_v53, %v1763_v62  ;;  %v1803_v24 = vrot.slane %v1800_v23, 4 }
 0x2b5   : > { %v2066_v25 = vld.sshfl [vmem:[#allocation1 + $0x8] sm:$0xff pattern:$0x75643120]  ;;  %v2064_v27 = vld.sshfl [vmem:[#allocation1] sm:$0xff pattern:$0x75643120] }
 0x2b6   : > { %2070 = vrot.lane.b32.xlu0 %v2066_v25, %s6316_s25  ;;  %2083 = vst [vmem:[#allocation1] ss:$2 sm:$0xff] %v5301_v15  ;;  %v1725_v15 = vsel %vm6317_vm12, %v1720_v32, %v1722_v33  ;;  %vm6321_vm12 = vmmov %vm6320_vm11  ;;  %vm6323_vm11 = vcmask 801792  }
 0x2b7   : > { %2068 = vrot.lane.b32.xlu2 %v2064_v27, %s6316_s25  ;;  %1729 = vst.msk [vmem:[#allocation2 + $0x218] sm:$0x33] %vm4921_vm2, %v1725_v15  ;;  %v1745_v63 = vsel %vm6321_vm12, %v1739_v59, %v1744_v9  ;;  %s4811_s25 = smov 65   ;;  %v1766_v26 = vsel %vm6323_vm11, %v1761_v17, %v1763_v62  ;;  %vm6325_vm12 = vcmask 793600  }
 0x2b8   : > { %v1782_v13 = vpop.permute.xlu1 %1781  ;;  %1749 = vst [vmem:[#allocation2 + $0x210] sm:$0xcc] %v1745_v63  ;;  %v1780_v10 = vpop.permute.xlu0 %1779 }
 0x2b9   : > { %v1784_v61 = vrot.slane %v1782_v13, 4  ;;  %v1783_v18 = vrot.slane %v1780_v10, 4  ;;  %1770 = vst.msk [vmem:[#allocation2 + $0x228] sm:$0x33] %vm4921_vm2, %v1766_v26 }
 0x2ba   : > { %v1823_v15 = vpop.permute.xlu2 %1822 }
 0x2bb   : > { %v1787_v0 = vsel %vm6322_vm3, %v1782_v13, %v1784_v61  ;;  %v1785_v20 = vsel %vm221_vm4, %v1783_v18, %v1784_v61  ;;  %vm6324_vm3 = vmmov %vm6323_vm11  ;;  %vm6327_vm11 = vcmask 785408  }
 0x2bc   : > { %1791 = vst.msk [vmem:[#allocation2 + $0x228] sm:$0xcc] %vm4965_vm7, %v1787_v0  ;;  %v1765_v21 = vsel %vm6324_vm3, %v1759_v49, %v1764_v16  ;;  %v1786_v52 = vsel %vm6325_vm12, %v1780_v10, %v1785_v20  ;;  %vm6328_vm3 = vmmov %vm6327_vm11  ;;  %vm6329_vm12 = vcmask 769024  }
 0x2bd   : > { %v2086_v4 = vld.sshfl [vmem:[#allocation1 + $0x8] sm:$0xff pattern:$0x75643120]  ;;  %v2084_v35 = vld.sshfl [vmem:[#allocation1] sm:$0xff pattern:$0x75643120] }
 0x2be   : > { %2090 = vrot.lane.b32.xlu1 %v2086_v4, %s6318_s24  ;;  %2088 = vrot.lane.b32.xlu0 %v2084_v35, %s6318_s24  ;;  %2104 = vst [vmem:[#allocation1 + $0x1] ss:$2 sm:$0xff] %v5582_v38  ;;  %s4812_s24 = smov 64   ;;  %v1825_v4 = vrot.slane %v1823_v15, 4 }
 0x2bf   : > { %1769 = vst [vmem:[#allocation2 + $0x220] sm:$0x33] %v1765_v21 }
 0x2c0   : > { %1790 = vst [vmem:[#allocation2 + $0x220] sm:$0xcc] %v1786_v52  ;;  %v1802_v39 = vpop.permute.xlu0 %1801 }
 0x2c1   : > { %v1804_v45 = vrot.slane %v1802_v39, 4 }
 0x2c2   : > { %v1862_v56 = vpop.permute.xlu2 %1861 }
 0x2c3   : > { %v1807_v42 = vsel %vm6327_vm11, %v1802_v39, %v1804_v45  ;;  %v1805_v30 = vsel %vm221_vm4, %v1803_v24, %v1804_v45  ;;  %vm6332_vm11 = vcmask 777216  }
 0x2c4   : > { %1811 = vst.msk [vmem:[#allocation2 + $0x238] sm:$0x33] %vm4921_vm2, %v1807_v42  ;;  %v1806_v31 = vsel %vm6328_vm3, %v1800_v23, %v1805_v30  ;;  %v1828_v46 = vsel %vm6332_vm11, %v1823_v15, %v1825_v4  ;;  %vm6333_vm3 = vmmov %vm6332_vm11  ;;  %vm1909_vm11 = vcmask 744448  }
 0x2c5   : > { %v2105_v28 = vld.sshfl [vmem:[#allocation1] sm:$0xff pattern:$0x75643120]  ;;  %v2107_v40 = vld.sshfl [vmem:[#allocation1 + $0x8] sm:$0xff pattern:$0x75643120] }
 0x2c6   : > { %2124 = vst [vmem:[#allocation1] ss:$2 sm:$0xff] %v5582_v38  ;;  %2111 = vrot.lane.b32.xlu0 %v2107_v40, %s6319_s9  ;;  %2109 = vrot.lane.b32.xlu2 %v2105_v28, %s6319_s9  ;;  %s6326_s9 = smov 48   ;;  %v1865_v40 = vrot.slane %v1862_v56, 4 }
 0x2c7   : > { %1810 = vst [vmem:[#allocation2 + $0x230] sm:$0x33] %v1806_v31 }
 0x2c8   : > { %v1821_v19 = vpop.permute.xlu1 %1820  ;;  %1832 = vst.msk [vmem:[#allocation2 + $0x238] sm:$0xcc] %vm4965_vm7, %v1828_v46 }
 0x2c9   : > { %v1824_v36 = vrot.slane %v1821_v19, 4 }
 0x2ca   : > { %v1884_v0 = vpop.permute.xlu2 %1883 }
 0x2cb   : > { %v1826_v48 = vsel %vm221_vm4, %v1824_v36, %v1825_v4 }
 0x2cc   : > { %v1827_v49 = vsel %vm6333_vm3, %v1821_v19, %v1826_v48  ;;  %vm6335_vm3 = vcmask 760832  }
 0x2cd   : > { %v2125_v47 = vld.sshfl [vmem:[#allocation1] sm:$0xff pattern:$0x75643120]  ;;  %v2127_v2 = vld.sshfl [vmem:[#allocation1 + $0x8] sm:$0xff pattern:$0x75643120] }
 0x2ce   : > { %2129 = vrot.lane.b32.xlu1 %v2125_v47, %s4811_s25  ;;  %2146 = vst [vmem:[#allocation1 + $0x1] ss:$2 sm:$0xff] %v5582_v38  ;;  %2131 = vrot.lane.b32.xlu2 %v2127_v2, %s4811_s25  ;;  %s6330_s25 = smov 47   ;;  %v1886_v2 = vrot.slane %v1884_v0, 4 }
 0x2cf   : > { %1831 = vst [vmem:[#allocation2 + $0x230] sm:$0xcc] %v1827_v49 }
 0x2d0   : > { %v1843_v25 = vpop.permute.xlu1 %1842  ;;  %v1841_v5 = vpop.permute.xlu0 %1840 }
 0x2d1   : > { %v1845_v27 = vrot.slane %v1843_v25, 4  ;;  %v1844_v35 = vrot.slane %v1841_v5, 4 }
 0x2d3   : > { %v1848_v34 = vsel %vm6329_vm12, %v1843_v25, %v1845_v27  ;;  %v1846_v29 = vsel %vm221_vm4, %v1844_v35, %v1845_v27 }
 0x2d4   : > { %1852 = vst.msk [vmem:[#allocation2 + $0x248] sm:$0x33] %vm4921_vm2, %v1848_v34  ;;  %v1847_v50 = vsel %vm6329_vm12, %v1841_v5, %v1846_v29  ;;  %vm6336_vm12 = vmmov %vm6335_vm3 }
 0x2d5   : > { %v2149_v3 = vld.sshfl [vmem:[#allocation1 + $0x8] sm:$0xff pattern:$0x75643120]  ;;  %v2147_v7 = vld.sshfl [vmem:[#allocation1] sm:$0xff pattern:$0x75643120] }
 0x2d6   : > { %2153 = vrot.lane.b32.xlu1 %v2149_v3, %s4812_s24  ;;  %2151 = vrot.lane.b32.xlu0 %v2147_v7, %s4812_s24  ;;  %2167 = vst [vmem:[#allocation1] ss:$2 sm:$0xff] %v5582_v38  ;;  %s6331_s24 = smov 46  }
 0x2d7   : > { %1851 = vst [vmem:[#allocation2 + $0x240] sm:$0x33] %v1847_v50 }
 0x2d8   : > { %v1864_v55 = vpop.permute.xlu0 %1863  ;;  %v1924_v20 = vpop.permute.xlu2 %1923 }
 0x2d9   : > { %v1866_v28 = vrot.slane %v1864_v55, 4  ;;  %v1927_v52 = vrot.slane %v1924_v20, 4 }
 0x2db   : > { %v1869_v60 = vsel %vm6335_vm3, %v1864_v55, %v1866_v28  ;;  %v1867_v11 = vsel %vm221_vm4, %v1865_v40, %v1866_v28  ;;  %vm6338_vm3 = vcmask 752640  }
 0x2dc   : > { %1873 = vst.msk [vmem:[#allocation2 + $0x248] sm:$0xcc] %vm4965_vm7, %v1869_v60  ;;  %v1868_v13 = vsel %vm6336_vm12, %v1862_v56, %v1867_v11  ;;  %v1889_v17 = vsel %vm6338_vm3, %v1884_v0, %v1886_v2  ;;  %vm6339_vm12 = vmmov %vm6338_vm3  ;;  %vm1930_vm3 = vcmask 736256  }
 0x2dd   : > { %v2168_v1 = vld.sshfl [vmem:[#allocation1] sm:$0xff pattern:$0x75643120]  ;;  %v2170_v22 = vld.sshfl [vmem:[#allocation1 + $0x8] sm:$0xff pattern:$0x75643120] }
 0x2de   : > { %2172 = vrot.lane.b32.xlu1 %v2168_v1, %s6326_s9  ;;  %2188 = vst [vmem:[#allocation1 + $0x1] ss:$2 sm:$0xff] %v5582_v38  ;;  %2174 = vrot.lane.b32.xlu2 %v2170_v22, %s6326_s9  ;;  %s6334_s9 = smov 45  }
 0x2df   : > { %1872 = vst [vmem:[#allocation2 + $0x240] sm:$0xcc] %v1868_v13 }
 0x2e0   : > { %v1882_v12 = vpop.permute.xlu1 %1881  ;;  %1893 = vst.msk [vmem:[#allocation2 + $0x258] sm:$0x33] %vm4921_vm2, %v1889_v17  ;;  %v1948_v30 = vpop.permute.xlu2 %1947 }
 0x2e1   : > { %v1885_v8 = vrot.slane %v1882_v12, 4  ;;  %v1950_v34 = vrot.slane %v1948_v30, 4 }
 0x2e3   : > { %v1887_v7 = vsel %vm221_vm4, %v1885_v8, %v1886_v2 }
 0x2e4   : > { %v1888_v62 = vsel %vm6339_vm12, %v1882_v12, %v1887_v7  ;;  %vm6343_vm12 = vcmask 605184  }
 0x2e5   : > { %v2191_v32 = vld.sshfl [vmem:[#allocation1 + $0x8] sm:$0xff pattern:$0x75643120]  ;;  %v2189_v33 = vld.sshfl [vmem:[#allocation1] sm:$0xff pattern:$0x75643120]  ;;  %v1953_v36 = vsel %vm6343_vm12, %v1948_v30, %v1950_v34 }
 0x2e6   : > { %2195 = vrot.lane.b32.xlu1 %v2191_v32, %s6330_s25  ;;  %2193 = vrot.lane.b32.xlu0 %v2189_v33, %s6330_s25  ;;  %2208 = vst [vmem:[#allocation1] ss:$2 sm:$0xff] %v5582_v38  ;;  %s6337_s25 = smov 44  }
 0x2e7   : > { %1892 = vst [vmem:[#allocation2 + $0x250] sm:$0x33] %v1888_v62 }
 0x2e8   : > { %v1905_v58 = vpop.permute.xlu1 %1904  ;;  %v1903_v47 = vpop.permute.xlu0 %1902  ;;  %1957 = vst.msk [vmem:[#allocation2 + $0x268] sm:$0xcc] %vm4965_vm7, %v1953_v36 }
 0x2e9   : > { %v1907_v59 = vrot.slane %v1905_v58, 4  ;;  %v1906_v53 = vrot.slane %v1903_v47, 4 }
 0x2eb   : > { %v1911_v61 = vsel %vm1909_vm11, %v1905_v58, %v1907_v59  ;;  %v1908_v10 = vsel %vm221_vm4, %v1906_v53, %v1907_v59 }
 0x2ec   : > { %1915 = vst.msk [vmem:[#allocation2 + $0x258] sm:$0xcc] %vm4965_vm7, %v1911_v61  ;;  %v1910_v18 = vsel %vm1909_vm11, %v1903_v47, %v1908_v10  ;;  %vm6341_vm11 = vcmask 596992  }
 0x2ed   : > { %v2211_v37 = vld.sshfl [vmem:[#allocation1 + $0x8] sm:$0xff pattern:$0x75643120]  ;;  %v2209_v57 = vld.sshfl [vmem:[#allocation1] sm:$0xff pattern:$0x75643120] }
 0x2ee   : > { %2215 = vrot.lane.b32.xlu0 %v2211_v37, %s6331_s24  ;;  %2229 = vst [vmem:[#allocation1 + $0x1] ss:$2 sm:$0xff] %v5582_v38  ;;  %2213 = vrot.lane.b32.xlu2 %v2209_v57, %s6331_s24  ;;  %s6340_s24 = smov 43  }
 0x2ef   : > { %1914 = vst [vmem:[#allocation2 + $0x250] sm:$0xcc] %v1910_v18 }
 0x2f0   : > { %v1926_v26 = vpop.permute.xlu0 %1925 }
 0x2f1   : > { %v1928_v21 = vrot.slane %v1926_v26, 4  ;;  %v1987_v48 = vpop.permute.xlu2 %1986 }
 0x2f2   : > { %v1990_v29 = vrot.slane %v1987_v48, 4 }
 0x2f3   : > { %v1932_v39 = vsel %vm1930_vm3, %v1926_v26, %v1928_v21  ;;  %v1929_v23 = vsel %vm221_vm4, %v1927_v52, %v1928_v21 }
 0x2f4   : > { %1936 = vst.msk [vmem:[#allocation2 + $0x268] sm:$0x33] %vm4921_vm2, %v1932_v39  ;;  %v1931_v45 = vsel %vm1930_vm3, %v1924_v20, %v1929_v23  ;;  %vm6344_vm3 = vmmov %vm6343_vm12  ;;  %vm6345_vm12 = vcmask 588800  }
 0x2f5   : > { %v2230_v41 = vld.sshfl [vmem:[#allocation1] sm:$0xff pattern:$0x75643120]  ;;  %v2232_v51 = vld.sshfl [vmem:[#allocation1 + $0x8] sm:$0xff pattern:$0x75643120] }
 0x2f6   : > { %2234 = vrot.lane.b32.xlu1 %v2230_v41, %s6334_s9  ;;  %2249 = vst [vmem:[#allocation1] ss:$2 sm:$0xff] %v5582_v38  ;;  %2236 = vrot.lane.b32.xlu2 %v2232_v51, %s6334_s9  ;;  %s6342_s9 = smov 42  }
 0x2f7   : > { %1935 = vst [vmem:[#allocation2 + $0x260] sm:$0x33] %v1931_v45 }
 0x2f8   : > { %v1946_v3 = vpop.permute.xlu1 %1945 }
 0x2f9   : > { %v1949_v25 = vrot.slane %v1946_v3, 4  ;;  %v2009_v58 = vpop.permute.xlu2 %2008 }
 0x2fa   : > { %v2011_v11 = vrot.slane %v2009_v58, 4 }
 0x2fb   : > { %v1951_v33 = vsel %vm221_vm4, %v1949_v25, %v1950_v34 }
 0x2fc   : > { %v1952_v15 = vsel %vm6344_vm3, %v1946_v3, %v1951_v33  ;;  %vm6346_vm3 = vmmov %vm6345_vm12 }
 0x2fd   : > { %v2252_v9 = vld.sshfl [vmem:[#allocation1 + $0x8] sm:$0xff pattern:$0x75643120]  ;;  %v2250_v63 = vld.sshfl [vmem:[#allocation1] sm:$0xff pattern:$0x75643120] }
 0x2fe   : > { %2256 = vrot.lane.b32.xlu1 %v2252_v9, %s6337_s25  ;;  %2254 = vrot.lane.b32.xlu0 %v2250_v63, %s6337_s25  ;;  %2270 = vst [vmem:[#allocation1 + $0x1] ss:$2 sm:$0xff] %v5582_v38 }
 0x2ff   : > { %1956 = vst [vmem:[#allocation2 + $0x260] sm:$0xcc] %v1952_v15 }
 0x300   : > { %v1968_v1 = vpop.permute.xlu1 %1967  ;;  %v1966_v31 = vpop.permute.xlu0 %1965 }
 0x301   : > { %v1970_v22 = vrot.slane %v1968_v1, 4  ;;  %v1969_v32 = vrot.slane %v1966_v31, 4 }
 0x303   : > { %v1973_v24 = vsel %vm6341_vm11, %v1968_v1, %v1970_v22  ;;  %v1971_v37 = vsel %vm221_vm4, %v1969_v32, %v1970_v22 }
 0x304   : > { %1977 = vst.msk [vmem:[#allocation2 + $0x278] sm:$0x33] %vm4921_vm2, %v1973_v24  ;;  %v1972_v5 = vsel %vm6341_vm11, %v1966_v31, %v1971_v37  ;;  %vm6347_vm11 = vcmask 572416  }
 0x305   : > { %v2273_v19 = vld.sshfl [vmem:[#allocation1 + $0x8] sm:$0xff pattern:$0x75643120]  ;;  %v2271_v16 = vld.sshfl [vmem:[#allocation1] sm:$0xff pattern:$0x75643120] }
 0x306   : > { %2277 = vrot.lane.b32.xlu0 %v2273_v19, %s6340_s24  ;;  %2290 = vst [vmem:[#allocation1] ss:$2 sm:$0xff] %v5582_v38  ;;  %2275 = vrot.lane.b32.xlu2 %v2271_v16, %s6340_s24  ;;  %s4813_s24 = smov 13  }
 0x307   : > { %1976 = vst [vmem:[#allocation2 + $0x270] sm:$0x33] %v1972_v5 }
 0x309   : > { %v1989_v12 = vpop.permute.xlu0 %1988  ;;  %v2048_v3 = vpop.permute.xlu2 %2047 }
 0x30a   : > { %v1991_v46 = vrot.slane %v1989_v12, 4  ;;  %v2051_v10 = vrot.slane %v2048_v3, 4 }
 0x30c   : > { %v1994_v49 = vsel %vm6345_vm12, %v1989_v12, %v1991_v46  ;;  %v1992_v50 = vsel %vm221_vm4, %v1990_v29, %v1991_v46  ;;  %vm6348_vm12 = vcmask 580608  }
 0x30d   : > { %v2291_v27 = vld.sshfl [vmem:[#allocation1] sm:$0xff pattern:$0x75643120]  ;;  %v2293_v42 = vld.sshfl [vmem:[#allocation1 + $0x8] sm:$0xff pattern:$0x75643120]  ;;  %v1993_v51 = vsel %vm6346_vm3, %v1987_v48, %v1992_v50  ;;  %v2014_v8 = vsel %vm6348_vm12, %v2009_v58, %v2011_v11  ;;  %vm6349_vm3 = vmmov %vm6348_vm12 }
 0x30e   : > { %2295 = vrot.lane.b32.xlu1 %v2291_v27, %s6342_s9  ;;  %2311 = vst [vmem:[#allocation1 + $0x1] ss:$2 sm:$0xff] %v5582_v38  ;;  %2297 = vrot.lane.b32.xlu2 %v2293_v42, %s6342_s9  ;;  %vm6351_vm12 = vmmov %vm6350_vm6  ;;  %s4814_s9 = smov 12  }
 0x30f   : > { %1998 = vst.msk [vmem:[#allocation2 + $0x278] sm:$0xcc] %vm4965_vm7, %v1994_v49 }
 0x310   : > { %1997 = vst [vmem:[#allocation2 + $0x270] sm:$0xcc] %v1993_v51 }
 0x311   : > { %v2007_v57 = vpop.permute.xlu1 %2006  ;;  %2018 = vst.msk [vmem:[#allocation2 + $0x288] sm:$0x33] %vm4921_vm2, %v2014_v8  ;;  %v2069_v20 = vpop.permute.xlu2 %2068 }
 0x312   : > { %v2010_v28 = vrot.slane %v2007_v57, 4  ;;  %v2072_v1 = vrot.slane %v2069_v20, 4 }
 0x314   : > { %v2012_v61 = vsel %vm221_vm4, %v2010_v28, %v2011_v11 }
 0x315   : > { %v2314_v4 = vld.sshfl [vmem:[#allocation1 + $0x8] sm:$0xff pattern:$0x75643120]  ;;  %v2312_v35 = vld.sshfl [vmem:[#allocation1] sm:$0xff pattern:$0x75643120]  ;;  %v2013_v0 = vsel %vm6349_vm3, %v2007_v57, %v2012_v61 }
 0x316   : > { %2318 = vrot.lane.b32.xlu1 %v2314_v4, %s4805_s16  ;;  %2316 = vrot.lane.b32.xlu0 %v2312_v35, %s4805_s16  ;;  %2331 = vst [vmem:[#allocation1] ss:$2 sm:$0xff] %v5582_v38  ;;  %vm6352_vm3 = vcmask 556032  }
 0x317   : > { %2017 = vst [vmem:[#allocation2 + $0x280] sm:$0x33] %v2013_v0 }
 0x319   : > { %v2030_v41 = vpop.permute.xlu1 %2029  ;;  %v2028_v59 = vpop.permute.xlu0 %2027 }
 0x31a   : > { %v2032_v55 = vrot.slane %v2030_v41, 4  ;;  %v2031_v13 = vrot.slane %v2028_v59, 4 }
 0x31c   : > { %v2035_v56 = vsel %vm6347_vm11, %v2030_v41, %v2032_v55  ;;  %v2033_v9 = vsel %vm221_vm4, %v2031_v13, %v2032_v55 }
 0x31d   : > { %2039 = vst.msk [vmem:[#allocation2 + $0x288] sm:$0xcc] %vm4965_vm7, %v2035_v56  ;;  %v5691_v40 = vld.sshfl [vmem:[#allocation1] sm:$0xff pattern:$0x75643120]  ;;  %v2034_v47 = vsel %vm6347_vm11, %v2028_v59, %v2033_v9  ;;  %vm6354_vm11 = vcmask 547840  }
 0x31e   : > { %v5693_v60 = vld.sshfl [vmem:[#allocation1 + $0x8] sm:$0xff pattern:$0x75643120]  ;;  %2038 = vst [vmem:[#allocation2 + $0x280] sm:$0xcc] %v2034_v47 }
 0x31f   : > { %2352 = vst [vmem:[#allocation1 + $0x1] ss:$2 sm:$0xff] %v5582_v38 }
 0x320   : > { %v2110_v31 = vpop.permute.xlu2 %2109 }
 0x321   : > { %v2050_v63 = vpop.permute.xlu1 %2049  ;;  %v2113_v33 = vrot.slane %v2110_v31, 4 }
 0x322   : > { %v2052_v2 = vrot.slane %v2050_v63, 4 }
 0x324   : > { %v2055_v53 = vsel %vm6350_vm6, %v2050_v63, %v2052_v2  ;;  %v2053_v18 = vsel %vm221_vm4, %v2051_v10, %v2052_v2  ;;  %vm6353_vm6 = vmmov %vm6352_vm3 }
 0x325   : > { %2059 = vst.msk [vmem:[#allocation2 + $0x298] sm:$0x33] %vm4921_vm2, %v2055_v53  ;;  %v2054_v16 = vsel %vm6351_vm12, %v2048_v3, %v2053_v18  ;;  %vm6355_vm12 = vmmov %vm6354_vm11 }
 0x326   : > { %v5706_v7 = vld.sshfl [vmem:[#allocation1] sm:$0xff pattern:$0x75643120]  ;;  %v5708_v17 = vld.sshfl [vmem:[#allocation1 + $0x8] sm:$0xff pattern:$0x75643120] }
 0x327   : > { %2373 = vst [vmem:[#allocation1] ss:$2 sm:$0xff] %v5582_v38 }
 0x328   : > { %v2071_v62 = vpop.permute.xlu0 %2070  ;;  %2058 = vst [vmem:[#allocation2 + $0x290] sm:$0x33] %v2054_v16  ;;  %v2132_v4 = vpop.permute.xlu2 %2131 }
 0x329   : > { %v2073_v19 = vrot.slane %v2071_v62, 4  ;;  %v2134_v48 = vrot.slane %v2132_v4, 4 }
 0x32b   : > { %v2076_v26 = vsel %vm6352_vm3, %v2071_v62, %v2073_v19  ;;  %v2074_v45 = vsel %vm221_vm4, %v2072_v1, %v2073_v19  ;;  %vm6356_vm3 = vcmask 539648  }
 0x32c   : > { %2080 = vst.msk [vmem:[#allocation2 + $0x298] sm:$0xcc] %vm4965_vm7, %v2076_v26  ;;  %v2075_v25 = vsel %vm6353_vm6, %v2069_v20, %v2074_v45  ;;  %vm6357_vm6 = vmmov %vm6356_vm3 }
 0x32d   : > { %2079 = vst [vmem:[#allocation2 + $0x290] sm:$0xcc] %v2075_v25 }
 0x32e   : > { %v5716_v21 = vld.sshfl [vmem:[#allocation1] sm:$0xff pattern:$0x75643120]  ;;  %v5718_v52 = vld.sshfl [vmem:[#allocation1 + $0x8] sm:$0xff pattern:$0x75643120] }
 0x32f   : > { %2396 = vst [vmem:[#allocation1 + $0x1] ss:$2 sm:$0xff] %v5582_v38 }
 0x330   : > { %v2091_v22 = vpop.permute.xlu1 %2090  ;;  %v2089_v39 = vpop.permute.xlu0 %2088 }
 0x331   : > { %v2093_v23 = vrot.slane %v2091_v22, 4  ;;  %v2092_v24 = vrot.slane %v2089_v39, 4 }
 0x333   : > { %v2096_v27 = vsel %vm6354_vm11, %v2091_v22, %v2093_v23  ;;  %v2094_v42 = vsel %vm221_vm4, %v2092_v24, %v2093_v23  ;;  %vm2136_vm11 = vcmask 531456  }
 0x334   : > { %2100 = vst.msk [vmem:[#allocation2 + $0x2a8] sm:$0x33] %vm4921_vm2, %v2096_v27  ;;  %v2095_v30 = vsel %vm6355_vm12, %v2089_v39, %v2094_v42  ;;  %v2138_v49 = vsel %vm2136_vm11, %v2132_v4, %v2134_v48  ;;  %vm2158_vm12 = vcmask 523264  }
 0x335   : > { %2099 = vst [vmem:[#allocation2 + $0x2a0] sm:$0x33] %v2095_v30 }
 0x336   : > { %v5728_v34 = vld.sshfl [vmem:[#allocation1] sm:$0xff pattern:$0x75643120]  ;;  %v5730_v32 = vld.sshfl [vmem:[#allocation1 + $0x8] sm:$0xff pattern:$0x75643120] }
 0x337   : > { %2426 = vst [vmem:[#allocation1] ss:$2 sm:$0xff] %v5582_v38 }
 0x338   : > { %v2112_v36 = vpop.permute.xlu0 %2111  ;;  %2142 = vst.msk [vmem:[#allocation2 + $0x2b8] sm:$0x33] %vm4921_vm2, %v2138_v49  ;;  %v2175_v51 = vpop.permute.xlu2 %2174 }
 0x339   : > { %v2114_v37 = vrot.slane %v2112_v36, 4  ;;  %v2177_v28 = vrot.slane %v2175_v51, 4 }
 0x33b   : > { %v2117_v57 = vsel %vm6356_vm3, %v2112_v36, %v2114_v37  ;;  %v2115_v15 = vsel %vm221_vm4, %v2113_v33, %v2114_v37  ;;  %vm6358_vm3 = vcmask 392192  }
 0x33c   : > { %2121 = vst.msk [vmem:[#allocation2 + $0x2a8] sm:$0xcc] %vm4965_vm7, %v2117_v57  ;;  %v2116_v5 = vsel %vm6357_vm6, %v2110_v31, %v2115_v15  ;;  %v2180_v61 = vsel %vm6358_vm3, %v2175_v51, %v2177_v28  ;;  %vm6359_vm6 = vmmov %vm6358_vm3  ;;  %vm6366_vm3 = vcmask 171008  }
 0x33d   : > { %2120 = vst [vmem:[#allocation2 + $0x2a0] sm:$0xcc] %v2116_v5 }
 0x33e   : > { %v2430_v35 = vld.sshfl [vmem:[#allocation1] sm:$0xff pattern:$0x75643120]  ;;  %v2432_v12 = vld.sshfl [vmem:[#allocation1 + $0x8] sm:$0xff pattern:$0x75643120] }
 0x33f   : > { %2436 = vrot.lane.b32.xlu1 %v2430_v35, %s4760_s27  ;;  %2457 = vst [vmem:[#allocation1 + $0x1] ss:$2 sm:$0xff] %v5582_v38  ;;  %2438 = vrot.lane.b32.xlu2 %v2432_v12, %s4760_s27 }
 0x340   : > { %v2130_v46 = vpop.permute.xlu1 %2129  ;;  %2184 = vst.msk [vmem:[#allocation2 + $0x2c8] sm:$0x33] %vm4921_vm2, %v2180_v61 }
 0x341   : > { %v2133_v29 = vrot.slane %v2130_v46, 4 }
 0x343   : > { %v2135_v50 = vsel %vm221_vm4, %v2133_v29, %v2134_v48 }
 0x344   : > { %v2137_v41 = vsel %vm2136_vm11, %v2130_v46, %v2135_v50  ;;  %vm6360_vm11 = vcmask 367616  }
 0x345   : > { %2141 = vst [vmem:[#allocation2 + $0x2b0] sm:$0x33] %v2137_v41 }
 0x346   : > { %v2461_v55 = vld.sshfl [vmem:[#allocation1] sm:$0xff pattern:$0x75643120]  ;;  %v2463_v56 = vld.sshfl [vmem:[#allocation1 + $0x8] sm:$0xff pattern:$0x75643120] }
 0x347   : > { %2467 = vrot.lane.b32.xlu0 %v2461_v55, %s4763_s30  ;;  %2469 = vrot.lane.b32.xlu1 %v2463_v56, %s4763_s30  ;;  %2487 = vst [vmem:[#allocation1] ss:$2 sm:$0xff] %v5582_v38  ;;  %v5795_v55 = vld [vmem:[%s6201_s1] sm:$0xff] }
 0x348   : > { %v2154_v58 = vpop.permute.xlu1 %2153  ;;  %v2152_v59 = vpop.permute.xlu0 %2151 }
 0x349   : > { %v2156_v11 = vrot.slane %v2154_v58, 4  ;;  %v2155_v13 = vrot.slane %v2152_v59, 4  ;;  %v2214_v0 = vpop.permute.xlu2 %2213 }
 0x34a   : > { %v2217_v30 = vrot.slane %v2214_v0, 4 }
 0x34b   : > { %v2160_v8 = vsel %vm2158_vm12, %v2154_v58, %v2156_v11  ;;  %v2157_v9 = vsel %vm221_vm4, %v2155_v13, %v2156_v11  ;;  %v3089_v58 = vunpack.c.l.b16 %v5795_v55 }
 0x34c   : > { %2164 = vst.msk [vmem:[#allocation2 + $0x2b8] sm:$0xcc] %vm4965_vm7, %v2160_v8  ;;  %v2159_v63 = vsel %vm2158_vm12, %v2152_v59, %v2157_v9  ;;  %vm6362_vm12 = vmmov %vm6360_vm11 }
 0x34d   : > { %2163 = vst [vmem:[#allocation2 + $0x2b0] sm:$0xcc] %v2159_v63  ;;  %v5798_v13 = vpack.c.b16 %v3089_v58, %v3089_v58 }
 0x34e   : > { %v5753_v47 = vld.sshfl [vmem:[#allocation1] sm:$0xff pattern:$0x75643120]  ;;  %v5755_v2 = vld.sshfl [vmem:[#allocation1 + $0x8] sm:$0xff pattern:$0x75643120] }
 0x34f   : > { %2518 = vst [vmem:[#allocation1 + $0x1] ss:$2 sm:$0xff] %v5582_v38  ;;  %3734 = vmatmul.bf16.vlgmr.msra.gmra.mxu0 %v5798_v13 }
 0x350   : > { %v2173_v53 = vpop.permute.xlu1 %2172 }
 0x351   : > { %v2176_v3 = vrot.slane %v2173_v53, 4  ;;  %v2237_v16 = vpop.permute.xlu2 %2236 }
 0x352   : > { %v2239_v26 = vrot.slane %v2237_v16, 4 }
 0x353   : > { %v2178_v10 = vsel %vm221_vm4, %v2176_v3, %v2177_v28 }
 0x354   : > { %v2179_v62 = vsel %vm6359_vm6, %v2173_v53, %v2178_v10  ;;  %v2242_v23 = vsel %vm6360_vm11, %v2237_v16, %v2239_v26  ;;  %vm6367_vm6 = vcmask 162816   ;;  %vm6368_vm11 = vcmask 138240  }
 0x355   : > { %2183 = vst [vmem:[#allocation2 + $0x2c0] sm:$0x33] %v2179_v62 }
 0x356   : > { %v5760_v18 = vld.sshfl [vmem:[#allocation1] sm:$0xff pattern:$0x75643120]  ;;  %v5762_v19 = vld.sshfl [vmem:[#allocation1 + $0x8] sm:$0xff pattern:$0x75643120] }
 0x357   : > { %2548 = vst [vmem:[#allocation1] ss:$2 sm:$0xff] %v5582_v38 }
 0x358   : > { %v2196_v20 = vpop.permute.xlu1 %2195  ;;  %v2194_v1 = vpop.permute.xlu0 %2193  ;;  %2246 = vst.msk [vmem:[#allocation2 + $0x2d8] sm:$0xcc] %vm4965_vm7, %v2242_v23 }
 0x359   : > { %v2198_v22 = vrot.slane %v2196_v20, 4  ;;  %v2197_v39 = vrot.slane %v2194_v1, 4 }
 0x35b   : > { %v2201_v45 = vsel %vm978_vm5, %v2196_v20, %v2198_v22  ;;  %v2199_v24 = vsel %vm221_vm4, %v2197_v39, %v2198_v22 }
 0x35c   : > { %2205 = vst.msk [vmem:[#allocation2 + $0x2c8] sm:$0xcc] %vm4965_vm7, %v2201_v45  ;;  %v2200_v25 = vsel %vm978_vm5, %v2194_v1, %v2199_v24  ;;  %vm6361_vm5 = vcmask 343040   ;;  %v5820_v24 = vld [vmem:[%s4864_s19 + $0x4] sm:$0xff] }
 0x35d   : > { %2204 = vst [vmem:[#allocation2 + $0x2c0] sm:$0xcc] %v2200_v25 }
 0x35e   : > { %v2554_v27 = vld.sshfl [vmem:[#allocation1 + $0x8] sm:$0xff pattern:$0x75643120]  ;;  %v2552_v42 = vld.sshfl [vmem:[#allocation1] sm:$0xff pattern:$0x75643120] }
 0x35f   : > { %2560 = vrot.lane.b32.xlu0 %v2554_v27, %s4775_s22  ;;  %2579 = vst [vmem:[#allocation1 + $0x1] ss:$2 sm:$0xff] %v5582_v38  ;;  %2558 = vrot.lane.b32.xlu2 %v2552_v42, %s4775_s22 }
 0x360   : > { %v2216_v31 = vpop.permute.xlu0 %2215  ;;  %v2276_v33 = vpop.permute.xlu2 %2275 }
 0x361   : > { %v2218_v36 = vrot.slane %v2216_v31, 4  ;;  %v2279_v53 = vrot.slane %v2276_v33, 4 }
 0x363   : > { %v2221_v37 = vsel %vm1000_vm1, %v2216_v31, %v2218_v36  ;;  %v2219_v57 = vsel %vm221_vm4, %v2217_v30, %v2218_v36 }
 0x364   : > { %2225 = vst.msk [vmem:[#allocation2 + $0x2d8] sm:$0x33] %vm4921_vm2, %v2221_v37  ;;  %v2220_v15 = vsel %vm1000_vm1, %v2214_v0, %v2219_v57  ;;  %vm6364_vm1 = vcmask 334848  }
 0x365   : > { %2224 = vst [vmem:[#allocation2 + $0x2d0] sm:$0x33] %v2220_v15 }
 0x366   : > { %v2583_v5 = vld.sshfl [vmem:[#allocation1] sm:$0xff pattern:$0x75643120]  ;;  %v2585_v4 = vld.sshfl [vmem:[#allocation1 + $0x8] sm:$0xff pattern:$0x75643120] }
 0x367   : > { %2589 = vrot.lane.b32.xlu1 %v2583_v5, %s4779_s18  ;;  %2609 = vst [vmem:[#allocation1] ss:$2 sm:$0xff] %v5582_v38  ;;  %2591 = vrot.lane.b32.xlu2 %v2585_v4, %s4779_s18  ;;  %v4390_v4 = vld [vmem:[#allocation2 + $0x2c8] sm:$0xf] }
 0x368   : > { %v2235_v35 = vpop.permute.xlu1 %2234  ;;  %v2298_v12 = vpop.permute.xlu2 %2297 }
 0x369   : > { %v2238_v48 = vrot.slane %v2235_v35, 4  ;;  %v2300_v46 = vrot.slane %v2298_v12, 4 }
 0x36b   : > { %v2240_v29 = vsel %vm221_vm4, %v2238_v48, %v2239_v26  ;;  %v2303_v49 = vsel %vm6361_vm5, %v2298_v12, %v2300_v46 }
 0x36c   : > { %v2241_v50 = vsel %vm6362_vm12, %v2235_v35, %v2240_v29  ;;  %2307 = vst.msk [vmem:[#allocation2 + $0x2f8] sm:$0x33] %vm4921_vm2, %v2303_v49  ;;  %v4606_v35 = vld [vmem:[#allocation2 + $0x2d4] sm:$0xf0]  ;;  %vm2690_vm12 = vcmask 105472  }
 0x36d   : > { %2245 = vst [vmem:[#allocation2 + $0x2d0] sm:$0xcc] %v2241_v50  ;;  %v4603_v50 = vld [vmem:[#allocation2 + $0x2c4] sm:$0xf] }
 0x36e   : > { %v2613_v41 = vld.sshfl [vmem:[#allocation1] sm:$0xff pattern:$0x75643120]  ;;  %v2615_v51 = vld.sshfl [vmem:[#allocation1 + $0x8] sm:$0xff pattern:$0x75643120] }
 0x36f   : > { %2619 = vrot.lane.b32.xlu0 %v2613_v41, %s4783_s17  ;;  %2621 = vrot.lane.b32.xlu1 %v2615_v51, %s4783_s17  ;;  %2640 = vst [vmem:[#allocation1 + $0x1] ss:$2 sm:$0xff] %v5582_v38 }
 0x370   : > { %v2257_v56 = vpop.permute.xlu1 %2256  ;;  %v2255_v28 = vpop.permute.xlu0 %2254 }
 0x371   : > { %v2259_v59 = vrot.slane %v2257_v56, 4  ;;  %v2258_v11 = vrot.slane %v2255_v28, 4 }
 0x373   : > { %v2262_v61 = vsel %vm1043_vm0, %v2257_v56, %v2259_v59  ;;  %v2260_v8 = vsel %vm221_vm4, %v2258_v11, %v2259_v59  ;;  %v4374_v11 = vld [vmem:[#allocation2 + $0x2a8] sm:$0xf] }
 0x374   : > { %2266 = vst.msk [vmem:[#allocation2 + $0x2e8] sm:$0x33] %vm4921_vm2, %v2262_v61  ;;  %v2261_v9 = vsel %vm1043_vm0, %v2255_v28, %v2260_v8  ;;  %vm6363_vm0 = vmmov %vm6361_vm5  ;;  %v4605_v49 = vld [vmem:[#allocation2 + $0x2cc] sm:$0xf0]  ;;  %v4384_v28 = vld [vmem:[#allocation2 + $0x2d0] sm:$0xf0]  ;;  %v4391_v61 = vor.u32 %v4606_v35, %v4390_v4 }
 0x375   : > { %2265 = vst [vmem:[#allocation2 + $0x2e0] sm:$0x33] %v2261_v9  ;;  %v4336_v4 = vld [vmem:[#allocation2 + $0x270] sm:$0xf0]  ;;  %vm6369_vm5 = vcmask 130048  }
 0x376   : > { %v2646_v63 = vld.sshfl [vmem:[#allocation1 + $0x8] sm:$0xff pattern:$0x75643120]  ;;  %v2644_v0 = vld.sshfl [vmem:[#allocation1] sm:$0xff pattern:$0x75643120] }
 0x377   : > { %2652 = vrot.lane.b32.xlu0 %v2646_v63, %s4787_s10  ;;  %2670 = vst [vmem:[#allocation1] ss:$2 sm:$0xff] %v5582_v38  ;;  %2650 = vrot.lane.b32.xlu2 %v2644_v0, %s4787_s10  ;;  %v4387_v0 = vor.u32 %v4603_v50, %v4384_v28  ;;  %v4320_v28 = vld [vmem:[#allocation2 + $0x250] sm:$0xf0] }
 0x378   : > { %v2278_v3 = vpop.permute.xlu0 %2277 }
 0x379   : > { %v2280_v10 = vrot.slane %v2278_v3, 4 }
 0x37b   : > { %v2283_v62 = vsel %vm1064_vm8, %v2278_v3, %v2280_v10  ;;  %v2281_v16 = vsel %vm221_vm4, %v2279_v53, %v2280_v10  ;;  %v4602_v53 = vld [vmem:[#allocation2 + $0x2b4] sm:$0xf0]  ;;  %v4366_v3 = vld [vmem:[#allocation2 + $0x2a0] sm:$0xf]  ;;  %v4601_v10 = vld [vmem:[#allocation2 + $0x2ac] sm:$0xf0] }
 0x37c   : > { %2287 = vst.msk [vmem:[#allocation2 + $0x2e8] sm:$0xcc] %vm4965_vm7, %v2283_v62  ;;  %v2282_v26 = vsel %vm1064_vm8, %v2276_v33, %v2281_v16  ;;  %vm6365_vm8 = vmmov %vm6364_vm1  ;;  %v4599_v62 = vld [vmem:[#allocation2 + $0x2a4] sm:$0xf]  ;;  %v4368_v16 = vld [vmem:[#allocation2 + $0x2b0] sm:$0xf0] }
 0x37d   : > { %2286 = vst [vmem:[#allocation2 + $0x2e0] sm:$0xcc] %v2282_v26  ;;  %v4375_v26 = vor.u32 %v4602_v53, %v4374_v11  ;;  %v4310_v11 = vld [vmem:[#allocation2 + $0x228] sm:$0xf]  ;;  %v4304_v53 = vld [vmem:[#allocation2 + $0x230] sm:$0xf0] }
 0x37e   : > { %v2676_v20 = vld.sshfl [vmem:[#allocation1 + $0x8] sm:$0xff pattern:$0x75643120]  ;;  %v2674_v1 = vld.sshfl [vmem:[#allocation1] sm:$0xff pattern:$0x75643120] }
 0x37f   : > { %2682 = vrot.lane.b32.xlu1 %v2676_v20, %s4813_s24  ;;  %2680 = vrot.lane.b32.xlu0 %v2674_v1, %s4813_s24  ;;  %2702 = vst [vmem:[#allocation1 + $0x1] ss:$2 sm:$0xff] %v5582_v38  ;;  %v4367_v20 = vor.u32 %v4601_v10, %v4366_v3  ;;  %v4371_v1 = vor.u32 %v4599_v62, %v4368_v16  ;;  %v4294_v10 = vld [vmem:[#allocation2 + $0x208] sm:$0xf]  ;;  %v4582_v62 = vld [vmem:[#allocation2 + $0x214] sm:$0xf0] }
 0x380   : > { %v2296_v22 = vpop.permute.xlu1 %2295  ;;  %v4286_v16 = vld [vmem:[#allocation2 + $0x200] sm:$0xf] }
 0x381   : > { %v2299_v39 = vrot.slane %v2296_v22, 4 }
 0x383   : > { %v2301_v23 = vsel %vm221_vm4, %v2299_v39, %v2300_v46  ;;  %v4406_v5 = vld [vmem:[#allocation2 + $0x2e8] sm:$0xf]  ;;  %v4382_v46 = vld [vmem:[#allocation2 + $0x2c0] sm:$0xf]  ;;  %v4598_v39 = vld [vmem:[#allocation2 + $0x294] sm:$0xf0] }
 0x384   : > { %v2302_v45 = vsel %vm6363_vm0, %v2296_v22, %v2301_v23  ;;  %v4398_v12 = vld [vmem:[#allocation2 + $0x2e0] sm:$0xf]  ;;  %v4607_v48 = vld [vmem:[#allocation2 + $0x2e4] sm:$0xf]  ;;  %v4383_v63 = vor.u32 %v4605_v49, %v4382_v46  ;;  %v4358_v22 = vld [vmem:[#allocation2 + $0x288] sm:$0xf] }
 0x385   : > { %2306 = vst [vmem:[#allocation2 + $0x2f0] sm:$0x33] %v2302_v45  ;;  %v4350_v23 = vld [vmem:[#allocation2 + $0x280] sm:$0xf]  ;;  %v4597_v45 = vld [vmem:[#allocation2 + $0x28c] sm:$0xf0] }
 0x386   : > { %v2708_v25 = vld.sshfl [vmem:[#allocation1 + $0x8] sm:$0xff pattern:$0x75643120]  ;;  %v2706_v27 = vld.sshfl [vmem:[#allocation1] sm:$0xff pattern:$0x75643120] }
 0x387   : > { %2714 = vrot.lane.b32.xlu0 %v2708_v25, %s4814_s9  ;;  %2732 = vst [vmem:[#allocation1] ss:$2 sm:$0xff] %v5820_v24  ;;  %2712 = vrot.lane.b32.xlu2 %v2706_v27, %s4814_s9  ;;  %v4595_v25 = vld [vmem:[#allocation2 + $0x284] sm:$0xf]  ;;  %v4352_v27 = vld [vmem:[#allocation2 + $0x290] sm:$0xf0] }
 0x388   : > { %v2319_v42 = vpop.permute.xlu1 %2318  ;;  %v2317_v38 = vpop.permute.xlu0 %2316  ;;  %v4590_v46 = vld [vmem:[#allocation2 + $0x254] sm:$0xf0]  ;;  %v4589_v49 = vld [vmem:[#allocation2 + $0x24c] sm:$0xf0]  ;;  %vm2722_vm0 = vcmask 97280  }
 0x389   : > { %v2321_v30 = vrot.slane %v2319_v42, 4  ;;  %v2320_v31 = vrot.slane %v2317_v38, 4 }
 0x38b   : > { %v2324_v33 = vsel %vm6364_vm1, %v2319_v42, %v2321_v30  ;;  %v2322_v36 = vsel %vm221_vm4, %v2320_v31, %v2321_v30  ;;  %v4359_v42 = vor.u32 %v4598_v39, %v4358_v22  ;;  %v4351_v31 = vor.u32 %v4597_v45, %v4350_v23  ;;  %v4288_v22 = vld [vmem:[#allocation2 + $0x210] sm:$0xf0] }
 0x38c   : > { %2328 = vst.msk [vmem:[#allocation2 + $0x2f8] sm:$0xcc] %vm4965_vm7, %v2324_v33  ;;  %v2323_v37 = vsel %vm6365_vm8, %v2317_v38, %v2322_v36  ;;  %v4355_v33 = vor.u32 %v4595_v25, %v4352_v27  ;;  %v4342_v36 = vld [vmem:[#allocation2 + $0x268] sm:$0xf]  ;;  %v4295_v27 = vor.u32 %v4582_v62, %v4294_v10  ;;  %vm6374_vm1 = vcmask 982016  }
 0x38d   : > { %2327 = vst [vmem:[#allocation2 + $0x2f0] sm:$0xcc] %v2323_v37  ;;  %v4594_v37 = vld [vmem:[#allocation2 + $0x274] sm:$0xf0]  ;;  %vm6375_vm8 = vmmov %vm6374_vm1 }
 0x38e   : > { %v2733_v57 = vld.sshfl [vmem:[#allocation1] sm:$0xff pattern:$0x75643120]  ;;  %v2735_v15 = vld.sshfl [vmem:[#allocation1 + $0x8] sm:$0xff pattern:$0x75643120]  ;;  %v4343_v35 = vor.u32 %v4594_v37, %v4342_v36 }
 0x38f   : > { %2737 = vrot.lane.b32.xlu1 %v2733_v57, %s4759_s26  ;;  %2753 = vst [vmem:[#allocation1 + $0x1] ss:$2 sm:$0xff] %v5820_v24  ;;  %2739 = vrot.lane.b32.xlu2 %v2735_v15, %s4759_s26  ;;  %v4334_v57 = vld [vmem:[#allocation2 + $0x260] sm:$0xf]  ;;  %v4593_v15 = vld [vmem:[#allocation2 + $0x26c] sm:$0xf0] }
 0x390   : > { %v5844_v25 = vld.sshfl [vmem:[#allocation1 + $0x10] sm:$0xff pattern:$0x75643120]  ;;  %v2546_v36 = vld [vmem:[%s4864_s19 + $0xa] sm:$0x3]  ;;  %s4815_s26 = smov 115  }
 0x393   : > { %v4610_v29 = vld [vmem:[#allocation2 + $0x2f4] sm:$0xf0] }
 0x394   : > { %v4407_v41 = vor.u32 %v4610_v29, %v4406_v5  ;;  %v4609_v51 = vld [vmem:[#allocation2 + $0x2ec] sm:$0xf0]  ;;  %v4400_v56 = vld [vmem:[#allocation2 + $0x2f0] sm:$0xf0]  ;;  %v4591_v5 = vld [vmem:[#allocation2 + $0x264] sm:$0xf] }
 0x395   : > { %v4399_v58 = vor.u32 %v4609_v51, %v4398_v12  ;;  %v4403_v59 = vor.u32 %v4607_v48, %v4400_v56  ;;  %v4326_v12 = vld [vmem:[#allocation2 + $0x248] sm:$0xf]  ;;  %v4335_v48 = vor.u32 %v4593_v15, %v4334_v57  ;;  %v4318_v29 = vld [vmem:[#allocation2 + $0x240] sm:$0xf]  ;;  %v4587_v56 = vld [vmem:[#allocation2 + $0x244] sm:$0xf] }
 0x396   : > { %3856 = vmatpush.bf16.msra.mxu0 %v4407_v41  ;;  %v2756_v8 = vld.sshfl [vmem:[#allocation1 + $0x8] sm:$0xff pattern:$0x75643120]  ;;  %v2754_v9 = vld.sshfl [vmem:[#allocation1] sm:$0xff pattern:$0x75643120]  ;;  %v4339_v41 = vor.u32 %v4591_v5, %v4336_v4 }
 0x397   : > { %3752 = vmatpush.bf16.msra.mxu2 %v4399_v58  ;;  %3804 = vmatpush.bf16.msrb.mxu1 %v4403_v59  ;;  %2773 = vst [vmem:[#allocation1] ss:$2 sm:$0xff] %v5820_v24  ;;  %v4327_v58 = vor.u32 %v4590_v46, %v4326_v12  ;;  %v4319_v59 = vor.u32 %v4589_v49, %v4318_v29 }
 0x398   : > { %2760 = vrot.lane.b32.xlu1 %v2756_v8, %s4761_s28  ;;  %2758 = vrot.lane.b32.xlu0 %v2754_v9, %s4761_s28  ;;  %v4323_v8 = vor.u32 %v4587_v56, %v4320_v28  ;;  %v4302_v9 = vld [vmem:[#allocation2 + $0x220] sm:$0xf]  ;;  %s4816_s28 = smov 114  }
 0x399   : > { %v5852_v37 = vpop.permute.xlu2 %2438 }
 0x39a   : > { %3857 = vmatpush.bf16.msra.mxu0 %v4391_v61  ;;  %v4586_v61 = vld [vmem:[#allocation2 + $0x234] sm:$0xf0]  ;;  %v2443_v5 = vrot.slane %v5852_v37, 4 }
 0x39b   : > { %3753 = vmatpush.bf16.msra.mxu2 %v4383_v63  ;;  %3805 = vmatpush.bf16.msrb.mxu1 %v4387_v0  ;;  %v4585_v63 = vld [vmem:[#allocation2 + $0x22c] sm:$0xf0]  ;;  %v4583_v0 = vld [vmem:[#allocation2 + $0x224] sm:$0xf]  ;;  %v4311_v3 = vor.u32 %v4586_v61, %v4310_v11 }
 0x39c   : > { %v4307_v23 = vor.u32 %v4583_v0, %v4304_v53 }
 0x39e   : > { %3858 = vmatpush.bf16.msra.mxu0 %v4375_v26  ;;  %v2774_v38 = vld.sshfl [vmem:[#allocation1] sm:$0xff pattern:$0x75643120]  ;;  %v2776_v30 = vld.sshfl [vmem:[#allocation1 + $0x8] sm:$0xff pattern:$0x75643120]  ;;  %v4303_v26 = vor.u32 %v4585_v63, %v4302_v9 }
 0x39f   : > { %3754 = vmatpush.bf16.msra.mxu2 %v4367_v20  ;;  %3806 = vmatpush.bf16.msrb.mxu1 %v4371_v1  ;;  %2794 = vst [vmem:[#allocation1 + $0x1] ss:$2 sm:$0xff] %v5820_v24  ;;  %v4581_v20 = vld [vmem:[#allocation2 + $0x20c] sm:$0xf0]  ;;  %v4579_v1 = vld [vmem:[#allocation2 + $0x204] sm:$0xf] }
 0x3a0   : > { %2778 = vrot.lane.b32.xlu1 %v2774_v38, %s4762_s29  ;;  %2780 = vrot.lane.b32.xlu2 %v2776_v30, %s4762_s29  ;;  %v4287_v38 = vor.u32 %v4581_v20, %v4286_v16  ;;  %v4291_v30 = vor.u32 %v4579_v1, %v4288_v22  ;;  %s4817_s29 = smov 38  }
 0x3a2   : > { %3859 = vmatpush.bf16.msra.mxu0 %v4359_v42  ;;  %v2515_v42 = vld [vmem:[%s4864_s19 + $0xa] sm:$0x3] }
 0x3a3   : > { %3755 = vmatpush.bf16.msra.mxu2 %v4351_v31  ;;  %3807 = vmatpush.bf16.msrb.mxu1 %v4355_v33  ;;  %2521 = vst [vmem:[#allocation1 + $0x11] ss:$2 sm:$0xff] %v2515_v42 }
 0x3a6   : > { %v2795_v50 = vld.sshfl [vmem:[#allocation1] sm:$0xff pattern:$0x75643120]  ;;  %3860 = vmatpush.bf16.msra.mxu0 %v4343_v35  ;;  %v2797_v51 = vld.sshfl [vmem:[#allocation1 + $0x8] sm:$0xff pattern:$0x75643120] }
 0x3a7   : > { %2799 = vrot.lane.b32.xlu0 %v2795_v50, %s4764_s4  ;;  %3756 = vmatpush.bf16.msra.mxu2 %v4335_v48  ;;  %2814 = vst [vmem:[#allocation1] ss:$2 sm:$0xff] %v5820_v24  ;;  %v2576_v50 = vld [vmem:[%s4864_s19 + $0xa] sm:$0x3] }
 0x3a8   : > { %3808 = vmatpush.bf16.msrb.mxu1 %v4339_v41  ;;  %2801 = vrot.lane.b32.xlu1 %v2797_v51, %s4764_s4  ;;  %s4818_s4 = smov 39  }
 0x3aa   : > { %3861 = vmatpush.bf16.msra.mxu0 %v4327_v58  ;;  %v5854_v15 = vld.sshfl [vmem:[#allocation1 + $0x10] sm:$0xff pattern:$0x75643120] }
 0x3ab   : > { %3757 = vmatpush.bf16.msra.mxu2 %v4319_v59  ;;  %2551 = vst [vmem:[#allocation1 + $0x10] ss:$2 sm:$0xff] %v2546_v36  ;;  %v2699_v36 = vld [vmem:[%s4864_s19 + $0xa] sm:$0x3] }
 0x3ac   : > { %3809 = vmatpush.bf16.msrb.mxu1 %v4323_v8  ;;  %v2607_v8 = vld [vmem:[%s4864_s19 + $0xa] sm:$0x3] }
 0x3ae   : > { %v2817_v39 = vld.sshfl [vmem:[#allocation1 + $0x8] sm:$0xff pattern:$0x75643120]  ;;  %3862 = vmatpush.bf16.msra.mxu0 %v4311_v3  ;;  %v2815_v45 = vld.sshfl [vmem:[#allocation1] sm:$0xff pattern:$0x75643120] }
 0x3af   : > { %2821 = vrot.lane.b32.xlu0 %v2817_v39, %s4765_s5  ;;  %3758 = vmatpush.bf16.msra.mxu2 %v4303_v26  ;;  %2835 = vst [vmem:[#allocation1 + $0x1] ss:$2 sm:$0xff] %v5820_v24  ;;  %v2637_v3 = vld [vmem:[%s4864_s19 + $0xa] sm:$0x3] }
 0x3b0   : > { %3810 = vmatpush.bf16.msrb.mxu1 %v4307_v23  ;;  %2819 = vrot.lane.b32.xlu2 %v2815_v45, %s4765_s5  ;;  %v2668_v23 = vld [vmem:[%s4864_s19 + $0xa] sm:$0x3]  ;;  %s6370_s19 = smov 22  }
 0x3b1   : > { %v2437_v57 = vpop.permute.xlu1 %2436 }
 0x3b2   : > { %3863 = vmatpush.bf16.msra.mxu0 %v4295_v27  ;;  %v2442_v4 = vrot.slane %v2437_v57, 4  ;;  %v5867_v51 = vld.sshfl [vmem:[#allocation1 + $0x10] sm:$0xff pattern:$0x75643120] }
 0x3b3   : > { %3759 = vmatpush.bf16.msra.mxu2 %v4287_v38  ;;  %2582 = vst [vmem:[#allocation1 + $0x11] ss:$2 sm:$0xff] %v2576_v50 }
 0x3b4   : > { %3811 = vmatpush.bf16.msrb.mxu1 %v4291_v30  ;;  %v2445_v35 = vsel %vm221_vm4, %v2442_v4, %v2443_v5 }
 0x3b5   : > { %v2446_v12 = vsel %vm6366_vm3, %v2437_v57, %v2445_v35  ;;  %vm6376_vm3 = vcmask 957440  }
 0x3b6   : > { %v2836_v31 = vld.sshfl [vmem:[#allocation1] sm:$0xff pattern:$0x75643120]  ;;  %v2838_v33 = vld.sshfl [vmem:[#allocation1 + $0x8] sm:$0xff pattern:$0x75643120] }
 0x3b7   : > { %2840 = vrot.lane.b32.xlu1 %v2836_v31, %s4766_s6  ;;  %2855 = vst [vmem:[#allocation1] ss:$2 sm:$0xff] %v5820_v24 }
 0x3b8   : > { %2842 = vrot.lane.b32.xlu2 %v2838_v33, %s4766_s6  ;;  %2451 = vst [vmem:[#allocation2 + $0x320] sm:$0x33] %v2446_v12 }
 0x3b9   : > { %v2468_v29 = vpop.permute.xlu0 %2467  ;;  %v5865_v41 = vpop.permute.xlu1 %2469 }
 0x3ba   : > { %v2473_v49 = vrot.slane %v2468_v29, 4  ;;  %v2474_v56 = vrot.slane %v5865_v41, 4  ;;  %v2559_v58 = vpop.permute.xlu2 %2558  ;;  %v5878_v9 = vld.sshfl [vmem:[#allocation1 + $0x10] sm:$0xff pattern:$0x75643120] }
 0x3bb   : > { %2612 = vst [vmem:[#allocation1 + $0x10] ss:$2 sm:$0xff] %v2607_v8  ;;  %v2564_v10 = vrot.slane %v2559_v58, 4 }
 0x3bc   : > { %v2476_v28 = vsel %vm221_vm4, %v2473_v49, %v2474_v56 }
 0x3bd   : > { %v2477_v59 = vsel %vm6367_vm6, %v2468_v29, %v2476_v28 }
 0x3be   : > { %v2858_v48 = vld.sshfl [vmem:[#allocation1 + $0x8] sm:$0xff pattern:$0x75643120]  ;;  %v2856_v46 = vld.sshfl [vmem:[#allocation1] sm:$0xff pattern:$0x75643120] }
 0x3bf   : > { %2862 = vrot.lane.b32.xlu0 %v2858_v48, %s6297_s20  ;;  %2876 = vst [vmem:[#allocation1 + $0x1] ss:$2 sm:$0xff] %v5820_v24 }
 0x3c0   : > { %2860 = vrot.lane.b32.xlu2 %v2856_v46, %s6297_s20  ;;  %2482 = vst [vmem:[#allocation2 + $0x320] sm:$0xcc] %v2477_v59 }
 0x3c2   : > { %v5880_v53 = vpop.permute.xlu2 %2591  ;;  %v5886_v62 = vld.sshfl [vmem:[#allocation1 + $0x10] sm:$0xff pattern:$0x75643120] }
 0x3c3   : > { %2643 = vst [vmem:[#allocation1 + $0x11] ss:$2 sm:$0xff] %v2637_v3  ;;  %v2596_v45 = vrot.slane %v5880_v53, 4 }
 0x3c6   : > { %v2877_v11 = vld.sshfl [vmem:[#allocation1] sm:$0xff pattern:$0x75643120]  ;;  %v2879_v61 = vld.sshfl [vmem:[#allocation1 + $0x8] sm:$0xff pattern:$0x75643120] }
 0x3c7   : > { %2881 = vrot.lane.b32.xlu1 %v2877_v11, %s4807_s21  ;;  %2896 = vst [vmem:[#allocation1] ss:$2 sm:$0xff] %v5820_v24 }
 0x3c8   : > { %2883 = vrot.lane.b32.xlu2 %v2879_v61, %s4807_s21 }
 0x3ca   : > { %v5900_v42 = vld.sshfl [vmem:[#allocation1 + $0x10] sm:$0xff pattern:$0x75643120] }
 0x3cb   : > { %2673 = vst [vmem:[#allocation1 + $0x10] ss:$2 sm:$0xff] %v2668_v23 }
 0x3ce   : > { %v2899_v63 = vld.sshfl [vmem:[#allocation1 + $0x8] sm:$0xff pattern:$0x75643120]  ;;  %v2897_v0 = vld.sshfl [vmem:[#allocation1] sm:$0xff pattern:$0x75643120] }
 0x3cf   : > { %2903 = vrot.lane.b32.xlu1 %v2899_v63, %s4808_s23  ;;  %2901 = vrot.lane.b32.xlu0 %v2897_v0, %s4808_s23  ;;  %2917 = vst [vmem:[#allocation1 + $0x1] ss:$2 sm:$0xff] %v5820_v24 }
 0x3d1   : > { %v5888_v16 = vpop.permute.xlu0 %2560  ;;  %v2651_v27 = vpop.permute.xlu2 %2650 }
 0x3d2   : > { %v2565_v26 = vrot.slane %v5888_v16, 4  ;;  %v2678_v57 = vld.sshfl [vmem:[#allocation1 + $0x10] sm:$0xff pattern:$0x75643120]  ;;  %v2656_v49 = vrot.slane %v2651_v27, 4 }
 0x3d3   : > { %2705 = vst [vmem:[#allocation1 + $0x11] ss:$2 sm:$0xff] %v2699_v36 }
 0x3d4   : > { %v2567_v20 = vsel %vm221_vm4, %v2564_v10, %v2565_v26 }
 0x3d5   : > { %v2568_v1 = vsel %vm6368_vm11, %v2559_v58, %v2567_v20  ;;  %vm6378_vm11 = vcmask 965632  }
 0x3d6   : > { %v2920_v22 = vld.sshfl [vmem:[#allocation1 + $0x8] sm:$0xff pattern:$0x75643120]  ;;  %v2918_v39 = vld.sshfl [vmem:[#allocation1] sm:$0xff pattern:$0x75643120] }
 0x3d7   : > { %2528 = vrot.lane.b32.xlu1 %v5760_v18, %s4771_s11  ;;  %2924 = vrot.lane.b32.xlu0 %v2920_v22, %s4815_s26  ;;  %2938 = vst [vmem:[#allocation1] ss:$2 sm:$0xff] %v5820_v24 }
 0x3d8   : > { %2922 = vrot.lane.b32.xlu2 %v2918_v39, %s4815_s26  ;;  %2573 = vst [vmem:[#allocation2 + $0x340] sm:$0x33] %v2568_v1 }
 0x3d9   : > { %v2590_v38 = vpop.permute.xlu1 %2589 }
 0x3da   : > { %v2595_v30 = vrot.slane %v2590_v38, 4  ;;  %v2710_v23 = vld.sshfl [vmem:[#allocation1 + $0x10] sm:$0xff pattern:$0x75643120] }
 0x3dc   : > { %v2598_v18 = vsel %vm221_vm4, %v2595_v30, %v2596_v45 }
 0x3dd   : > { %v2599_v31 = vsel %vm6369_vm5, %v2590_v38, %v2598_v18  ;;  %vm6379_vm5 = vmmov %vm6378_vm11 }
 0x3de   : > { %v2941_v33 = vld.sshfl [vmem:[#allocation1 + $0x8] sm:$0xff pattern:$0x75643120]  ;;  %v2939_v24 = vld.sshfl [vmem:[#allocation1] sm:$0xff pattern:$0x75643120] }
 0x3df   : > { %2338 = vrot.lane.b32.xlu1 %v5693_v60, %s4806_s8  ;;  %2945 = vrot.lane.b32.xlu0 %v2941_v33, %s4816_s28  ;;  %2604 = vst [vmem:[#allocation2 + $0x340] sm:$0xcc] %v2599_v31 }
 0x3e0   : > { %2943 = vrot.lane.b32.xlu2 %v2939_v24, %s4816_s28 }
 0x3e1   : > { %v2620_v4 = vpop.permute.xlu0 %2619  ;;  %v5909_v35 = vpop.permute.xlu1 %2621 }
 0x3e2   : > { %v2625_v12 = vrot.slane %v2620_v4, 4  ;;  %v2626_v48 = vrot.slane %v5909_v35, 4  ;;  %v2713_v46 = vpop.permute.xlu2 %2712 }
 0x3e4   : > { %v2628_v29 = vsel %vm221_vm4, %v2625_v12, %v2626_v48 }
 0x3e5   : > { %v2629_v60 = vsel %vm1443_vm13, %v2620_v4, %v2628_v29 }
 0x3e6   : > { %2634 = vst [vmem:[#allocation2 + $0x350] sm:$0x33] %v2629_v60 }
 0x3e7   : > { %2378 = vrot.lane.b32.xlu1 %v5716_v21, %s4817_s29  ;;  %2499 = vrot.lane.b32.xlu0 %v5755_v2, %s4767_s7 }
 0x3e8   : > { %2497 = vrot.lane.b32.xlu2 %v5753_v47, %s4767_s7 }
 0x3e9   : > { %v5922_v50 = vpop.permute.xlu0 %2652 }
 0x3ea   : > { %v2657_v28 = vrot.slane %v5922_v50, 4  ;;  %v2740_v58 = vpop.permute.xlu2 %2739 }
 0x3eb   : > { %v2742_v59 = vrot.slane %v2740_v58, 4 }
 0x3ec   : > { %v2659_v11 = vsel %vm221_vm4, %v2656_v49, %v2657_v28 }
 0x3ed   : > { %v2660_v61 = vsel %vm1474_vm14, %v2651_v27, %v2659_v11  ;;  %v2745_v21 = vsel %vm290_vm9, %v2740_v58, %v2742_v59 }
 0x3ee   : > { %2665 = vst [vmem:[#allocation2 + $0x350] sm:$0xcc] %v2660_v61 }
 0x3ef   : > { %2408 = vrot.lane.b32.xlu1 %v5730_v32, %s6370_s19  ;;  %2336 = vrot.lane.b32.xlu0 %v5691_v40, %s4806_s8  ;;  %2749 = vst.msk [vmem:[#allocation2 + $0x378] sm:$0x33] %vm4921_vm2, %v2745_v21  ;;  %v2718_v40 = vrot.slane %v2713_v46, 4 }
 0x3f0   : > { %2530 = vrot.lane.b32.xlu2 %v5762_v19, %s4771_s11 }
 0x3f1   : > { %v5938_v47 = vpop.permute.xlu1 %2682  ;;  %v2681_v2 = vpop.permute.xlu0 %2680 }
 0x3f2   : > { %v2687_v8 = vrot.slane %v5938_v47, 4  ;;  %v2686_v63 = vrot.slane %v2681_v2, 4 }
 0x3f4   : > { %v2689_v32 = vsel %vm221_vm4, %v2686_v63, %v2687_v8 }
 0x3f5   : > { %v2691_v0 = vsel %vm2690_vm12, %v2681_v2, %v2689_v32 }
 0x3f6   : > { %2696 = vst [vmem:[#allocation2 + $0x360] sm:$0x33] %v2691_v0 }
 0x3f7   : > { %2562 = vrot.lane.b32.xlu1 %v5867_v51, %s4775_s22  ;;  %2359 = vrot.lane.b32.xlu0 %v5708_v17, %s4818_s4 }
 0x3f8   : > { %2357 = vrot.lane.b32.xlu2 %v5706_v7, %s4818_s4 }
 0x3f9   : > { %v5949_v19 = vpop.permute.xlu0 %2714 }
 0x3fa   : > { %v2719_v3 = vrot.slane %v5949_v19, 4  ;;  %v2781_v10 = vpop.permute.xlu2 %2780 }
 0x3fb   : > { %v2783_v20 = vrot.slane %v2781_v10, 4 }
 0x3fc   : > { %v2721_v1 = vsel %vm221_vm4, %v2718_v40, %v2719_v3 }
 0x3fd   : > { %v2723_v22 = vsel %vm2722_vm0, %v2713_v46, %v2721_v1  ;;  %v2786_v51 = vsel %vm333_vm15, %v2781_v10, %v2783_v20 }
 0x3fe   : > { %2728 = vst [vmem:[#allocation2 + $0x360] sm:$0xcc] %v2723_v22 }
 0x3ff   : > { %2654 = vrot.lane.b32.xlu1 %v5900_v42, %s4787_s10  ;;  %2406 = vrot.lane.b32.xlu0 %v5728_v34, %s6370_s19  ;;  %2790 = vst.msk [vmem:[#allocation2 + $0x388] sm:$0x33] %vm4921_vm2, %v2786_v51 }
 0x400   : > { %2380 = vrot.lane.b32.xlu2 %v5718_v52, %s4817_s29 }
 0x401   : > { %v2738_v7 = vpop.permute.xlu1 %2737 }
 0x402   : > { %v2741_v17 = vrot.slane %v2738_v7, 4 }
 0x404   : > { %v2743_v39 = vsel %vm221_vm4, %v2741_v17, %v2742_v59 }
 0x405   : > { %v2744_v27 = vsel %vm290_vm9, %v2738_v7, %v2743_v39  ;;  %vm6371_vm9 = vcmask 973824  }
 0x406   : > { %2748 = vst [vmem:[#allocation2 + $0x370] sm:$0x33] %v2744_v27  ;;  %vm6377_vm6 = vmmov %vm6371_vm9 }
 0x407   : > { %2501 = vrot.lane.b32.xlu1 %v5844_v25, %s4767_s7  ;;  %2716 = vrot.lane.b32.xlu0 %v2710_v23, %s4814_s9  ;;  %s4514_s7 = sshll.u32 %s6408_s12, 5 }
 0x408   : > { %2684 = vrot.lane.b32.xlu2 %v2678_v57, %s4813_s24 }
 0x40a   : > { %v2761_v34 = vpop.permute.xlu1 %2760  ;;  %v2759_v42 = vpop.permute.xlu0 %2758 }
 0x40b   : > { %v2763_v38 = vrot.slane %v2761_v34, 4  ;;  %v2762_v30 = vrot.slane %v2759_v42, 4  ;;  %v2820_v52 = vpop.permute.xlu2 %2819 }
 0x40d   : > { %v2766_v18 = vsel %vm312_vm10, %v2761_v34, %v2763_v38  ;;  %v2764_v31 = vsel %vm221_vm4, %v2762_v30, %v2763_v38 }
 0x40e   : > { %2770 = vst.msk [vmem:[#allocation2 + $0x378] sm:$0xcc] %vm4965_vm7, %v2766_v18  ;;  %v2765_v33 = vsel %vm312_vm10, %v2759_v42, %v2764_v31  ;;  %vm6372_vm10 = vcmask 990208  }
 0x40f   : > { %2769 = vst [vmem:[#allocation2 + $0x370] sm:$0xcc] %v2765_v33  ;;  %2623 = vrot.lane.b32.xlu0 %v5886_v62, %s4783_s17  ;;  %s6185_s17 = scalar_lea.vmem %s6203_s3, %s4514_s7 }
 0x410   : > { %2593 = vrot.lane.b32.xlu2 %v5878_v9, %s4779_s18 }
 0x412   : > { %v2779_v25 = vpop.permute.xlu1 %2778 }
 0x413   : > { %v2782_v24 = vrot.slane %v2779_v25, 4  ;;  %v2843_v36 = vpop.permute.xlu2 %2842 }
 0x414   : > { %v2845_v57 = vrot.slane %v2843_v36, 4 }
 0x415   : > { %v2784_v4 = vsel %vm221_vm4, %v2782_v24, %v2783_v20 }
 0x416   : > { %v2785_v12 = vsel %vm333_vm15, %v2779_v25, %v2784_v4  ;;  %v2848_v46 = vsel %vm6371_vm9, %v2843_v36, %v2845_v57  ;;  %vm6373_vm15 = vmmov %vm6372_vm10 }
 0x417   : > { %2789 = vst [vmem:[#allocation2 + $0x380] sm:$0x33] %v2785_v12  ;;  %2471 = vrot.lane.b32.xlu0 %v5021_v6, %s4763_s30  ;;  %vm6380_vm9 = vmmov %vm6376_vm3 }
 0x418   : > { %2440 = vrot.lane.b32.xlu2 %v5006_v54, %s4760_s27  ;;  %2852 = vst.msk [vmem:[#allocation2 + $0x398] sm:$0xcc] %vm4965_vm7, %v2848_v46  ;;  %v2823_v54 = vrot.slane %v2820_v52, 4 }
 0x419   : > { %v2800_v9 = vpop.permute.xlu0 %2799 }
 0x41a   : > { %v2803_v62 = vrot.slane %v2800_v9, 4  ;;  %v2802_v29 = vpop.permute.xlu1 %2801 }
 0x41b   : > { %v2804_v60 = vrot.slane %v2802_v29, 4  ;;  %v2861_v49 = vpop.permute.xlu2 %2860 }
 0x41c   : > { %v2864_v1 = vrot.slane %v2861_v49, 4 }
 0x41d   : > { %v2805_v58 = vsel %vm221_vm4, %v2803_v62, %v2804_v60  ;;  %v2807_v59 = vsel %vm6372_vm10, %v2802_v29, %v2804_v60  ;;  %vm6381_vm10 = vcmask 949248  }
 0x41e   : > { %v2806_v11 = vsel %vm6373_vm15, %v2800_v9, %v2805_v58  ;;  %2811 = vst.msk [vmem:[#allocation2 + $0x388] sm:$0xcc] %vm4965_vm7, %v2807_v59  ;;  %vm6382_vm15 = vmmov %vm6381_vm10 }
 0x41f   : > { %2810 = vst [vmem:[#allocation2 + $0x380] sm:$0xcc] %v2806_v11  ;;  %2410 = vrot.lane.b32.xlu0 %v4999_v43, %s6370_s19 }
 0x420   : > { %2532 = vrot.lane.b32.xlu2 %v5854_v15, %s4771_s11 }
 0x421   : > { %v2822_v6 = vpop.permute.xlu0 %2821 }
 0x422   : > { %v2824_v61 = vrot.slane %v2822_v6, 4 }
 0x423   : > { %v2884_v21 = vpop.permute.xlu2 %2883 }
 0x424   : > { %v2825_v2 = vsel %vm221_vm4, %v2823_v54, %v2824_v61  ;;  %v2827_v63 = vsel %vm6374_vm1, %v2822_v6, %v2824_v61  ;;  %v2886_v32 = vrot.slane %v2884_v21, 4  ;;  %vm2929_vm1 = vcmask 941056  }
 0x425   : > { %v2826_v0 = vsel %vm6375_vm8, %v2820_v52, %v2825_v2  ;;  %2831 = vst.msk [vmem:[#allocation2 + $0x398] sm:$0x33] %vm4921_vm2, %v2827_v63  ;;  %v3090_v52 = vunpack.c.h.b16 %v5795_v55  ;;  %vm6383_vm8 = vcmask 146432  }
 0x426   : > { %2830 = vst [vmem:[#allocation2 + $0x390] sm:$0x33] %v2826_v0  ;;  %v2889_v43 = vsel %vm6376_vm3, %v2884_v21, %v2886_v32  ;;  %vm2950_vm3 = vcmask 932864  }
 0x427   : > { %2893 = vst.msk [vmem:[#allocation2 + $0x3a8] sm:$0xcc] %vm4965_vm7, %v2889_v43  ;;  %v6016_v36 = vpack.c.b16 %v3090_v52, %v3090_v52 }
 0x429   : > { %v2841_v15 = vpop.permute.xlu1 %2840  ;;  %3747 = vmatmul.bf16.vlgmr.msra.gmra.mxu1 %v6016_v36  ;;  %3799 = vmatmul.bf16.vlgmr.msrb.gmra.mxu0 %v6016_v36 }
 0x42a   : > { %v2844_v40 = vrot.slane %v2841_v15, 4 }
 0x42c   : > { %v2846_v10 = vsel %vm221_vm4, %v2844_v40, %v2845_v57 }
 0x42d   : > { %v2847_v20 = vsel %vm6377_vm6, %v2841_v15, %v2846_v10  ;;  %vm6384_vm6 = vcmask 326656  }
 0x42e   : > { %2851 = vst [vmem:[#allocation2 + $0x390] sm:$0xcc] %v2847_v20 }
 0x431   : > { %v2863_v22 = vpop.permute.xlu0 %2862 }
 0x432   : > { %v2923_v51 = vpop.permute.xlu2 %2922  ;;  %v2865_v7 = vrot.slane %v2863_v22, 4 }
 0x433   : > { %v2926_v12 = vrot.slane %v2923_v51, 4 }
 0x434   : > { %v2866_v17 = vsel %vm221_vm4, %v2864_v1, %v2865_v7  ;;  %v2868_v39 = vsel %vm6378_vm11, %v2863_v22, %v2865_v7  ;;  %vm2385_vm11 = vcmask 310272  }
 0x435   : > { %v2867_v23 = vsel %vm6379_vm5, %v2861_v49, %v2866_v17  ;;  %2872 = vst.msk [vmem:[#allocation2 + $0x3a8] sm:$0x33] %vm4921_vm2, %v2868_v39  ;;  %vm6385_vm5 = vcmask 154624  }
 0x436   : > { %2871 = vst [vmem:[#allocation2 + $0x3a0] sm:$0x33] %v2867_v23 }
 0x439   : > { %v2882_v27 = vpop.permute.xlu1 %2881 }
 0x43a   : > { %v2885_v34 = vrot.slane %v2882_v27, 4  ;;  %v2944_v42 = vpop.permute.xlu2 %2943 }
 0x43b   : > { %v2947_v61 = vrot.slane %v2944_v42, 4 }
 0x43c   : > { %v2887_v38 = vsel %vm221_vm4, %v2885_v34, %v2886_v32 }
 0x43d   : > { %v2888_v30 = vsel %vm6380_vm9, %v2882_v27, %v2887_v38  ;;  %vm6386_vm9 = vcmask 1041408  }
 0x43e   : > { %2892 = vst [vmem:[#allocation2 + $0x3a0] sm:$0xcc] %v2888_v30 }
 0x441   : > { %v2904_v18 = vpop.permute.xlu1 %2903  ;;  %v2902_v31 = vpop.permute.xlu0 %2901 }
 0x442   : > { %v2906_v33 = vrot.slane %v2904_v18, 4  ;;  %v2905_v25 = vrot.slane %v2902_v31, 4  ;;  %v2498_v24 = vpop.permute.xlu2 %2497 }
 0x443   : > { %v2503_v20 = vrot.slane %v2498_v24, 4 }
 0x444   : > { %v2909_v57 = vsel %vm6381_vm10, %v2904_v18, %v2906_v33  ;;  %v2907_v4 = vsel %vm221_vm4, %v2905_v25, %v2906_v33  ;;  %v6054_v33 = vld [vmem:[%s6201_s1 + $0x8] sm:$0xff]  ;;  %vm6387_vm10 = vmmov %vm6386_vm9 }
 0x445   : > { %2913 = vst.msk [vmem:[#allocation2 + $0x3b8] sm:$0x33] %vm4921_vm2, %v2909_v57  ;;  %v2908_v55 = vsel %vm6382_vm15, %v2902_v31, %v2907_v4  ;;  %v3091_v4 = vunpack.c.l.b16 %v6054_v33  ;;  %vm6388_vm15 = vmmov %vm6386_vm9 }
 0x446   : > { %2912 = vst [vmem:[#allocation2 + $0x3b0] sm:$0x33] %v2908_v55 }
 0x449   : > { %v2529_v46 = vpop.permute.xlu1 %2528  ;;  %v2925_v9 = vpop.permute.xlu0 %2924 }
 0x44a   : > { %v2534_v62 = vrot.slane %v2529_v46, 4  ;;  %v2927_v29 = vrot.slane %v2925_v9, 4  ;;  %v6025_v60 = vpop.permute.xlu2 %2530 }
 0x44b   : > { %v2535_v49 = vrot.slane %v6025_v60, 4 }
 0x44c   : > { %v2928_v58 = vsel %vm221_vm4, %v2926_v12, %v2927_v29  ;;  %v2931_v59 = vsel %vm2929_vm1, %v2925_v9, %v2927_v29 }
 0x44d   : > { %v2930_v11 = vsel %vm2929_vm1, %v2923_v51, %v2928_v58  ;;  %2935 = vst.msk [vmem:[#allocation2 + $0x3b8] sm:$0xcc] %vm4965_vm7, %v2931_v59  ;;  %v2537_v54 = vsel %vm221_vm4, %v2534_v62, %v2535_v49  ;;  %v4494_v58 = vld [vmem:[#allocation2 + $0x3a0] sm:$0xf]  ;;  %vm6389_vm1 = vmmov %vm6386_vm9 }
 0x44e   : > { %2934 = vst [vmem:[#allocation2 + $0x3b0] sm:$0xcc] %v2930_v11  ;;  %v2538_v6 = vsel %vm6383_vm8, %v2529_v46, %v2537_v54  ;;  %v6061_v11 = vpack.c.b16 %v3091_v4, %v3091_v4  ;;  %vm6390_vm8 = vmmov %vm6384_vm6 }
 0x44f   : > { %2543 = vst [vmem:[#allocation2 + $0x330] sm:$0xcc] %v2538_v6 }
 0x450   : > { %3760 = vmatmul.bf16.vlgmr.msra.gmra.mxu2 %v6061_v11  ;;  %3812 = vmatmul.bf16.vlgmr.msrb.gmra.mxu1 %v6061_v11 }
 0x451   : > { %v2339_v21 = vpop.permute.xlu1 %2338  ;;  %v2946_v2 = vpop.permute.xlu0 %2945  ;;  %3864 = vmatmul.bf16.vlgmr.msra.gmra.mxu0 %v6061_v11 }
 0x452   : > { %v2341_v63 = vrot.slane %v2339_v21, 4  ;;  %v2948_v32 = vrot.slane %v2946_v2, 4  ;;  %v6035_v0 = vpop.permute.xlu2 %2357 }
 0x454   : > { %v2344_v43 = vsel %vm6384_vm6, %v2339_v21, %v2341_v63  ;;  %v2949_v15 = vsel %vm221_vm4, %v2947_v61, %v2948_v32  ;;  %v2952_v40 = vsel %vm2950_vm3, %v2946_v2, %v2948_v32  ;;  %v4634_v29 = vld [vmem:[#allocation2 + $0x3b4] sm:$0xf0]  ;;  %vm6392_vm6 = vcmask 130048  }
 0x455   : > { %2348 = vst.msk [vmem:[#allocation2 + $0x308] sm:$0x33] %vm4921_vm2, %v2344_v43  ;;  %v2951_v10 = vsel %vm2950_vm3, %v2944_v42, %v2949_v15  ;;  %v4633_v59 = vld [vmem:[#allocation2 + $0x3ac] sm:$0xf0]  ;;  %v4496_v2 = vld [vmem:[#allocation2 + $0x3b0] sm:$0xf0] }
 0x456   : > { %2955 = vst [vmem:[#allocation2 + $0x3c0] sm:$0x33] %v2951_v10  ;;  %vm6391_vm3 = vcmask 138240  }
 0x457   : > { %2956 = vst.msk [vmem:[#allocation2 + $0x3c8] sm:$0x33] %vm4921_vm2, %v2952_v40  ;;  %v4504_v40 = vld [vmem:[#allocation2 + $0x3b8] sm:$0xf0] }
 0x459   : > { %v2379_v1 = vpop.permute.xlu1 %2378  ;;  %v6043_v22 = vpop.permute.xlu0 %2499 }
 0x45a   : > { %v2382_v51 = vrot.slane %v2379_v1, 4  ;;  %v2504_v7 = vrot.slane %v6043_v22, 4  ;;  %v2381_v17 = vpop.permute.xlu2 %2380 }
 0x45b   : > { %v2383_v39 = vrot.slane %v2381_v17, 4 }
 0x45c   : > { %v2506_v23 = vsel %vm221_vm4, %v2503_v20, %v2504_v7  ;;  %v4495_v20 = vor.u32 %v4633_v59, %v4494_v58 }
 0x45d   : > { %v2507_v27 = vsel %vm6385_vm5, %v2498_v24, %v2506_v23  ;;  %v2384_v34 = vsel %vm221_vm4, %v2382_v51, %v2383_v39  ;;  %v2387_v42 = vsel %vm2385_vm11, %v2381_v17, %v2383_v39  ;;  %v3079_v38 = vld [vmem:[#allocation2 + $0x3c0] sm:$0x33]  ;;  %v4502_v39 = vld [vmem:[#allocation2 + $0x3a8] sm:$0xf]  ;;  %v4632_v23 = vld [vmem:[#allocation2 + $0x3ac] sm:$0xf] }
 0x45e   : > { %2512 = vst [vmem:[#allocation2 + $0x330] sm:$0x33] %v2507_v27  ;;  %v2386_v30 = vsel %vm2385_vm11, %v2379_v1, %v2384_v34  ;;  %v3080_v52 = vld [vmem:[#allocation2 + $0x3c8] sm:$0x33]  ;;  %v3462_v18 = vunpack.c.l.b16 %v3079_v38  ;;  %v3463_v31 = vunpack.c.h.b16 %v3079_v38  ;;  %v4631_v1 = vld [vmem:[#allocation2 + $0x3a4] sm:$0xf]  ;;  %v4503_v34 = vor.u32 %v4634_v29, %v4502_v39 }
 0x45f   : > { %2390 = vst [vmem:[#allocation2 + $0x310] sm:$0x33] %v2386_v30  ;;  %v3464_v25 = vunpack.c.l.b16 %v3080_v52  ;;  %v3465_v57 = vunpack.c.h.b16 %v3080_v52  ;;  %v4499_v27 = vor.u32 %v4631_v1, %v4496_v2  ;;  %v4629_v38 = vld [vmem:[#allocation2 + $0x38c] sm:$0xf0]  ;;  %v4480_v30 = vld [vmem:[#allocation2 + $0x390] sm:$0xf0] }
 0x460   : > { %2391 = vst.msk [vmem:[#allocation2 + $0x318] sm:$0x33] %vm4921_vm2, %v2387_v42  ;;  %v3586_v24 = vpack.c.b16 %v3462_v18, %v3462_v18  ;;  %v3587_v55 = vpack.c.b16 %v3463_v31, %v3463_v31  ;;  %v4507_v42 = vor.u32 %v4632_v23, %v4504_v40  ;;  %v4462_v52 = vld [vmem:[#allocation2 + $0x360] sm:$0xf]  ;;  %v4625_v18 = vld [vmem:[#allocation2 + $0x36c] sm:$0xf0] }
 0x461   : > { %v6059_v12 = vpop.permute.xlu1 %2408  ;;  %v2337_v46 = vpop.permute.xlu0 %2336  ;;  %v3588_v9 = vpack.c.b16 %v3464_v25, %v3464_v25  ;;  %v3589_v62 = vpack.c.b16 %v3465_v57, %v3465_v57  ;;  %v4488_v31 = vld [vmem:[#allocation2 + $0x398] sm:$0xf0]  ;;  %v2361_v25 = vrot.slane %v6035_v0, 4  ;;  %v4627_v57 = vld [vmem:[#allocation2 + $0x384] sm:$0xf]  ;;  %vm6393_vm11 = vcmask 179200  }
 0x462   : > { %v2340_v54 = vrot.slane %v2337_v46, 4  ;;  %v2685_v6 = vpop.permute.xlu2 %2684  ;;  %v3715_v61 = vsel %vm6386_vm9, %v3586_v24, 0  ;;  %v3718_v21 = vsel %vm6387_vm10, %v3587_v55, 0  ;;  %v4486_v55 = vld [vmem:[#allocation2 + $0x388] sm:$0xf]  ;;  %vm6394_vm5 = vcmask 171008  }
 0x463   : > { %v2688_v32 = vrot.slane %v2685_v6, 4  ;;  %v3721_v43 = vsel %vm6388_vm15, %v3588_v9, 0  ;;  %v3724_v15 = vsel %vm6389_vm1, %v3589_v62, 0  ;;  %3766 = vmatpush.bf16.msra.mxu3 %v3715_v61  ;;  %3818 = vmatpush.bf16.msrb.mxu2 %v3718_v21  ;;  %v4483_v62 = vor.u32 %v4627_v57, %v4480_v30  ;;  %v4623_v61 = vld [vmem:[#allocation2 + $0x364] sm:$0xf] }
 0x464   : > { %v2342_v10 = vsel %vm221_vm4, %v2340_v54, %v2341_v63  ;;  %3870 = vmatpush.bf16.msra.mxu1 %v3721_v43  ;;  %3922 = vmatpush.bf16.msrb.mxu0 %v3724_v15  ;;  %v4464_v21 = vld [vmem:[#allocation2 + $0x370] sm:$0xf0]  ;;  %v4615_v57 = vld [vmem:[#allocation2 + $0x324] sm:$0xf]  ;;  %vm6396_vm9 = vcmask 146432   ;;  %vm3937_vm15 = vcmask 261120  }
 0x465   : > { %v2343_v51 = vsel %vm6390_vm8, %v2337_v46, %v2342_v10  ;;  %v2692_v17 = vsel %vm221_vm4, %v2687_v8, %v2688_v32  ;;  %v4630_v8 = vld [vmem:[#allocation2 + $0x394] sm:$0xf0]  ;;  %v4628_v46 = vld [vmem:[#allocation2 + $0x38c] sm:$0xf]  ;;  %v4463_v32 = vor.u32 %v4625_v18, %v4462_v52  ;;  %v4448_v23 = vld [vmem:[#allocation2 + $0x350] sm:$0xf0] }
 0x466   : > { %2347 = vst [vmem:[#allocation2 + $0x300] sm:$0x33] %v2343_v51  ;;  %v2693_v63 = vsel %vm2690_vm12, %v5938_v47, %v2692_v17  ;;  %v4478_v47 = vld [vmem:[#allocation2 + $0x380] sm:$0xf]  ;;  %vm2364_vm12 = vcmask 318464   ;;  %v4487_v54 = vor.u32 %v4630_v8, %v4486_v55  ;;  %v4491_v6 = vor.u32 %v4628_v46, %v4488_v31 }
 0x467   : > { %2697 = vst.msk [vmem:[#allocation2 + $0x368] sm:$0x33] %vm4921_vm2, %v2693_v63  ;;  %3767 = vmatpush.bf16.msra.mxu3 %v4495_v20  ;;  %3819 = vmatpush.bf16.msrb.mxu2 %v4499_v27  ;;  %v4479_v9 = vor.u32 %v4629_v38, %v4478_v47  ;;  %v4446_v51 = vld [vmem:[#allocation2 + $0x340] sm:$0xf]  ;;  %v4619_v17 = vld [vmem:[#allocation2 + $0x344] sm:$0xf] }
 0x468   : > { %3871 = vmatpush.bf16.msra.mxu1 %v4503_v34  ;;  %3923 = vmatpush.bf16.msrb.mxu0 %v4507_v42  ;;  %v4451_v34 = vor.u32 %v4619_v17, %v4448_v23  ;;  %v4617_v42 = vld [vmem:[#allocation2 + $0x32c] sm:$0xf0]  ;;  %v4432_v18 = vld [vmem:[#allocation2 + $0x330] sm:$0xf0]  ;;  %v4430_v8 = vld [vmem:[#allocation2 + $0x320] sm:$0xf] }
 0x469   : > { %v2563_v4 = vpop.permute.xlu1 %2562  ;;  %v2360_v24 = vpop.permute.xlu0 %2359  ;;  %v4431_v47 = vor.u32 %v4617_v42, %v4430_v8  ;;  %v4435_v46 = vor.u32 %v4615_v57, %v4432_v18  ;;  %v4128_v17 = vld [vmem:[#allocation2 + $0xd0] sm:$0xf0]  ;;  %v4118_v42 = vld [vmem:[#allocation2 + $0xa8] sm:$0xf]  ;;  %v4538_v18 = vld [vmem:[#allocation2 + $0xb4] sm:$0xf0] }
 0x46a   : > { %v2566_v29 = vrot.slane %v2563_v4, 4  ;;  %v2362_v58 = vrot.slane %v2360_v24, 4  ;;  %v2594_v59 = vpop.permute.xlu2 %2593  ;;  %v4531_v57 = vld [vmem:[#allocation2 + $0x84] sm:$0xf] }
 0x46b   : > { %v2597_v2 = vrot.slane %v2594_v59, 4  ;;  %3768 = vmatpush.bf16.msra.mxu3 %v4479_v9  ;;  %3820 = vmatpush.bf16.msrb.mxu2 %v4483_v62 }
 0x46c   : > { %v2569_v43 = vsel %vm221_vm4, %v2565_v26, %v2566_v29  ;;  %v2363_v15 = vsel %vm221_vm4, %v2361_v25, %v2362_v58  ;;  %v2366_v40 = vsel %vm2364_vm12, %v2360_v24, %v2362_v58  ;;  %3872 = vmatpush.bf16.msra.mxu1 %v4487_v54  ;;  %3924 = vmatpush.bf16.msrb.mxu0 %v4491_v6  ;;  %v4543_v54 = vld [vmem:[#allocation2 + $0xe4] sm:$0xf]  ;;  %v4144_v6 = vld [vmem:[#allocation2 + $0xf0] sm:$0xf0] }
 0x46d   : > { %v2570_v10 = vsel %vm6391_vm3, %v5888_v16, %v2569_v43  ;;  %v2365_v20 = vsel %vm2364_vm12, %v6035_v0, %v2363_v15  ;;  %2370 = vst.msk [vmem:[#allocation2 + $0x308] sm:$0xcc] %vm4965_vm7, %v2366_v40  ;;  %v2600_v1 = vsel %vm221_vm4, %v2596_v45, %v2597_v2  ;;  %v4467_v26 = vor.u32 %v4623_v61, %v4464_v21  ;;  %v4621_v16 = vld [vmem:[#allocation2 + $0x34c] sm:$0xf0]  ;;  %v4150_v61 = vld [vmem:[#allocation2 + $0xe8] sm:$0xf] }
 0x46e   : > { %2574 = vst.msk [vmem:[#allocation2 + $0x348] sm:$0x33] %vm4921_vm2, %v2570_v10  ;;  %v2601_v39 = vsel %vm6392_vm6, %v5880_v53, %v2600_v1  ;;  %v2413_v0 = vrot.slane %v6059_v12, 4  ;;  %v4447_v63 = vor.u32 %v4621_v16, %v4446_v51  ;;  %v3092_v21 = vunpack.c.h.b16 %v6054_v33  ;;  %v4546_v40 = vld [vmem:[#allocation2 + $0xf4] sm:$0xf0] }
 0x46f   : > { %2369 = vst [vmem:[#allocation2 + $0x300] sm:$0xcc] %v2365_v20  ;;  %3769 = vmatpush.bf16.msra.mxu3 %v4463_v32  ;;  %3821 = vmatpush.bf16.msrb.mxu2 %v4467_v26  ;;  %v4151_v20 = vor.u32 %v4546_v40, %v4150_v61  ;;  %v4539_v1 = vld [vmem:[#allocation2 + $0xc4] sm:$0xf]  ;;  %v4064_v40 = vld [vmem:[#allocation2 + $0x50] sm:$0xf0] }
 0x470   : > { %2605 = vst.msk [vmem:[#allocation2 + $0x348] sm:$0xcc] %vm4965_vm7, %v2601_v39  ;;  %v6141_v26 = vpack.c.b16 %v3092_v21, %v3092_v21  ;;  %v4542_v39 = vld [vmem:[#allocation2 + $0xd4] sm:$0xf0] }
 0x471   : > { %v2655_v45 = vpop.permute.xlu1 %2654  ;;  %v2407_v27 = vpop.permute.xlu0 %2406 }
 0x472   : > { %v2658_v38 = vrot.slane %v2655_v45, 4  ;;  %v2412_v30 = vrot.slane %v2407_v27, 4  ;;  %v2441_v52 = vpop.permute.xlu2 %2440  ;;  %v4131_v45 = vor.u32 %v4539_v1, %v4128_v17  ;;  %v4522_v17 = vld [vmem:[#allocation2 + $0x34] sm:$0xf0] }
 0x473   : > { %v2444_v53 = vrot.slane %v2441_v52, 4  ;;  %3770 = vmatpush.bf16.msra.mxu3 %v4447_v63  ;;  %3822 = vmatpush.bf16.msrb.mxu2 %v4451_v34  ;;  %v4535_v63 = vld [vmem:[#allocation2 + $0xa4] sm:$0xf]  ;;  %v4112_v34 = vld [vmem:[#allocation2 + $0xb0] sm:$0xf0] }
 0x474   : > { %v2661_v31 = vsel %vm221_vm4, %v2657_v28, %v2658_v38  ;;  %v2415_v25 = vsel %vm221_vm4, %v2412_v30, %v2413_v0  ;;  %v4626_v30 = vld [vmem:[#allocation2 + $0x374] sm:$0xf0]  ;;  %v4472_v52 = vld [vmem:[#allocation2 + $0x378] sm:$0xf0] }
 0x475   : > { %v2662_v4 = vsel %vm1474_vm14, %v5922_v50, %v2661_v31  ;;  %v2416_v24 = vsel %vm6393_vm11, %v2407_v27, %v2415_v25  ;;  %v2447_v55 = vsel %vm221_vm4, %v2443_v5, %v2444_v53  ;;  %vm6395_vm14 = vcmask 154624  }
 0x476   : > { %2666 = vst.msk [vmem:[#allocation2 + $0x358] sm:$0xcc] %vm4965_vm7, %v2662_v4  ;;  %v2448_v28 = vsel %vm6394_vm5, %v5852_v37, %v2447_v55  ;;  %v4611_v15 = vld [vmem:[#allocation2 + $0x304] sm:$0xf]  ;;  %v4115_v25 = vor.u32 %v4535_v63, %v4112_v34  ;;  %v4819_v4 = vmov 0  }
 0x477   : > { %2421 = vst [vmem:[#allocation2 + $0x310] sm:$0xcc] %v2416_v24  ;;  %3771 = vmatpush.bf16.msra.mxu3 %v4431_v47  ;;  %3823 = vmatpush.bf16.msrb.mxu2 %v4435_v46  ;;  %v4119_v47 = vor.u32 %v4538_v18, %v4118_v42  ;;  %v4096_v24 = vld [vmem:[#allocation2 + $0x90] sm:$0xf0]  ;;  %v4102_v55 = vld [vmem:[#allocation2 + $0x88] sm:$0xf] }
 0x478   : > { %2452 = vst.msk [vmem:[#allocation2 + $0x328] sm:$0x33] %vm4921_vm2, %v2448_v28  ;;  %4727 = vset.pattern.permute.xlu1 %v4819_v4  ;;  %4728 = vset.pattern.permute.xlu0 %v4819_v4  ;;  %v4534_v46 = vld [vmem:[#allocation2 + $0x94] sm:$0xf0]  ;;  %v4620_v61 = vld [vmem:[#allocation2 + $0x34c] sm:$0xf] }
 0x479   : > { %v2502_v50 = vpop.permute.xlu1 %2501  ;;  %v2717_v9 = vpop.permute.xlu0 %2716  ;;  %v4515_v34 = vld [vmem:[#allocation2 + $0x4] sm:$0xf]  ;;  %v4032_v42 = vld [vmem:[#allocation2 + $0x10] sm:$0xf0]  ;;  %v4576_v18 = vld [vmem:[#allocation2 + $0x1ec] sm:$0xf] }
 0x47a   : > { %v2505_v62 = vrot.slane %v2502_v50, 4  ;;  %v2720_v29 = vrot.slane %v2717_v9, 4  ;;  %v2533_v58 = vpop.permute.xlu2 %2532  ;;  %v4527_v50 = vld [vmem:[#allocation2 + $0x64] sm:$0xf]  ;;  %v4080_v9 = vld [vmem:[#allocation2 + $0x70] sm:$0xf0] }
 0x47b   : > { %v2536_v59 = vrot.slane %v2533_v58, 4  ;;  %v4103_v58 = vor.u32 %v4534_v46, %v4102_v55 }
 0x47c   : > { %v2508_v5 = vsel %vm221_vm4, %v2504_v7, %v2505_v62  ;;  %v2724_v37 = vsel %vm221_vm4, %v2719_v3, %v2720_v29  ;;  %v4414_v7 = vld [vmem:[#allocation2 + $0x300] sm:$0xf]  ;;  %v4099_v29 = vor.u32 %v4531_v57, %v4096_v24 }
 0x47d   : > { %v2509_v2 = vsel %vm6395_vm14, %v6043_v22, %v2508_v5  ;;  %v2725_v32 = vsel %vm2722_vm0, %v5949_v19, %v2724_v37  ;;  %v2539_v43 = vsel %vm221_vm4, %v2535_v49, %v2536_v59  ;;  %v4147_v49 = vor.u32 %v4543_v54, %v4144_v6  ;;  %v4454_v59 = vld [vmem:[#allocation2 + $0x348] sm:$0xf]  ;;  %v4530_v37 = vld [vmem:[#allocation2 + $0x74] sm:$0xf0] }
 0x47e   : > { %2513 = vst.msk [vmem:[#allocation2 + $0x338] sm:$0x33] %vm4921_vm2, %v2509_v2  ;;  %v2540_v3 = vsel %vm6396_vm9, %v6025_v60, %v2539_v43  ;;  %v4613_v33 = vld [vmem:[#allocation2 + $0x30c] sm:$0xf0]  ;;  %v4416_v10 = vld [vmem:[#allocation2 + $0x310] sm:$0xf0] }
 0x47f   : > { %2729 = vst.msk [vmem:[#allocation2 + $0x368] sm:$0xcc] %vm4965_vm7, %v2725_v32  ;;  %v4415_v22 = vor.u32 %v4613_v33, %v4414_v7  ;;  %v4419_v19 = vor.u32 %v4611_v15, %v4416_v10  ;;  %v4134_v60 = vld [vmem:[#allocation2 + $0xc8] sm:$0xf]  ;;  %vm6397_vm0 = vcmask 818176  }
 0x480   : > { %2544 = vst.msk [vmem:[#allocation2 + $0x338] sm:$0xcc] %vm4965_vm7, %v2540_v3  ;;  %v4135_v27 = vor.u32 %v4542_v39, %v4134_v60  ;;  %vm6398_vm10 = vmmov %vm6397_vm0  ;;  %v4086_v5 = vld [vmem:[#allocation2 + $0x68] sm:$0xf]  ;;  %v4523_v7 = vld [vmem:[#allocation2 + $0x44] sm:$0xf] }
 0x481   : > { %3772 = vmatpush.bf16.msra.mxu3 %v4415_v22  ;;  %3824 = vmatpush.bf16.msrb.mxu2 %v4419_v19  ;;  %v2624_v51 = vpop.permute.xlu0 %2623  ;;  %v4087_v43 = vor.u32 %v4530_v37, %v4086_v5  ;;  %v4070_v3 = vld [vmem:[#allocation2 + $0x48] sm:$0xf]  ;;  %v4526_v33 = vld [vmem:[#allocation2 + $0x54] sm:$0xf0]  ;;  %v4519_v10 = vld [vmem:[#allocation2 + $0x24] sm:$0xf] }
 0x482   : > { %v2627_v16 = vrot.slane %v2624_v51, 4  ;;  %v4048_v22 = vld [vmem:[#allocation2 + $0x30] sm:$0xf0]  ;;  %v4054_v51 = vld [vmem:[#allocation2 + $0x28] sm:$0xf] }
 0x483   : > { %v4055_v63 = vor.u32 %v4522_v17, %v4054_v51  ;;  %v4246_v37 = vld [vmem:[#allocation2 + $0x1a8] sm:$0xf]  ;;  %v4560_v51 = vld [vmem:[#allocation2 + $0x16c] sm:$0xf] }
 0x484   : > { %v2630_v23 = vsel %vm221_vm4, %v2626_v48, %v2627_v16  ;;  %4508 = vmatmul.msk.bf16.vlgmr.msra.gmra.mxu3 %vm6397_vm0, %v6141_v26  ;;  %4509 = vmatmul.msk.bf16.vlgmr.msrb.gmra.mxu2 %vm6398_vm10, %v6141_v26  ;;  %v4528_v17 = vld [vmem:[#allocation2 + $0x6c] sm:$0xf] }
 0x485   : > { %3778 = vmatpush.bf16.msrb.mxu3 %v4147_v49  ;;  %3830 = vmatpush.bf16.msra.mxu2 %v4151_v20  ;;  %v2631_v38 = vsel %vm1443_vm13, %v5909_v35, %v2630_v23  ;;  %v3081_v35 = vld [vmem:[%s6202_s2] sm:$0xff]  ;;  %v4067_v49 = vor.u32 %v4523_v7, %v4064_v40  ;;  %v4071_v20 = vor.u32 %v4526_v33, %v4070_v3  ;;  %vm6400_vm13 = vmmov %vm6393_vm11  ;;  %v4532_v3 = vld [vmem:[#allocation2 + $0x8c] sm:$0xf] }
 0x486   : > { %2635 = vst.msk [vmem:[#allocation2 + $0x358] sm:$0x33] %vm4921_vm2, %v2631_v38  ;;  %v4470_v48 = vld [vmem:[#allocation2 + $0x368] sm:$0xf]  ;;  %v4624_v53 = vld [vmem:[#allocation2 + $0x36c] sm:$0xf]  ;;  %3084 = vperm.xlu1 %4727, %v3081_v35  }
 0x487   : > { %v4471_v8 = vor.u32 %v4626_v30, %v4470_v48  ;;  %v4475_v31 = vor.u32 %v4624_v53, %v4472_v52  ;;  %vm6399_vm2 = vcmask 162816   ;;  %v4618_v1 = vld [vmem:[#allocation2 + $0x334] sm:$0xf0]  ;;  %v4440_v23 = vld [vmem:[#allocation2 + $0x338] sm:$0xf0]  ;;  %v4035_v53 = vor.u32 %v4515_v34, %v4032_v42 }
 0x488   : > { %v4038_v38 = vld [vmem:[#allocation2 + $0x8] sm:$0xf]  ;;  %v4518_v30 = vld [vmem:[#allocation2 + $0x14] sm:$0xf0]  ;;  %v4280_v48 = vld [vmem:[#allocation2 + $0x1f8] sm:$0xf0] }
 0x489   : > { %3779 = vmatpush.bf16.msrb.mxu3 %v4131_v45  ;;  %3831 = vmatpush.bf16.msra.mxu2 %v4135_v27  ;;  %v2472_v44 = vpop.permute.xlu0 %2471  ;;  %v4278_v52 = vld [vmem:[#allocation2 + $0x1e8] sm:$0xf]  ;;  %v4283_v4 = vor.u32 %v4576_v18, %v4280_v48  ;;  %v4566_v7 = vld [vmem:[#allocation2 + $0x194] sm:$0xf0]  ;;  %v4524_v34 = vld [vmem:[#allocation2 + $0x4c] sm:$0xf] }
 0x48a   : > { %3873 = vmatpush.bf16.msra.mxu1 %v4471_v8  ;;  %3925 = vmatpush.bf16.msrb.mxu0 %v4475_v31  ;;  %v2475_v28 = vrot.slane %v2472_v44, 4  ;;  %v4039_v8 = vor.u32 %v4518_v30, %v4038_v38  ;;  %v4422_v31 = vld [vmem:[#allocation2 + $0x308] sm:$0xf]  ;;  %v4612_v44 = vld [vmem:[#allocation2 + $0x30c] sm:$0xf] }
 0x48b   : > { %v4230_v33 = vld [vmem:[#allocation2 + $0x188] sm:$0xf]  ;;  %v4072_v42 = vld [vmem:[#allocation2 + $0x58] sm:$0xf0]  ;;  %v4552_v18 = vld [vmem:[#allocation2 + $0x12c] sm:$0xf] }
 0x48c   : > { %v2478_v62 = vsel %vm221_vm4, %v2474_v56, %v2475_v28  ;;  %v4083_v56 = vor.u32 %v4527_v50, %v4080_v9  ;;  %v4574_v28 = vld [vmem:[#allocation2 + $0x1d4] sm:$0xf0]  ;;  %v4572_v50 = vld [vmem:[#allocation2 + $0x1cc] sm:$0xf]  ;;  %v4264_v9 = vld [vmem:[#allocation2 + $0x1d8] sm:$0xf0] }
 0x48d   : > { %3780 = vmatpush.bf16.msrb.mxu3 %v4115_v25  ;;  %3832 = vmatpush.bf16.msra.mxu2 %v4119_v47  ;;  %v2479_v54 = vsel %vm6399_vm2, %v5865_v41, %v2478_v62  ;;  %v4622_v6 = vld [vmem:[#allocation2 + $0x354] sm:$0xf0]  ;;  %v4456_v21 = vld [vmem:[#allocation2 + $0x358] sm:$0xf0]  ;;  %v4262_v47 = vld [vmem:[#allocation2 + $0x1c8] sm:$0xf]  ;;  %v4267_v5 = vor.u32 %v4572_v50, %v4264_v9 }
 0x48e   : > { %2483 = vst.msk [vmem:[#allocation2 + $0x328] sm:$0xcc] %vm4965_vm7, %v2479_v54  ;;  %v4455_v2 = vor.u32 %v4622_v6, %v4454_v59  ;;  %v4459_v32 = vor.u32 %v4620_v61, %v4456_v21  ;;  %v4152_v25 = vld [vmem:[#allocation2 + $0xf8] sm:$0xf0]  ;;  %v4263_v59 = vor.u32 %v4574_v28, %v4262_v47  ;;  %v4570_v54 = vld [vmem:[#allocation2 + $0x1b4] sm:$0xf0] }
 0x48f   : > { %v4155_v62 = vor.u32 %v4544_v14, %v4152_v25  ;;  %v4568_v6 = vld [vmem:[#allocation2 + $0x1ac] sm:$0xf]  ;;  %v4248_v61 = vld [vmem:[#allocation2 + $0x1b8] sm:$0xf0]  ;;  %v4075_v14 = vor.u32 %v4524_v34, %v4072_v42  ;;  %v4166_v47 = vld [vmem:[#allocation2 + $0x108] sm:$0xf] }
 0x490   : > { %3874 = vmatpush.bf16.msra.mxu1 %v4455_v2  ;;  %3926 = vmatpush.bf16.msrb.mxu0 %v4459_v32  ;;  %v4536_v2 = vld [vmem:[#allocation2 + $0xac] sm:$0xf]  ;;  %v4120_v32 = vld [vmem:[#allocation2 + $0xb8] sm:$0xf0] }
 0x491   : > { %3781 = vmatpush.bf16.msrb.mxu3 %v4099_v29  ;;  %3833 = vmatpush.bf16.msra.mxu2 %v4103_v58  ;;  %v2411_v15 = vpop.permute.xlu0 %2410  ;;  %v4540_v29 = vld [vmem:[#allocation2 + $0xcc] sm:$0xf]  ;;  %v4136_v58 = vld [vmem:[#allocation2 + $0xd8] sm:$0xf0]  ;;  %v4123_v40 = vor.u32 %v4536_v2, %v4120_v32 }
 0x492   : > { %v2414_v41 = vrot.slane %v2411_v15, 4  ;;  %v4139_v21 = vor.u32 %v4540_v29, %v4136_v58  ;;  %v4232_v15 = vld [vmem:[#allocation2 + $0x198] sm:$0xf0]  ;;  %v4604_v58 = vld [vmem:[#allocation2 + $0x2cc] sm:$0xf] }
 0x493   : > { %v4184_v48 = vld [vmem:[#allocation2 + $0x138] sm:$0xf0]  ;;  %v4592_v32 = vld [vmem:[#allocation2 + $0x26c] sm:$0xf] }
 0x494   : > { %v2417_v19 = vsel %vm221_vm4, %v2413_v0, %v2414_v41  ;;  %v4051_v0 = vor.u32 %v4519_v10, %v4048_v22  ;;  %vm6401_vm4 = vmmov %vm6397_vm0  ;;  %v4564_v41 = vld [vmem:[#allocation2 + $0x18c] sm:$0xf]  ;;  %v4104_v10 = vld [vmem:[#allocation2 + $0x98] sm:$0xf0]  ;;  %v4231_v22 = vor.u32 %v4566_v7, %v4230_v33  ;;  %v4187_v25 = vor.u32 %v4552_v18, %v4184_v48 }
 0x495   : > { %3782 = vmatpush.bf16.msrb.mxu3 %v4083_v56  ;;  %3834 = vmatpush.bf16.msra.mxu2 %v4087_v43  ;;  %v2418_v60 = vsel %vm6400_vm13, %v6059_v12, %v2417_v19  ;;  %v4438_v39 = vld [vmem:[#allocation2 + $0x328] sm:$0xf]  ;;  %v4616_v16 = vld [vmem:[#allocation2 + $0x32c] sm:$0xf]  ;;  %v4578_v12 = vld [vmem:[#allocation2 + $0x1f4] sm:$0xf0]  ;;  %v4247_v56 = vor.u32 %v4570_v54, %v4246_v37  ;;  %v4251_v43 = vor.u32 %v4568_v6, %v4248_v61 }
 0x496   : > { %2422 = vst.msk [vmem:[#allocation2 + $0x318] sm:$0xcc] %vm4965_vm7, %v2418_v60  ;;  %v4439_v45 = vor.u32 %v4618_v1, %v4438_v39  ;;  %v4443_v27 = vor.u32 %v4616_v16, %v4440_v23  ;;  %v4279_v57 = vor.u32 %v4578_v12, %v4278_v52  ;;  %vm6402_vm7 = vmmov %vm6397_vm0  ;;  %v4235_v19 = vor.u32 %v4564_v41, %v4232_v15  ;;  %v4214_v1 = vld [vmem:[#allocation2 + $0x168] sm:$0xf]  ;;  %v4088_v60 = vld [vmem:[#allocation2 + $0x78] sm:$0xf0] }
 0x497   : > { %v4198_v23 = vld [vmem:[#allocation2 + $0x148] sm:$0xf]  ;;  %v4554_v12 = vld [vmem:[#allocation2 + $0x134] sm:$0xf0]  ;;  %v4040_v28 = vld [vmem:[#allocation2 + $0x18] sm:$0xf0] }
 0x498   : > { %3875 = vmatpush.bf16.msra.mxu1 %v4439_v45  ;;  %3927 = vmatpush.bf16.msrb.mxu0 %v4443_v27  ;;  %v4558_v45 = vld [vmem:[#allocation2 + $0x154] sm:$0xf0]  ;;  %v4556_v27 = vld [vmem:[#allocation2 + $0x14c] sm:$0xf]  ;;  %v4182_v52 = vld [vmem:[#allocation2 + $0x128] sm:$0xf] }
 0x499   : > { %3783 = vmatpush.bf16.msrb.mxu3 %v4067_v49  ;;  %3835 = vmatpush.bf16.msra.mxu2 %v4071_v20  ;;  %v4562_v49 = vld [vmem:[#allocation2 + $0x174] sm:$0xf0]  ;;  %v4216_v20 = vld [vmem:[#allocation2 + $0x178] sm:$0xf0]  ;;  %v4199_v38 = vor.u32 %v4558_v45, %v4198_v23  ;;  %v4600_v37 = vld [vmem:[#allocation2 + $0x2ac] sm:$0xf] }
 0x49a   : > { %v4215_v39 = vor.u32 %v4562_v49, %v4214_v1  ;;  %v4219_v16 = vor.u32 %v4560_v51, %v4216_v20  ;;  %v4376_v54 = vld [vmem:[#allocation2 + $0x2b8] sm:$0xf0]  ;;  %v4596_v61 = vld [vmem:[#allocation2 + $0x28c] sm:$0xf] }
 0x49b   : > { %v4379_v6 = vor.u32 %v4600_v37, %v4376_v54  ;;  %v4588_v7 = vld [vmem:[#allocation2 + $0x24c] sm:$0xf]  ;;  %v4328_v15 = vld [vmem:[#allocation2 + $0x258] sm:$0xf0] }
 0x49c   : > { %v4580_v41 = vld [vmem:[#allocation2 + $0x20c] sm:$0xf] }
 0x49d   : > { %3784 = vmatpush.bf16.msrb.mxu3 %v4051_v0  ;;  %3836 = vmatpush.bf16.msra.mxu2 %v4055_v63  ;;  %v4614_v35 = vld [vmem:[#allocation2 + $0x314] sm:$0xf0]  ;;  %v4424_v24 = vld [vmem:[#allocation2 + $0x318] sm:$0xf0]  ;;  %v4091_v63 = vor.u32 %v4528_v17, %v4088_v60 }
 0x49e   : > { %v4423_v55 = vor.u32 %v4614_v35, %v4422_v31  ;;  %v4427_v46 = vor.u32 %v4612_v44, %v4424_v24  ;;  %v4200_v0 = vld [vmem:[#allocation2 + $0x158] sm:$0xf0]  ;;  %v4183_v31 = vor.u32 %v4554_v12, %v4182_v52  ;;  %v4608_v24 = vld [vmem:[#allocation2 + $0x2ec] sm:$0xf] }
 0x49f   : > { %v4203_v30 = vor.u32 %v4556_v27, %v4200_v0  ;;  %v4168_v35 = vld [vmem:[#allocation2 + $0x118] sm:$0xf0] }
 0x4a0   : > { %3876 = vmatpush.bf16.msra.mxu1 %v4423_v55  ;;  %3928 = vmatpush.bf16.msrb.mxu0 %v4427_v46  ;;  %v4408_v55 = vld [vmem:[#allocation2 + $0x2f8] sm:$0xf0]  ;;  %v4516_v46 = vld [vmem:[#allocation2 + $0xc] sm:$0xf] }
 0x4a1   : > { %3785 = vmatpush.bf16.msrb.mxu3 %v4035_v53  ;;  %3837 = vmatpush.bf16.msra.mxu2 %v4039_v8  ;;  %v4520_v53 = vld [vmem:[#allocation2 + $0x2c] sm:$0xf]  ;;  %v4056_v8 = vld [vmem:[#allocation2 + $0x38] sm:$0xf0]  ;;  %v4043_v29 = vor.u32 %v4516_v46, %v4040_v28 }
 0x4a2   : > { %v4059_v44 = vor.u32 %v4520_v53, %v4056_v8 }
 0x4a3   : > { %4510 = vmatmul.msk.bf16.vlgmr.msra.gmra.mxu1 %vm6401_vm4, %v6141_v26  ;;  %4511 = vmatmul.msk.bf16.vlgmr.msrb.gmra.mxu0 %vm6402_vm7, %v6141_v26  ;;  %v4107_v26 = vor.u32 %v4532_v3, %v4104_v10  ;;  %v4584_v3 = vld [vmem:[#allocation2 + $0x22c] sm:$0xf]  ;;  %v4296_v10 = vld [vmem:[#allocation2 + $0x218] sm:$0xf0] }
 0x4a4   : > { %3882 = vmatpush.bf16.msrb.mxu1 %v4155_v62  ;;  %3786 = vmatmul.bf16.vlgmr.msrb.gmra.mxu3 %v5798_v13  ;;  %v4411_v62 = vor.u32 %v4608_v24, %v4408_v55 }
 0x4a5   : > { %3843 = vmatpush.bf16.msra.mxu3 %v4279_v57  ;;  %3895 = vmatpush.bf16.msrb.mxu2 %v4283_v4  ;;  %v4550_v57 = vld [vmem:[#allocation2 + $0x114] sm:$0xf0]  ;;  %v4548_v4 = vld [vmem:[#allocation2 + $0x10c] sm:$0xf] }
 0x4a6   : > { %3838 = vmatmul.bf16.vlgmr.msra.gmra.mxu2 %v5798_v13  ;;  %v4167_v50 = vor.u32 %v4550_v57, %v4166_v47  ;;  %v4171_v9 = vor.u32 %v4548_v4, %v4168_v35 }
 0x4a8   : > { %3883 = vmatpush.bf16.msrb.mxu1 %v4139_v21  ;;  %v4360_v21 = vld [vmem:[#allocation2 + $0x298] sm:$0xf0] }
 0x4a9   : > { %3844 = vmatpush.bf16.msra.mxu3 %v4263_v59  ;;  %3896 = vmatpush.bf16.msrb.mxu2 %v4267_v5  ;;  %v4392_v59 = vld [vmem:[#allocation2 + $0x2d8] sm:$0xf0]  ;;  %v4363_v2 = vor.u32 %v4596_v61, %v4360_v21 }
 0x4aa   : > { %v4395_v5 = vor.u32 %v4604_v58, %v4392_v59 }
 0x4ac   : > { %3884 = vmatpush.bf16.msrb.mxu1 %v4123_v40  ;;  %v4331_v40 = vor.u32 %v4588_v7, %v4328_v15 }
 0x4ad   : > { %3845 = vmatpush.bf16.msra.mxu3 %v4247_v56  ;;  %3897 = vmatpush.bf16.msrb.mxu2 %v4251_v43  ;;  %v4344_v56 = vld [vmem:[#allocation2 + $0x278] sm:$0xf0] }
 0x4ae   : > { %v4347_v43 = vor.u32 %v4592_v32, %v4344_v56 }
 0x4b0   : > { %3885 = vmatpush.bf16.msrb.mxu1 %v4107_v26 }
 0x4b1   : > { %3846 = vmatpush.bf16.msra.mxu3 %v4231_v22  ;;  %3898 = vmatpush.bf16.msrb.mxu2 %v4235_v19  ;;  %v3735_v22 = vpop.f32.mrf.mxu0  ;;  %v3748_v19 = vpop.f32.mrf.mxu1 }
 0x4b4   : > { %3886 = vmatpush.bf16.msrb.mxu1 %v4091_v63 }
 0x4b5   : > { %3847 = vmatpush.bf16.msra.mxu3 %v4215_v39  ;;  %3899 = vmatpush.bf16.msrb.mxu2 %v4219_v16 }
 0x4b8   : > { %3887 = vmatpush.bf16.msrb.mxu1 %v4075_v14 }
 0x4b9   : > { %3848 = vmatpush.bf16.msra.mxu3 %v4199_v38  ;;  %3900 = vmatpush.bf16.msrb.mxu2 %v4203_v30  ;;  %v3750_v20 = vpop.f32.mrf.mxu1  ;;  %v3737_v26 = vpop.f32.mrf.mxu0 }
 0x4bc   : > { %3888 = vmatpush.bf16.msrb.mxu1 %v4059_v44 }
 0x4bd   : > { %3849 = vmatpush.bf16.msra.mxu3 %v4183_v31  ;;  %3901 = vmatpush.bf16.msrb.mxu2 %v4187_v25 }
 0x4c0   : > { %3889 = vmatpush.bf16.msrb.mxu1 %v4043_v29 }
 0x4c1   : > { %3850 = vmatpush.bf16.msra.mxu3 %v4167_v50  ;;  %3902 = vmatpush.bf16.msrb.mxu2 %v4171_v9  ;;  %v3800_v45 = vpop.f32.mrf.mxu0 }
 0x4c3   : > { %3890 = vmatmul.bf16.vlgmr.msrb.gmra.mxu1 %v5798_v13  ;;  %v4299_v13 = vor.u32 %v4580_v41, %v4296_v10 }
 0x4c4   : > { %3851 = vmatmul.bf16.vlgmr.msra.gmra.mxu3 %v6016_v36  ;;  %3903 = vmatmul.bf16.vlgmr.msrb.gmra.mxu2 %v6016_v36  ;;  %v4312_v36 = vld [vmem:[#allocation2 + $0x238] sm:$0xf0] }
 0x4c5   : > { %3908 = vmatpush.bf16.msrb.mxu3 %v4411_v62  ;;  %v4315_v33 = vor.u32 %v4584_v3, %v4312_v36 }
 0x4c9   : > { %3909 = vmatpush.bf16.msrb.mxu3 %v4395_v5  ;;  %v3802_v63 = vpop.f32.mrf.mxu0 }
 0x4cd   : > { %3910 = vmatpush.bf16.msrb.mxu3 %v4379_v6  ;;  %v3813_v51 = vpop.f32.mrf.mxu1 }
 0x4d1   : > { %3911 = vmatpush.bf16.msrb.mxu3 %v4363_v2  ;;  %v3865_v30 = vpop.f32.mrf.mxu0 }
 0x4d3   : > { %v3761_v49 = vpop.f32.mrf.mxu2 }
 0x4d5   : > { %3912 = vmatpush.bf16.msrb.mxu3 %v4347_v43  ;;  %v3815_v39 = vpop.f32.mrf.mxu1 }
 0x4d9   : > { %3913 = vmatpush.bf16.msrb.mxu3 %v4331_v40  ;;  %v3867_v8 = vpop.f32.mrf.mxu0 }
 0x4db   : > { %v3763_v1 = vpop.f32.mrf.mxu2 }
 0x4dd   : > { %3914 = vmatpush.bf16.msrb.mxu3 %v4315_v33 }
 0x4e1   : > { %3915 = vmatpush.bf16.msrb.mxu3 %v4299_v13 }
 0x4e4   : > { %3916 = vmatmul.bf16.vlgmr.msrb.gmra.mxu3 %v6061_v11 }
 0x4f8   : > { %v3085_v17 = vpop.permute.xlu1 %3084 }
 0x4f9   : > { %v3736_v60 = vadd.f32 %v3735_v22, %v3085_v17 }
 0x4fb   : > { %v3749_v16 = vadd.f32 %v3748_v19, %v3736_v60 }
 0x4fd   : > { %v3762_v23 = vadd.f32 %v3761_v49, %v3749_v16 }
 0x507   : > { %v3774_v27 = vpop.f32.mrf.mxu3  ;;  %v3826_v0 = vpop.f32.mrf.mxu2 }
 0x508   : > { %v3775_v11 = vadd.f32 %v3774_v27, %v3762_v23 }
 0x50a   : > { %3934 = vst [vmem:[%s6185_s17] sm:$0xff] %v3775_v11 }
 0x50f   : > { %v3776_v34 = vpop.f32.mrf.mxu3  ;;  %v3828_v42 = vpop.f32.mrf.mxu2 }
 0x520   : > { %v3878_v38 = vpop.f32.mrf.mxu1  ;;  %v3930_v57 = vpop.f32.mrf.mxu0 }
 0x527   : > { %v3787_v52 = vpop.f32.mrf.mxu3 }
 0x528   : > { %v3788_v12 = vadd.f32 %v3787_v52, %v3085_v17  ;;  %v3880_v53 = vpop.f32.mrf.mxu1  ;;  %v3932_v4 = vpop.f32.mrf.mxu0 }
 0x529   : > { %v3839_v18 = vpop.f32.mrf.mxu2 }
 0x52a   : > { %v3801_v48 = vadd.f32 %v3800_v45, %v3788_v12  ;;  %v3840_v44 = vadd.f32 %v3839_v18, %v3085_v17 }
 0x52c   : > { %v3814_v14 = vadd.f32 %v3813_v51, %v3801_v48 }
 0x52e   : > { %v3827_v31 = vadd.f32 %v3826_v0, %v3814_v14 }
 0x52f   : > { %v3789_v25 = vpop.f32.mrf.mxu3 }
 0x530   : > { %3935 = vst [vmem:[%s6185_s17 + $0x8] sm:$0xff] %v3827_v31 }
 0x531   : > { %v3841_v47 = vpop.f32.mrf.mxu2 }
 0x540   : > { %v3891_v35 = vpop.f32.mrf.mxu1 }
 0x541   : > { %v3892_v58 = vadd.f32 %v3891_v35, %v3085_v17 }
 0x547   : > { %v3852_v24 = vpop.f32.mrf.mxu3  ;;  %v3904_v55 = vpop.f32.mrf.mxu2 }
 0x548   : > { %v3853_v46 = vadd.f32 %v3852_v24, %v3840_v44  ;;  %v3893_v50 = vpop.f32.mrf.mxu1  ;;  %v3905_v59 = vadd.f32 %v3904_v55, %v3892_v58 }
 0x54a   : > { %v3866_v28 = vadd.f32 %v3865_v30, %v3853_v46 }
 0x54c   : > { %v3879_v9 = vadd.f32 %v3878_v38, %v3866_v28 }
 0x54e   : > { %3936 = vst [vmem:[%s6185_s17 + $0x10] sm:$0xff] %v3879_v9 }
 0x54f   : > { %v3854_v62 = vpop.f32.mrf.mxu3  ;;  %v3906_v29 = vpop.f32.mrf.mxu2 }
 0x567   : > { %v3917_v5 = vpop.f32.mrf.mxu3 }
 0x568   : > { %v3918_v37 = vadd.f32 %v3917_v5, %v3905_v59 }
 0x56a   : > { %v3931_v54 = vadd.f32 %v3930_v57, %v3918_v37 }
 0x56c   : > { %3938 = vst.msk [vmem:[%s6185_s17 + $0x18] sm:$0xff] %vm3937_vm15, %v3931_v54 }
 0x56f   : > { %v3919_v6 = vpop.f32.mrf.mxu3 }
 0x570 PF: > { %s13_s14 = sadd.s32 1, %s4751_s14   ;;  %s6403_s12 = smov %s4747_s13 }
 0x571   : > { %p10_p5 = scmp.ge.s32.totalorder %s13_s14, 4   ;;  %s6404_s13 = smov %s6406_s15 }
 0x573   :  { %12 = sbr.rel (!%p10_p5) target bundleno = 2 (0x2), region = 144 }

</bundles_post_ra>
